<compile_context>
chip_gen: v7x
topology: tpu7x:2x2x1
jax: 0.10.0
libtpu: 0.0.40
codegen_flags: <defaults>
</compile_context>

<pallas_src>
import jax
import jax.numpy as jnp
from jax.experimental import pallas as pl
from jax.experimental.pallas import tpu as pltpu

EPS = 1e-5   # nn.BatchNorm2d default eps
PAD = 128    # lane halo around y1 in the conv2 scratch; must be >= W+1 = 29


def _bn(y):
    """BatchNorm2d, training-mode batch stats (gamma=1, beta=0), channel-major (C, M).

    Single-pass statistics: sum and sum-of-squares, var = E[x^2] - mean^2.
    """
    n = y.shape[1]
    s = jnp.sum(y, axis=1, keepdims=True)
    ss = jnp.sum(y * y, axis=1, keepdims=True)
    mean = s * (1.0 / n)
    var = jnp.maximum(ss * (1.0 / n) - mean * mean, 0.0)
    return (y - mean) * jax.lax.rsqrt(var + EPS)


def _make_bottleneck_kernel(N, H, W, C):
    M = N * H * W
    # flat-row offset of each 3x3 tap (dh, dw) relative to the output pixel
    taps = [((dh - 1) * W + (dw - 1), dh, dw) for dh in range(3) for dw in range(3)]

    def kernel(xt_ref, w1_ref, w2_ref, w3_ref, o_ref, y1pad_ref, win_ref):
        # ---- conv1 (1x1) + bn1 + relu, channel-major ------------------------
        y1 = jnp.dot(w1_ref[...], xt_ref[...],
                     preferred_element_type=jnp.float32)                 # (C, M)
        y1 = jnp.maximum(_bn(y1), 0.0)

        # Stage y1 into a zero lane-halo scratch: tap (dh, dw) is the static
        # lane window [PAD + off, PAD + off + M).
        y1pad_ref[:, :PAD] = jnp.zeros((C, PAD), jnp.float32)
        y1pad_ref[:, PAD + M:] = jnp.zeros((C, PAD), jnp.float32)
        y1pad_ref[:, PAD:PAD + M] = y1

        # ---- conv2 (3x3, pad=1) + bn2 + relu --------------------------------
        # Boundary masks from an in-kernel lane iota (no HBM masks array);
        # hoisted above the tap loop.
        midx = jax.lax.broadcasted_iota(jnp.int32, (1, M), 1)
        wi = midx % W                      # column within the image
        ri = midx % (H * W)                # flat pixel index within the image
        h_ok = (ri >= W, ri >= 0, ri < (H - 1) * W)     # dh = 0, 1, 2
        w_ok = (wi >= 1, wi >= 0, wi <= W - 2)          # dw = 0, 1, 2

        # Stack the 9 masked tap windows into a (9C, M) scratch, then ONE
        # K = 9C GEMM (masking via jnp.where also ignores halo garbage).
        for t, (off, dh, dw) in enumerate(taps):
            win = y1pad_ref[:, PAD + off:PAD + off + M]                   # (C, M)
            win_ref[t * C:(t + 1) * C, :] = jnp.where(h_ok[dh] & w_ok[dw], win, 0.0)

        y2 = jnp.dot(w2_ref[...], win_ref[...],
                     preferred_element_type=jnp.float32)                 # (C, M)
        y2 = jnp.maximum(_bn(y2), 0.0)

        # ---- conv3 (1x1) + bn3 + residual add + relu ------------------------
        y3 = jnp.dot(w3_ref[...], y2, preferred_element_type=jnp.float32)  # (4C, M)
        o_ref[...] = jnp.maximum(_bn(y3) + xt_ref[...], 0.0)

    return kernel


def block_forward(x_nchw, w1, w2, w3):
    """Fused forward of the ResNet50 bottleneck block (identity_downsample=None)."""
    N, Cin, H, W = x_nchw.shape
    C = w1.shape[0]          # out_channels
    Cexp = w3.shape[0]       # out_channels * 4
    assert H == 28 and W == 28, "F.interpolate(size=(28,28)) + residual add forces 28x28"
    assert Cin == Cexp, "residual add requires in_channels == 4 * out_channels"
    M = N * H * W

    # Channel-major lane-dense layout: xt[c, n*H*W + h*W + w] = x[n, c, h, w].
    xt = jnp.transpose(x_nchw.reshape(N, Cin, H * W), (1, 0, 2)).reshape(Cin, M)
    w1m = w1[:, :, 0, 0]                                       # (C, Cin)
    w2m = jnp.transpose(w2, (0, 2, 3, 1)).reshape(C, 9 * C)    # (C, 9C): [co, t*C + ci]
    w3m = w3[:, :, 0, 0]                                       # (Cexp, C)

    flops = 2 * M * (Cin * C + 9 * C * C + C * Cexp)
    bytes_accessed = 4 * (Cin * M + Cexp * M + Cin * C + 9 * C * C + Cexp * C)

    yt = pl.pallas_call(
        _make_bottleneck_kernel(N, H, W, C),
        out_shape=jax.ShapeDtypeStruct((Cexp, M), jnp.float32),
        grid=(1,),
        in_specs=[pl.BlockSpec((Cin, M), lambda i: (0, 0)),
                  pl.BlockSpec((C, Cin), lambda i: (0, 0)),
                  pl.BlockSpec((C, 9 * C), lambda i: (0, 0)),
                  pl.BlockSpec((Cexp, C), lambda i: (0, 0))],
        out_specs=pl.BlockSpec((Cexp, M), lambda i: (0, 0)),
        scratch_shapes=[pltpu.VMEM((C, M + 2 * PAD), jnp.float32),   # lane-haloed y1
                        pltpu.VMEM((9 * C, M), jnp.float32)],        # stacked tap windows
        compiler_params=pltpu.CompilerParams(
            dimension_semantics=("arbitrary",),
            vmem_limit_bytes=4 * 1024 * 1024),
        cost_estimate=pl.CostEstimate(flops=flops,
                                      transcendentals=2 * C + Cexp,
                                      bytes_accessed=bytes_accessed),
    )(xt, w1m, w2m, w3m)

    # TODO(synk): at production ResNet shapes (M = N*56*56, C >= 256) tile M on a
    # "parallel" grid axis (uses both v7x TensorCores) with a two-pass BN
    # (per-tile sum/sumsq partials + finalize) and re-derive tile sizes against
    # v7x's 64 MiB VMEM.
    return jnp.transpose(yt.reshape(Cexp, N, H, W), (1, 0, 2, 3))


# ------------------------- pure-JAX reference check -------------------------

def _bn_ref(y):
    mean = y.mean(axis=0, keepdims=True)
    var = jnp.square(y - mean).mean(axis=0, keepdims=True)
    return (y - mean) / jnp.sqrt(var + EPS)


def _im2col3x3(x_nhwc):
    N, H, W, C = x_nhwc.shape
    xp = jnp.pad(x_nhwc, ((0, 0), (1, 1), (1, 1), (0, 0)))
    cols = [xp[:, dh:dh + H, dw:dw + W, :] for dh in range(3) for dw in range(3)]
    return jnp.stack(cols, axis=-2).reshape(N * H * W, 9 * C)


def ref_forward(x_nchw, w1, w2, w3):
    N, Cin, H, W = x_nchw.shape
    C = w1.shape[0]
    Cexp = w3.shape[0]
    M = N * H * W
    x = jnp.transpose(x_nchw, (0, 2, 3, 1))                            # NHWC
    y1 = jnp.maximum(_bn_ref(x.reshape(M, Cin) @ w1[:, :, 0, 0].T), 0.0)
    p = _im2col3x3(y1.reshape(N, H, W, C))
    y2 = jnp.maximum(_bn_ref(p @ jnp.transpose(w2, (2, 3, 1, 0)).reshape(9 * C, C)), 0.0)
    y3 = _bn_ref(y2 @ w3[:, :, 0, 0].T)
    y3 = jnp.maximum(y3 + x.reshape(M, Cexp), 0.0)   # interpolate to (28,28) is identity here
    return jnp.transpose(y3.reshape(N, H, W, Cexp), (0, 3, 1, 2))


# ---------------------------------- main ------------------------------------

if __name__ == "__main__":
    key = jax.random.PRNGKey(0)
    k_x, k1, k2, k3 = jax.random.split(key, 4)

    out_channels = 4
    expansion = 4
    in_channels = out_channels * expansion        # residual add requires Cin == 4*C
    N, H, W = 2, 28, 28                           # 28x28 forced by interpolate(size=(28,28))

    x = jax.random.normal(k_x, (N, in_channels, H, W), dtype=jnp.float32)

    # kaiming_normal_(mode='fan_out', nonlinearity='relu'): std = sqrt(2 / fan_out)
    def kaiming(k, shape):
        fan_out = shape[0] * shape[2] * shape[3]
        return jax.random.normal(k, shape, dtype=jnp.float32) * jnp.sqrt(2.0 / fan_out)

    w1 = kaiming(k1, (out_channels, in_channels, 1, 1))
    w2 = kaiming(k2, (out_channels, out_channels, 3, 3))
    w3 = kaiming(k3, (out_channels * expansion, out_channels, 1, 1))
    # BatchNorm gamma=1, beta=0 (constant init) -> pure normalization, no affine params.

    out = jax.jit(block_forward)(x, w1, w2, w3)
    out = jax.block_until_ready(out)

    ref = ref_forward(x, w1, w2, w3)
    assert out.shape == (N, out_channels * expansion, H, W)
    assert bool(jnp.allclose(out, ref, atol=1e-2, rtol=1e-2)), "mismatch vs JAX reference"

    print("KERNEL_OK")
</pallas_src>

<mosaic_0001>
module attributes {stable_mosaic.version = 11 : i64} {
  func.func @kernel(%arg0: i32, %arg1: memref<16x1568xf32, #tpu.memory_space<vmem>>, %arg2: memref<4x16xf32, #tpu.memory_space<vmem>>, %arg3: memref<4x36xf32, #tpu.memory_space<vmem>>, %arg4: memref<16x4xf32, #tpu.memory_space<vmem>>, %arg5: memref<16x1568xf32, #tpu.memory_space<vmem>>, %arg6: memref<4x1824xf32, #tpu.memory_space<vmem>>, %arg7: memref<36x1568xf32, #tpu.memory_space<vmem>>) attributes {dimension_semantics = [#tpu.dimension_semantics<arbitrary>], iteration_bounds = array<i64: 1>, scalar_prefetch = 0 : i64, scratch_operands = 2 : i64, tpu.core_type = #tpu.core_type<tc>, window_params = [{pipeline_mode = #tpu.pipeline_mode<synchronous>, transform_indices = @transform_0, window_bounds = array<i64: 16, 1568>}, {pipeline_mode = #tpu.pipeline_mode<synchronous>, transform_indices = @transform_1, window_bounds = array<i64: 4, 16>}, {pipeline_mode = #tpu.pipeline_mode<synchronous>, transform_indices = @transform_2, window_bounds = array<i64: 4, 36>}, {pipeline_mode = #tpu.pipeline_mode<synchronous>, transform_indices = @transform_3, window_bounds = array<i64: 16, 4>}, {pipeline_mode = #tpu.pipeline_mode<synchronous>, transform_indices = @transform_4, window_bounds = array<i64: 16, 1568>}]} {
    %c0 = arith.constant 0 : index
    %c0_0 = arith.constant 0 : index
    %0 = vector.load %arg2[%c0, %c0_0] : memref<4x16xf32, #tpu.memory_space<vmem>>, vector<4x16xf32>
    %c0_1 = arith.constant 0 : index
    %c0_2 = arith.constant 0 : index
    %1 = vector.load %arg1[%c0_1, %c0_2] : memref<16x1568xf32, #tpu.memory_space<vmem>>, vector<16x1568xf32>
    %cst = arith.constant dense<0.000000e+00> : vector<4x1568xf32>
    %2 = tpu.matmul %0, %1, %cst {dimension_numbers = #tpu.dot_dimension_numbers<[1], [0], [0], [1], [0, 0, 1, 1], [], []>} : vector<4x16xf32>, vector<16x1568xf32>, vector<4x1568xf32> -> vector<4x1568xf32>
    %cst_3 = arith.constant dense<0.000000e+00> : vector<4xf32>
    %3 = vector.multi_reduction <add>, %2, %cst_3 [1] : vector<4x1568xf32> to vector<4xf32>
    %4 = vector.shape_cast %3 : vector<4xf32> to vector<4x1xf32>
    %5 = arith.mulf %2, %2 : vector<4x1568xf32>
    %cst_4 = arith.constant dense<0.000000e+00> : vector<4xf32>
    %6 = vector.multi_reduction <add>, %5, %cst_4 [1] : vector<4x1568xf32> to vector<4xf32>
    %7 = vector.shape_cast %6 : vector<4xf32> to vector<4x1xf32>
    %cst_5 = arith.constant 6.37755089E-4 : f32
    %8 = vector.broadcast %cst_5 : f32 to vector<4x1xf32>
    %9 = arith.mulf %4, %8 : vector<4x1xf32>
    %cst_6 = arith.constant 6.37755089E-4 : f32
    %10 = vector.broadcast %cst_6 : f32 to vector<4x1xf32>
    %11 = arith.mulf %7, %10 : vector<4x1xf32>
    %12 = arith.mulf %9, %9 : vector<4x1xf32>
    %13 = arith.subf %11, %12 : vector<4x1xf32>
    %cst_7 = arith.constant 0.000000e+00 : f32
    %14 = vector.broadcast %cst_7 : f32 to vector<4x1xf32>
    %15 = arith.maximumf %13, %14 : vector<4x1xf32>
    %16 = vector.broadcast %9 : vector<4x1xf32> to vector<4x1568xf32>
    %17 = arith.subf %2, %16 : vector<4x1568xf32>
    %cst_8 = arith.constant 9.99999974E-6 : f32
    %18 = vector.broadcast %cst_8 : f32 to vector<4x1xf32>
    %19 = arith.addf %15, %18 : vector<4x1xf32>
    %20 = math.rsqrt %19 : vector<4x1xf32>
    %21 = vector.broadcast %20 : vector<4x1xf32> to vector<4x1568xf32>
    %22 = arith.mulf %17, %21 : vector<4x1568xf32>
    %cst_9 = arith.constant 0.000000e+00 : f32
    %23 = vector.broadcast %cst_9 : f32 to vector<4x1568xf32>
    %24 = arith.maximumf %22, %23 : vector<4x1568xf32>
    %cst_10 = arith.constant 0.000000e+00 : f32
    %25 = vector.broadcast %cst_10 : f32 to vector<4x128xf32>
    %c0_11 = arith.constant 0 : index
    %c0_12 = arith.constant 0 : index
    %26 = vector.load %arg6[%c0_11, %c0_12] : memref<4x1824xf32, #tpu.memory_space<vmem>>, vector<4x128xf32>
    tpu.vector_store %arg6[%c0_11, %c0_12], %25 {strides = array<i32>} : memref<4x1824xf32, #tpu.memory_space<vmem>>, vector<4x128xf32>,
    %cst_13 = arith.constant 0.000000e+00 : f32
    %27 = vector.broadcast %cst_13 : f32 to vector<4x128xf32>
    %c0_14 = arith.constant 0 : index
    %c1696 = arith.constant 1696 : index
    %28 = vector.load %arg6[%c0_14, %c1696] : memref<4x1824xf32, #tpu.memory_space<vmem>>, vector<4x128xf32>
    tpu.vector_store %arg6[%c0_14, %c1696], %27 {strides = array<i32>} : memref<4x1824xf32, #tpu.memory_space<vmem>>, vector<4x128xf32>,
    %c0_15 = arith.constant 0 : index
    %c128 = arith.constant 128 : index
    %29 = vector.load %arg6[%c0_15, %c128] : memref<4x1824xf32, #tpu.memory_space<vmem>>, vector<4x1568xf32>
    tpu.vector_store %arg6[%c0_15, %c128], %24 {strides = array<i32>} : memref<4x1824xf32, #tpu.memory_space<vmem>>, vector<4x1568xf32>,
    %30 = tpu.iota {dimensions = array<i32: 1>} : vector<1x1568xi32>
    %c28_i32 = arith.constant 28 : i32
    %c0_i32 = arith.constant 0 : i32
    %31 = arith.cmpi eq, %c28_i32, %c0_i32 : i32
    %c1_i32 = arith.constant 1 : i32
    %32 = arith.select %31, %c1_i32, %c28_i32 : i32
    %33 = vector.broadcast %32 : i32 to vector<1x1568xi32>
    %34 = arith.remsi %30, %33 : vector<1x1568xi32>
    %c0_i32_16 = arith.constant 0 : i32
    %35 = vector.broadcast %c0_i32_16 : i32 to vector<1x1568xi32>
    %36 = arith.cmpi ne, %34, %35 : vector<1x1568xi32>
    %c0_i32_17 = arith.constant 0 : i32
    %37 = vector.broadcast %c0_i32_17 : i32 to vector<1x1568xi32>
    %38 = arith.cmpi slt, %34, %37 : vector<1x1568xi32>
    %c0_i32_18 = arith.constant 0 : i32
    %39 = arith.cmpi slt, %32, %c0_i32_18 : i32
    %40 = vector.broadcast %39 : i1 to vector<1x1568xi1>
    %41 = vector.broadcast %40 : vector<1x1568xi1> to vector<1x1568xi1>
    %42 = arith.xori %38, %41 : vector<1x1568xi1>
    %43 = arith.andi %42, %36 : vector<1x1568xi1>
    %44 = vector.broadcast %32 : i32 to vector<1x1568xi32>
    %45 = arith.addi %34, %44 : vector<1x1568xi32>
    %46 = arith.select %43, %45, %34 : vector<1x1568xi1>, vector<1x1568xi32>
    %c784_i32 = arith.constant 784 : i32
    %c0_i32_19 = arith.constant 0 : i32
    %47 = arith.cmpi eq, %c784_i32, %c0_i32_19 : i32
    %c1_i32_20 = arith.constant 1 : i32
    %48 = arith.select %47, %c1_i32_20, %c784_i32 : i32
    %49 = vector.broadcast %48 : i32 to vector<1x1568xi32>
    %50 = arith.remsi %30, %49 : vector<1x1568xi32>
    %c0_i32_21 = arith.constant 0 : i32
    %51 = vector.broadcast %c0_i32_21 : i32 to vector<1x1568xi32>
    %52 = arith.cmpi ne, %50, %51 : vector<1x1568xi32>
    %c0_i32_22 = arith.constant 0 : i32
    %53 = vector.broadcast %c0_i32_22 : i32 to vector<1x1568xi32>
    %54 = arith.cmpi slt, %50, %53 : vector<1x1568xi32>
    %c0_i32_23 = arith.constant 0 : i32
    %55 = arith.cmpi slt, %48, %c0_i32_23 : i32
    %56 = vector.broadcast %55 : i1 to vector<1x1568xi1>
    %57 = vector.broadcast %56 : vector<1x1568xi1> to vector<1x1568xi1>
    %58 = arith.xori %54, %57 : vector<1x1568xi1>
    %59 = arith.andi %58, %52 : vector<1x1568xi1>
    %60 = vector.broadcast %48 : i32 to vector<1x1568xi32>
    %61 = arith.addi %50, %60 : vector<1x1568xi32>
    %62 = arith.select %59, %61, %50 : vector<1x1568xi1>, vector<1x1568xi32>
    %c28_i32_24 = arith.constant 28 : i32
    %63 = vector.broadcast %c28_i32_24 : i32 to vector<1x1568xi32>
    %64 = arith.cmpi sge, %62, %63 : vector<1x1568xi32>
    %c0_i32_25 = arith.constant 0 : i32
    %65 = vector.broadcast %c0_i32_25 : i32 to vector<1x1568xi32>
    %66 = arith.cmpi sge, %62, %65 : vector<1x1568xi32>
    %c756_i32 = arith.constant 756 : i32
    %67 = vector.broadcast %c756_i32 : i32 to vector<1x1568xi32>
    %68 = arith.cmpi slt, %62, %67 : vector<1x1568xi32>
    %c1_i32_26 = arith.constant 1 : i32
    %69 = vector.broadcast %c1_i32_26 : i32 to vector<1x1568xi32>
    %70 = arith.cmpi sge, %46, %69 : vector<1x1568xi32>
    %c0_i32_27 = arith.constant 0 : i32
    %71 = vector.broadcast %c0_i32_27 : i32 to vector<1x1568xi32>
    %72 = arith.cmpi sge, %46, %71 : vector<1x1568xi32>
    %c26_i32 = arith.constant 26 : i32
    %73 = vector.broadcast %c26_i32 : i32 to vector<1x1568xi32>
    %74 = arith.cmpi sle, %46, %73 : vector<1x1568xi32>
    %c0_28 = arith.constant 0 : index
    %c99 = arith.constant 99 : index
    %75 = vector.load %arg6[%c0_28, %c99] : memref<4x1824xf32, #tpu.memory_space<vmem>>, vector<4x1568xf32>
    %76 = arith.andi %64, %70 : vector<1x1568xi1>
    %cst_29 = arith.constant 0.000000e+00 : f32
    %77 = vector.shape_cast %76 : vector<1x1568xi1> to vector<1x1568xi1>
    %78 = vector.broadcast %77 : vector<1x1568xi1> to vector<4x1568xi1>
    %79 = vector.broadcast %cst_29 : f32 to vector<4x1568xf32>
    %80 = arith.select %78, %75, %79 : vector<4x1568xi1>, vector<4x1568xf32>
    %c0_30 = arith.constant 0 : index
    %c0_31 = arith.constant 0 : index
    %81 = vector.load %arg7[%c0_30, %c0_31] : memref<36x1568xf32, #tpu.memory_space<vmem>>, vector<4x1568xf32>
    tpu.vector_store %arg7[%c0_30, %c0_31], %80 {strides = array<i32>} : memref<36x1568xf32, #tpu.memory_space<vmem>>, vector<4x1568xf32>,
    %c0_32 = arith.constant 0 : index
    %c100 = arith.constant 100 : index
    %82 = vector.load %arg6[%c0_32, %c100] : memref<4x1824xf32, #tpu.memory_space<vmem>>, vector<4x1568xf32>
    %83 = arith.andi %64, %72 : vector<1x1568xi1>
    %cst_33 = arith.constant 0.000000e+00 : f32
    %84 = vector.shape_cast %83 : vector<1x1568xi1> to vector<1x1568xi1>
    %85 = vector.broadcast %84 : vector<1x1568xi1> to vector<4x1568xi1>
    %86 = vector.broadcast %cst_33 : f32 to vector<4x1568xf32>
    %87 = arith.select %85, %82, %86 : vector<4x1568xi1>, vector<4x1568xf32>
    %c4 = arith.constant 4 : index
    %c0_34 = arith.constant 0 : index
    %88 = vector.load %arg7[%c4, %c0_34] : memref<36x1568xf32, #tpu.memory_space<vmem>>, vector<4x1568xf32>
    tpu.vector_store %arg7[%c4, %c0_34], %87 {strides = array<i32>} : memref<36x1568xf32, #tpu.memory_space<vmem>>, vector<4x1568xf32>,
    %c0_35 = arith.constant 0 : index
    %c101 = arith.constant 101 : index
    %89 = vector.load %arg6[%c0_35, %c101] : memref<4x1824xf32, #tpu.memory_space<vmem>>, vector<4x1568xf32>
    %90 = arith.andi %64, %74 : vector<1x1568xi1>
    %cst_36 = arith.constant 0.000000e+00 : f32
    %91 = vector.shape_cast %90 : vector<1x1568xi1> to vector<1x1568xi1>
    %92 = vector.broadcast %91 : vector<1x1568xi1> to vector<4x1568xi1>
    %93 = vector.broadcast %cst_36 : f32 to vector<4x1568xf32>
    %94 = arith.select %92, %89, %93 : vector<4x1568xi1>, vector<4x1568xf32>
    %c8 = arith.constant 8 : index
    %c0_37 = arith.constant 0 : index
    %95 = vector.load %arg7[%c8, %c0_37] : memref<36x1568xf32, #tpu.memory_space<vmem>>, vector<4x1568xf32>
    tpu.vector_store %arg7[%c8, %c0_37], %94 {strides = array<i32>} : memref<36x1568xf32, #tpu.memory_space<vmem>>, vector<4x1568xf32>,
    %c0_38 = arith.constant 0 : index
    %c127 = arith.constant 127 : index
    %96 = vector.load %arg6[%c0_38, %c127] : memref<4x1824xf32, #tpu.memory_space<vmem>>, vector<4x1568xf32>
    %97 = arith.andi %66, %70 : vector<1x1568xi1>
    %cst_39 = arith.constant 0.000000e+00 : f32
    %98 = vector.shape_cast %97 : vector<1x1568xi1> to vector<1x1568xi1>
    %99 = vector.broadcast %98 : vector<1x1568xi1> to vector<4x1568xi1>
    %100 = vector.broadcast %cst_39 : f32 to vector<4x1568xf32>
    %101 = arith.select %99, %96, %100 : vector<4x1568xi1>, vector<4x1568xf32>
    %c12 = arith.constant 12 : index
    %c0_40 = arith.constant 0 : index
    %102 = vector.load %arg7[%c12, %c0_40] : memref<36x1568xf32, #tpu.memory_space<vmem>>, vector<4x1568xf32>
    tpu.vector_store %arg7[%c12, %c0_40], %101 {strides = array<i32>} : memref<36x1568xf32, #tpu.memory_space<vmem>>, vector<4x1568xf32>,
    %c0_41 = arith.constant 0 : index
    %c128_42 = arith.constant 128 : index
    %103 = vector.load %arg6[%c0_41, %c128_42] : memref<4x1824xf32, #tpu.memory_space<vmem>>, vector<4x1568xf32>
    %104 = arith.andi %66, %72 : vector<1x1568xi1>
    %cst_43 = arith.constant 0.000000e+00 : f32
    %105 = vector.shape_cast %104 : vector<1x1568xi1> to vector<1x1568xi1>
    %106 = vector.broadcast %105 : vector<1x1568xi1> to vector<4x1568xi1>
    %107 = vector.broadcast %cst_43 : f32 to vector<4x1568xf32>
    %108 = arith.select %106, %103, %107 : vector<4x1568xi1>, vector<4x1568xf32>
    %c16 = arith.constant 16 : index
    %c0_44 = arith.constant 0 : index
    %109 = vector.load %arg7[%c16, %c0_44] : memref<36x1568xf32, #tpu.memory_space<vmem>>, vector<4x1568xf32>
    tpu.vector_store %arg7[%c16, %c0_44], %108 {strides = array<i32>} : memref<36x1568xf32, #tpu.memory_space<vmem>>, vector<4x1568xf32>,
    %c0_45 = arith.constant 0 : index
    %c129 = arith.constant 129 : index
    %110 = vector.load %arg6[%c0_45, %c129] : memref<4x1824xf32, #tpu.memory_space<vmem>>, vector<4x1568xf32>
    %111 = arith.andi %66, %74 : vector<1x1568xi1>
    %cst_46 = arith.constant 0.000000e+00 : f32
    %112 = vector.shape_cast %111 : vector<1x1568xi1> to vector<1x1568xi1>
    %113 = vector.broadcast %112 : vector<1x1568xi1> to vector<4x1568xi1>
    %114 = vector.broadcast %cst_46 : f32 to vector<4x1568xf32>
    %115 = arith.select %113, %110, %114 : vector<4x1568xi1>, vector<4x1568xf32>
    %c20 = arith.constant 20 : index
    %c0_47 = arith.constant 0 : index
    %116 = vector.load %arg7[%c20, %c0_47] : memref<36x1568xf32, #tpu.memory_space<vmem>>, vector<4x1568xf32>
    tpu.vector_store %arg7[%c20, %c0_47], %115 {strides = array<i32>} : memref<36x1568xf32, #tpu.memory_space<vmem>>, vector<4x1568xf32>,
    %c0_48 = arith.constant 0 : index
    %c155 = arith.constant 155 : index
    %117 = vector.load %arg6[%c0_48, %c155] : memref<4x1824xf32, #tpu.memory_space<vmem>>, vector<4x1568xf32>
    %118 = arith.andi %68, %70 : vector<1x1568xi1>
    %cst_49 = arith.constant 0.000000e+00 : f32
    %119 = vector.shape_cast %118 : vector<1x1568xi1> to vector<1x1568xi1>
    %120 = vector.broadcast %119 : vector<1x1568xi1> to vector<4x1568xi1>
    %121 = vector.broadcast %cst_49 : f32 to vector<4x1568xf32>
    %122 = arith.select %120, %117, %121 : vector<4x1568xi1>, vector<4x1568xf32>
    %c24 = arith.constant 24 : index
    %c0_50 = arith.constant 0 : index
    %123 = vector.load %arg7[%c24, %c0_50] : memref<36x1568xf32, #tpu.memory_space<vmem>>, vector<4x1568xf32>
    tpu.vector_store %arg7[%c24, %c0_50], %122 {strides = array<i32>} : memref<36x1568xf32, #tpu.memory_space<vmem>>, vector<4x1568xf32>,
    %c0_51 = arith.constant 0 : index
    %c156 = arith.constant 156 : index
    %124 = vector.load %arg6[%c0_51, %c156] : memref<4x1824xf32, #tpu.memory_space<vmem>>, vector<4x1568xf32>
    %125 = arith.andi %68, %72 : vector<1x1568xi1>
    %cst_52 = arith.constant 0.000000e+00 : f32
    %126 = vector.shape_cast %125 : vector<1x1568xi1> to vector<1x1568xi1>
    %127 = vector.broadcast %126 : vector<1x1568xi1> to vector<4x1568xi1>
    %128 = vector.broadcast %cst_52 : f32 to vector<4x1568xf32>
    %129 = arith.select %127, %124, %128 : vector<4x1568xi1>, vector<4x1568xf32>
    %c28 = arith.constant 28 : index
    %c0_53 = arith.constant 0 : index
    %130 = vector.load %arg7[%c28, %c0_53] : memref<36x1568xf32, #tpu.memory_space<vmem>>, vector<4x1568xf32>
    tpu.vector_store %arg7[%c28, %c0_53], %129 {strides = array<i32>} : memref<36x1568xf32, #tpu.memory_space<vmem>>, vector<4x1568xf32>,
    %c0_54 = arith.constant 0 : index
    %c157 = arith.constant 157 : index
    %131 = vector.load %arg6[%c0_54, %c157] : memref<4x1824xf32, #tpu.memory_space<vmem>>, vector<4x1568xf32>
    %132 = arith.andi %68, %74 : vector<1x1568xi1>
    %cst_55 = arith.constant 0.000000e+00 : f32
    %133 = vector.shape_cast %132 : vector<1x1568xi1> to vector<1x1568xi1>
    %134 = vector.broadcast %133 : vector<1x1568xi1> to vector<4x1568xi1>
    %135 = vector.broadcast %cst_55 : f32 to vector<4x1568xf32>
    %136 = arith.select %134, %131, %135 : vector<4x1568xi1>, vector<4x1568xf32>
    %c32 = arith.constant 32 : index
    %c0_56 = arith.constant 0 : index
    %137 = vector.load %arg7[%c32, %c0_56] : memref<36x1568xf32, #tpu.memory_space<vmem>>, vector<4x1568xf32>
    tpu.vector_store %arg7[%c32, %c0_56], %136 {strides = array<i32>} : memref<36x1568xf32, #tpu.memory_space<vmem>>, vector<4x1568xf32>,
    %c0_57 = arith.constant 0 : index
    %c0_58 = arith.constant 0 : index
    %138 = vector.load %arg3[%c0_57, %c0_58] : memref<4x36xf32, #tpu.memory_space<vmem>>, vector<4x36xf32>
    %c0_59 = arith.constant 0 : index
    %c0_60 = arith.constant 0 : index
    %139 = vector.load %arg7[%c0_59, %c0_60] : memref<36x1568xf32, #tpu.memory_space<vmem>>, vector<36x1568xf32>
    %cst_61 = arith.constant dense<0.000000e+00> : vector<4x1568xf32>
    %140 = tpu.matmul %138, %139, %cst_61 {dimension_numbers = #tpu.dot_dimension_numbers<[1], [0], [0], [1], [0, 0, 1, 1], [], []>} : vector<4x36xf32>, vector<36x1568xf32>, vector<4x1568xf32> -> vector<4x1568xf32>
    %cst_62 = arith.constant dense<0.000000e+00> : vector<4xf32>
    %141 = vector.multi_reduction <add>, %140, %cst_62 [1] : vector<4x1568xf32> to vector<4xf32>
    %142 = vector.shape_cast %141 : vector<4xf32> to vector<4x1xf32>
    %143 = arith.mulf %140, %140 : vector<4x1568xf32>
    %cst_63 = arith.constant dense<0.000000e+00> : vector<4xf32>
    %144 = vector.multi_reduction <add>, %143, %cst_63 [1] : vector<4x1568xf32> to vector<4xf32>
    %145 = vector.shape_cast %144 : vector<4xf32> to vector<4x1xf32>
    %cst_64 = arith.constant 6.37755089E-4 : f32
    %146 = vector.broadcast %cst_64 : f32 to vector<4x1xf32>
    %147 = arith.mulf %142, %146 : vector<4x1xf32>
    %cst_65 = arith.constant 6.37755089E-4 : f32
    %148 = vector.broadcast %cst_65 : f32 to vector<4x1xf32>
    %149 = arith.mulf %145, %148 : vector<4x1xf32>
    %150 = arith.mulf %147, %147 : vector<4x1xf32>
    %151 = arith.subf %149, %150 : vector<4x1xf32>
    %cst_66 = arith.constant 0.000000e+00 : f32
    %152 = vector.broadcast %cst_66 : f32 to vector<4x1xf32>
    %153 = arith.maximumf %151, %152 : vector<4x1xf32>
    %154 = vector.broadcast %147 : vector<4x1xf32> to vector<4x1568xf32>
    %155 = arith.subf %140, %154 : vector<4x1568xf32>
    %cst_67 = arith.constant 9.99999974E-6 : f32
    %156 = vector.broadcast %cst_67 : f32 to vector<4x1xf32>
    %157 = arith.addf %153, %156 : vector<4x1xf32>
    %158 = math.rsqrt %157 : vector<4x1xf32>
    %159 = vector.broadcast %158 : vector<4x1xf32> to vector<4x1568xf32>
    %160 = arith.mulf %155, %159 : vector<4x1568xf32>
    %cst_68 = arith.constant 0.000000e+00 : f32
    %161 = vector.broadcast %cst_68 : f32 to vector<4x1568xf32>
    %162 = arith.maximumf %160, %161 : vector<4x1568xf32>
    %c0_69 = arith.constant 0 : index
    %c0_70 = arith.constant 0 : index
    %163 = vector.load %arg4[%c0_69, %c0_70] : memref<16x4xf32, #tpu.memory_space<vmem>>, vector<16x4xf32>
    %cst_71 = arith.constant dense<0.000000e+00> : vector<16x1568xf32>
    %164 = tpu.matmul %163, %162, %cst_71 {dimension_numbers = #tpu.dot_dimension_numbers<[1], [0], [0], [1], [0, 0, 1, 1], [], []>} : vector<16x4xf32>, vector<4x1568xf32>, vector<16x1568xf32> -> vector<16x1568xf32>
    %cst_72 = arith.constant dense<0.000000e+00> : vector<16xf32>
    %165 = vector.multi_reduction <add>, %164, %cst_72 [1] : vector<16x1568xf32> to vector<16xf32>
    %166 = vector.shape_cast %165 : vector<16xf32> to vector<16x1xf32>
    %167 = arith.mulf %164, %164 : vector<16x1568xf32>
    %cst_73 = arith.constant dense<0.000000e+00> : vector<16xf32>
    %168 = vector.multi_reduction <add>, %167, %cst_73 [1] : vector<16x1568xf32> to vector<16xf32>
    %169 = vector.shape_cast %168 : vector<16xf32> to vector<16x1xf32>
    %cst_74 = arith.constant 6.37755089E-4 : f32
    %170 = vector.broadcast %cst_74 : f32 to vector<16x1xf32>
    %171 = arith.mulf %166, %170 : vector<16x1xf32>
    %cst_75 = arith.constant 6.37755089E-4 : f32
    %172 = vector.broadcast %cst_75 : f32 to vector<16x1xf32>
    %173 = arith.mulf %169, %172 : vector<16x1xf32>
    %174 = arith.mulf %171, %171 : vector<16x1xf32>
    %175 = arith.subf %173, %174 : vector<16x1xf32>
    %cst_76 = arith.constant 0.000000e+00 : f32
    %176 = vector.broadcast %cst_76 : f32 to vector<16x1xf32>
    %177 = arith.maximumf %175, %176 : vector<16x1xf32>
    %178 = vector.broadcast %171 : vector<16x1xf32> to vector<16x1568xf32>
    %179 = arith.subf %164, %178 : vector<16x1568xf32>
    %cst_77 = arith.constant 9.99999974E-6 : f32
    %180 = vector.broadcast %cst_77 : f32 to vector<16x1xf32>
    %181 = arith.addf %177, %180 : vector<16x1xf32>
    %182 = math.rsqrt %181 : vector<16x1xf32>
    %183 = vector.broadcast %182 : vector<16x1xf32> to vector<16x1568xf32>
    %184 = arith.mulf %179, %183 : vector<16x1568xf32>
    %c0_78 = arith.constant 0 : index
    %c0_79 = arith.constant 0 : index
    %185 = vector.load %arg1[%c0_78, %c0_79] : memref<16x1568xf32, #tpu.memory_space<vmem>>, vector<16x1568xf32>
    %186 = arith.addf %184, %185 : vector<16x1568xf32>
    %cst_80 = arith.constant 0.000000e+00 : f32
    %187 = vector.broadcast %cst_80 : f32 to vector<16x1568xf32>
    %188 = arith.maximumf %186, %187 : vector<16x1568xf32>
    %c0_81 = arith.constant 0 : index
    %c0_82 = arith.constant 0 : index
    %189 = vector.load %arg5[%c0_81, %c0_82] : memref<16x1568xf32, #tpu.memory_space<vmem>>, vector<16x1568xf32>
    tpu.vector_store %arg5[%c0_81, %c0_82], %188 {strides = array<i32>} : memref<16x1568xf32, #tpu.memory_space<vmem>>, vector<16x1568xf32>,
    return
  }
  func.func @transform_0(%arg0: i32) -> (i32, i32) {
    %c0_i32 = arith.constant 0 : i32
    %c0_i32_0 = arith.constant 0 : i32
    %c0_i32_1 = arith.constant 0 : i32
    return %c0_i32, %c0_i32_0 : i32, i32
  }
  func.func @transform_1(%arg0: i32) -> (i32, i32) {
    %c0_i32 = arith.constant 0 : i32
    %c0_i32_0 = arith.constant 0 : i32
    %c0_i32_1 = arith.constant 0 : i32
    return %c0_i32, %c0_i32_0 : i32, i32
  }
  func.func @transform_2(%arg0: i32) -> (i32, i32) {
    %c0_i32 = arith.constant 0 : i32
    %c0_i32_0 = arith.constant 0 : i32
    %c0_i32_1 = arith.constant 0 : i32
    return %c0_i32, %c0_i32_0 : i32, i32
  }
  func.func @transform_3(%arg0: i32) -> (i32, i32) {
    %c0_i32 = arith.constant 0 : i32
    %c0_i32_0 = arith.constant 0 : i32
    %c0_i32_1 = arith.constant 0 : i32
    return %c0_i32, %c0_i32_0 : i32, i32
  }
  func.func @transform_4(%arg0: i32) -> (i32, i32) {
    %c0_i32 = arith.constant 0 : i32
    %c0_i32_0 = arith.constant 0 : i32
    %c0_i32_1 = arith.constant 0 : i32
    return %c0_i32, %c0_i32_0 : i32, i32
  }
}

</mosaic_0001>

<bundles_post_ra>
// kernel: block_forward.1
= control target key start
LH: loop header
LB: loop body
LE: loop exit
PB: predicated region body
PF: predicated region fallthrough
CT: control target
= control target key end

     0   :  { %v7531_v3 = vmov 0.0   ;;  %vm44_vm0 = vcmask 130048   ;;  %v7529_v41 = vmov 0.0|0.0   ;;  %vm7512_vm1 = vmmov 0   ;;  %s4429_s15 = smov 27   ;;  %s4430_s16 = smov 28   ;;  %s7507_s0 = inlined_call_operand.vmem [shape: f32[16,1568], index: 0, kind: input, shape index: {}]   ;;  %s7508_s1 = inlined_call_operand.vmem [shape: f32[4,16], index: 1, kind: input, shape index: {}]   ;;  %s7509_s2 = inlined_call_operand.vmem [shape: f32[4,36], index: 2, kind: input, shape index: {}]   ;;  %s7510_s3 = inlined_call_operand.vmem [shape: f32[16,4], index: 3, kind: input, shape index: {}]   ;;  %s7511_s4 = inlined_call_operand.vmem [shape: f32[16,1568], index: 4, kind: output, shape index: {}]  }
   0x1   :  { %v19_v0 = vld [vmem:[%s7507_s0 + $0x8] sm:$0xff]  ;;  %v32_v1 = vld [vmem:[%s7507_s0 + $0x70] sm:$0xff]  ;;  %v18_v2 = vld [vmem:[%s7507_s0] sm:$0xff]  ;;  %112 = vmatprep.mubr.f32.mxu0 %v7531_v3  ;;  %659 = vst [vmem:[#allocation2] sm:$0xf] %v7531_v3  ;;  %183 = vmatprep.mubr.f32.mxu1 %v7531_v3  ;;  %vm7513_vm2 = vcmask 1043456  }
   0x2   :  { %v4255_v4 = vpack.c.bf16 %v32_v1, %v19_v0  ;;  %v31_v5 = vld [vmem:[%s7507_s0 + $0x68] sm:$0xff]  ;;  %v21_v6 = vld [vmem:[%s7507_s0 + $0x18] sm:$0xff]  ;;  %v34_v7 = vld [vmem:[%s7507_s0 + $0x80] sm:$0xff]  ;;  %vm7515_vm3 = vcmask 257024   ;;  %vm660_vm4 = vcmask 1043712   ;;  %vm7514_vm5 = vcmask 261124  }
   0x3   :  { %v4257_v8 = vpack.c.bf16 %v31_v5, %v18_v2  ;;  %v4259_v9 = vpack.c.bf16 %v34_v7, %v21_v6  ;;  %v20_v10 = vld [vmem:[%s7507_s0 + $0x10] sm:$0xff]  ;;  %v33_v11 = vld [vmem:[%s7507_s0 + $0x78] sm:$0xff]  ;;  %v17_v12 = vld [vmem:[%s7508_s1] sm:$0xf]  ;;  %s4431_s17 = smov 1   ;;  %s4432_s18 = smov 127  }
   0x4   :  { %4256 = vmatprep.subr.bf16.mxu0 %v4255_v4  ;;  %v4261_v13 = vpack.c.bf16 %v33_v11, %v20_v10  ;;  %v23_v14 = vld [vmem:[%s7507_s0 + $0x28] sm:$0xff]  ;;  %v36_v15 = vld [vmem:[%s7507_s0 + $0x90] sm:$0xff]  ;;  %v22_v16 = vld [vmem:[%s7507_s0 + $0x20] sm:$0xff]  ;;  %s4433_s19 = smov 100   ;;  %s4434_s20 = smov 29  }
   0x5   :  { %4258 = vmatpush1.bf16.msra.mxu0 %v4257_v8  ;;  %4260 = vmatprep.subr.bf16.mxu1 %v4259_v9  ;;  %v4263_v17 = vpack.c.bf16 %v36_v15, %v23_v14  ;;  %v35_v18 = vld [vmem:[%s7507_s0 + $0x88] sm:$0xff]  ;;  %v25_v19 = vld [vmem:[%s7507_s0 + $0x38] sm:$0xff]  ;;  %v38_v20 = vld [vmem:[%s7507_s0 + $0xa0] sm:$0xff]  ;;  %s4435_s21 = smov 101   ;;  %s4436_s22 = smov 99  }
   0x6   :  { %4262 = vmatpush1.bf16.msra.mxu1 %v4261_v13  ;;  %v4265_v21 = vpack.c.bf16 %v35_v18, %v22_v16  ;;  %v4267_v22 = vpack.c.bf16 %v38_v20, %v25_v19  ;;  %v24_v23 = vld [vmem:[%s7507_s0 + $0x30] sm:$0xff]  ;;  %v37_v24 = vld [vmem:[%s7507_s0 + $0x98] sm:$0xff]  ;;  %v27_v25 = vld [vmem:[%s7507_s0 + $0x48] sm:$0xff] }
   0x7   :  { %4264 = vmatprep.subr.bf16.mxu0 %v4263_v17  ;;  %v4269_v26 = vpack.c.bf16 %v37_v24, %v24_v23  ;;  %v40_v27 = vld [vmem:[%s7507_s0 + $0xb0] sm:$0xff]  ;;  %v26_v28 = vld [vmem:[%s7507_s0 + $0x40] sm:$0xff]  ;;  %v39_v29 = vld [vmem:[%s7507_s0 + $0xa8] sm:$0xff] }
   0x8   :  { %4164 = vmatmul.mubr.msk.f32.vlgmr.msra.gmra.mrb[0].mxu0 %vm44_vm0, %v17_v12  ;;  %4268 = vmatprep.subr.bf16.mxu1 %v4267_v22  ;;  %v4271_v30 = vpack.c.bf16 %v40_v27, %v27_v25  ;;  %v29_v31 = vld [vmem:[%s7507_s0 + $0x58] sm:$0xff]  ;;  %v42_v32 = vld [vmem:[%s7507_s0 + $0xc0] sm:$0xff]  ;;  %v28_v33 = vld [vmem:[%s7507_s0 + $0x50] sm:$0xff]  ;;  %v4273_v34 = vpack.c.bf16 %v39_v29, %v26_v28 }
   0x9   :  { %4165 = vmatmul.mubr.msk.f32.vlgmr.msra.gmra.mrb[0].mxu1 %vm44_vm0, %v17_v12  ;;  %4266 = vmatpush1.bf16.msra.mxu0 %v4265_v21  ;;  %v4275_v35 = vpack.c.bf16 %v42_v32, %v29_v31  ;;  %v41_v36 = vld [vmem:[%s7507_s0 + $0xb8] sm:$0xff]  ;;  %v30_v38 = vld [vmem:[%s7507_s0 + $0x60] sm:$0xff]  ;;  %v43_v39 = vld [vmem:[%s7507_s0 + $0xc8] sm:$0xff] }
   0xa   :  { %254 = vmatprep.mubr.f32.mxu0 %v7531_v3  ;;  %4270 = vmatpush1.bf16.msra.mxu1 %v4269_v26  ;;  %v4277_v37 = vpack.c.bf16 %v41_v36, %v28_v33  ;;  %v4280_v40 = vpack.c.bf16 %v43_v39, %v30_v38  ;;  %vm662_vm6 = vmor %vm7514_vm5, %vm660_vm4 }
   0xb   :  { %325 = vmatprep.mubr.f32.mxu1 %v7531_v3  ;;  %4272 = vmatprep.subr.bf16.mxu0 %v4271_v30  ;;  %663 = vst.msk [vmem:[#allocation2 + $0x34] sm:$0xff] %vm662_vm6, %v7531_v3 }
   0xc   :  { %4166 = vmatmul.mubr.msk.f32.vlgmr.msra.gmra.mrb[2].mxu0 %vm44_vm0, %v17_v12  ;;  %4276 = vmatprep.subr.bf16.mxu1 %v4275_v35 }
   0xd   :  { %4167 = vmatmul.mubr.msk.f32.vlgmr.msra.gmra.mrb[2].mxu1 %vm44_vm0, %v17_v12  ;;  %4274 = vmatpush1.bf16.msra.mxu0 %v4273_v34 }
   0xe   :  { %396 = vmatprep.mubr.f32.mxu0 %v7531_v3  ;;  %4278 = vmatpush1.bf16.msra.mxu1 %v4277_v37 }
   0xf   :  { %467 = vmatprep.mubr.f32.mxu1 %v7531_v3  ;;  %4279 = vmatprep.subr.bf16.mxu0 %v7529_v41 }
  0x10   :  { %4168 = vmatmul.mubr.msk.f32.vlgmr.msra.gmra.mrb[4].mxu0 %vm44_vm0, %v17_v12 }
  0x11   :  { %4169 = vmatmul.mubr.msk.f32.vlgmr.msra.gmra.mrb[4].mxu1 %vm44_vm0, %v17_v12  ;;  %4281 = vmatpush3.bf16.msra.mxu0 %v4280_v40 }
  0x12   :  { %4234 = vmatprep.mubr.msk.f32.mxu0 %vm7512_vm1, %v7531_v3  ;;  %2773 = vmatprep.mubr.f32.mxu1 %v7531_v3 }
  0x14   :  { %4235 = vmatmul.mubr.msk.f32.vlgmr.msra.gmra.mrb[6].mxu0 %vm44_vm0, %v17_v12 }
  0x15   :  { %2844 = vmatprep.mubr.f32.mxu0 %v7531_v3 }
  0xdb   :  { %v4562_v42 = vpop.f32.mrb[0].mxu0 }
  0xdc   :  { %v545_v43 = vsel %vm7513_vm2, %v4562_v42, 0.0  ;;  %v573_v44 = vmul.f32 %v4562_v42, %v4562_v42  ;;  %v4568_v45 = vpop.f32.mrb[1].mxu0  ;;  %v4570_v46 = vpop.f32.mrb[0].mxu1 }
  0xdd   :  { %v546_v47 = vsel %vm7513_vm2, %v4568_v45, 0.0  ;;  %v574_v48 = vmul.f32 %v4568_v45, %v4568_v45  ;;  %v548_v49 = vsel %vm7513_vm2, %v4570_v46, 0.0  ;;  %v575_v50 = vmul.f32 %v4570_v46, %v4570_v46  ;;  %v4580_v51 = vpop.f32.mrb[1].mxu1 }
  0xde   :  { %v586_v52 = vsel %vm7513_vm2, %v573_v44, 0.0  ;;  %v547_v53 = vadd.f32 %v546_v47, %v545_v43  ;;  %v576_v56 = vmul.f32 %v4580_v51, %v4580_v51  ;;  %v550_v62 = vsel %vm7513_vm2, %v4580_v51, 0.0 }
  0xdf   :  { %v587_v54 = vsel %vm7513_vm2, %v574_v48, 0.0  ;;  %v589_v55 = vsel %vm7513_vm2, %v575_v50, 0.0  ;;  %v4587_v57 = vpop.f32.mrb[2].mxu0 }
  0xe0   :  { %v588_v58 = vadd.f32 %v587_v54, %v586_v52  ;;  %v549_v59 = vadd.f32 %v548_v49, %v547_v53  ;;  %v4589_v60 = vpop.f32.mrb[3].mxu0  ;;  %v4591_v61 = vpop.f32.mrb[2].mxu1  ;;  %v552_v63 = vsel %vm7513_vm2, %v4587_v57, 0.0  ;;  %v577_v0 = vmul.f32 %v4587_v57, %v4587_v57 }
  0xe1   :  { %v4599_v1 = vpop.f32.mrb[3].mxu1  ;;  %v591_v5 = vsel %vm7513_vm2, %v576_v56, 0.0  ;;  %v578_v7 = vmul.f32 %v4589_v60, %v4589_v60  ;;  %v579_v8 = vmul.f32 %v4591_v61, %v4591_v61  ;;  %v554_v14 = vsel %vm7513_vm2, %v4589_v60, 0.0 }
  0xe2   :  { %v590_v2 = vadd.f32 %v589_v55, %v588_v58  ;;  %v551_v4 = vadd.f32 %v550_v62, %v549_v59  ;;  %v593_v6 = vsel %vm7513_vm2, %v577_v0, 0.0  ;;  %v556_v15 = vsel %vm7513_vm2, %v4591_v61, 0.0 }
  0xe3   :  { %v4607_v9 = vpop.f32.mrb[4].mxu0  ;;  %v595_v19 = vsel %vm7513_vm2, %v578_v7, 0.0  ;;  %v597_v20 = vsel %vm7513_vm2, %v579_v8, 0.0  ;;  %v580_v21 = vmul.f32 %v4599_v1, %v4599_v1  ;;  %v558_v27 = vsel %vm7513_vm2, %v4599_v1, 0.0 }
  0xe4   :  { %v592_v10 = vadd.f32 %v591_v5, %v590_v2  ;;  %v553_v11 = vadd.f32 %v552_v63, %v551_v4  ;;  %v4609_v12 = vpop.f32.mrb[5].mxu0  ;;  %v4611_v13 = vpop.f32.mrb[4].mxu1  ;;  %v581_v22 = vmul.f32 %v4607_v9, %v4607_v9  ;;  %v560_v28 = vsel %vm7513_vm2, %v4607_v9, 0.0 }
  0xe5   :  { %v4617_v16 = vpop.f32.mrb[5].mxu1  ;;  %v599_v31 = vsel %vm7513_vm2, %v580_v21, 0.0  ;;  %v582_v33 = vmul.f32 %v4609_v12, %v4609_v12  ;;  %v583_v34 = vmul.f32 %v4611_v13, %v4611_v13  ;;  %v562_v37 = vsel %vm7513_vm2, %v4609_v12, 0.0 }
  0xe6   :  { %v594_v17 = vadd.f32 %v593_v6, %v592_v10  ;;  %v555_v18 = vadd.f32 %v554_v14, %v553_v11  ;;  %v601_v32 = vsel %vm7513_vm2, %v581_v22, 0.0  ;;  %v564_v38 = vsel %vm7513_vm2, %v4611_v13, 0.0 }
  0xe7   :  { %v4625_v23 = vpop.f32.mrb[6].mxu0  ;;  %v603_v43 = vsel %vm7513_vm2, %v582_v33, 0.0  ;;  %v605_v44 = vsel %vm7513_vm2, %v583_v34, 0.0  ;;  %v584_v47 = vmul.f32 %v4617_v16, %v4617_v16  ;;  %v566_v52 = vsel %vm7513_vm2, %v4617_v16, 0.0 }
  0xe8   :  { %v596_v24 = vadd.f32 %v595_v19, %v594_v17  ;;  %v557_v25 = vadd.f32 %v556_v15, %v555_v18  ;;  %v4236_v26 = vpop.f32.mrb[7].mxu0  ;;  %v585_v48 = vmul.f32 %v4625_v23, %v4625_v23  ;;  %v569_v53 = vsel %vm7515_vm3, %v4625_v23, 0.0 }
  0xe9   :  { %v607_v56 = vsel %vm7513_vm2, %v584_v47, 0.0  ;;  %v695_v0 = vlaneseq  ;;  %v4428_v15 = vmov 0  }
  0xea   :  { %v598_v29 = vadd.f32 %v597_v20, %v596_v24  ;;  %v559_v30 = vadd.f32 %v558_v27, %v557_v25  ;;  %v609_v58 = vsel %vm7515_vm3, %v585_v48, 0.0 }
  0xeb   :  { %v4655_v2 = vand.u32 127, %v695_v0 }
  0xec   :  { %v600_v35 = vadd.f32 %v599_v31, %v598_v29  ;;  %v561_v36 = vadd.f32 %v560_v28, %v559_v30 }
  0xed   :  { %v697_v4 = vadd.s32 128, %v4655_v2  ;;  %v4659_v5 = vmul.u32.u64.low 2454267026, %v4655_v2  ;;  %v4660_v6 = vmul.u32.u64.high 2454267026, %v4655_v2, %v4659_v5  ;;  %v4663_v7 = vadd.s32 256, %v4655_v2 }
  0xee   :  { %v602_v39 = vadd.f32 %v601_v32, %v600_v35  ;;  %v563_v40 = vadd.f32 %v562_v37, %v561_v36  ;;  %v4674_v18 = vadd.s32 384, %v4655_v2  ;;  %v4693_v32 = vadd.s32 512, %v4655_v2 }
  0xef   :  { %vm715_vm7 = vc.u32 %v4659_v5, 2454267026  ;;  %v4665_v8 = vmul.u32.u64.low 2454267026, %v697_v4  ;;  %v4666_v10 = vmul.u32.u64.high 2454267026, %v697_v4, %v4665_v8  ;;  %v4697_v34 = vadd.s32 640, %v4655_v2 }
  0xf0   :  { %v604_v49 = vadd.f32 %v603_v43, %v602_v39  ;;  %v565_v50 = vadd.f32 %v564_v38, %v563_v40  ;;  %v4669_v11 = vmul.u32.u64.low 2454267026, %v4663_v7  ;;  %v4670_v14 = vmul.u32.u64.high 2454267026, %v4663_v7, %v4669_v11 }
  0xf1   :  { %v716_v17 = vsel %vm715_vm7, 1, %v4428_v15  ;;  %vm729_vm8 = vc.u32 %v4665_v8, 2454267026  ;;  %v4677_v19 = vmul.u32.u64.low 2804876602, %v4655_v2  ;;  %v4678_v20 = vmul.u32.u64.high 2804876602, %v4655_v2, %v4677_v19 }
  0xf2   :  { %v567_v54 = vadd.f32 %v566_v52, %v565_v50  ;;  %v606_v55 = vadd.f32 %v605_v44, %v604_v49  ;;  %vm743_vm9 = vc.u32 %v4669_v11, 2454267026  ;;  %v717_v21 = vadd.s32 %v4660_v6, %v716_v17 }
  0xf3   :  { %v4681_v22 = vmul.u32.u64.low 2804876602, %v697_v4  ;;  %v4682_v24 = vmul.u32.u64.high 2804876602, %v697_v4, %v4681_v22  ;;  %v730_v25 = vsel %vm729_vm8, 1, %v4428_v15  ;;  %v744_v28 = vsel %vm743_vm9, 1, %v4428_v15 }
  0xf4   :  { %v570_v59 = vadd.f32 %v569_v53, %v567_v54  ;;  %v608_v62 = vadd.f32 %v607_v56, %v606_v55  ;;  %v4686_v26 = vmul.u32.u64.low 2454267026, %v4674_v18  ;;  %v4687_v27 = vmul.u32.u64.high 2454267026, %v4674_v18, %v4686_v26 }
  0xf5   :  { %v718_v29 = vshrl.u32 %v717_v21, 4  ;;  %v731_v30 = vadd.s32 %v4666_v10, %v730_v25  ;;  %v745_v31 = vadd.s32 %v4670_v14, %v744_v28  ;;  %v962_v33 = vshrl.u32 %v4678_v20, 9 }
  0xf6   :  { %571 = vadd.xlane.f32.xlu0 %v570_v59  ;;  %v610_v63 = vadd.f32 %v609_v58, %v608_v62  ;;  %vm757_vm10 = vc.u32 %v4686_v26, 2454267026  ;;  %v973_v38 = vshrl.u32 %v4682_v24, 9  ;;  %v4729_v20 = vadd.s32 768, %v4655_v2 }
  0xf7   :  { %v719_v35 = vmul.u32 28, %v718_v29  ;;  %v732_v36 = vshrl.u32 %v731_v30, 4  ;;  %v758_v37 = vsel %vm757_vm10, 1, %v4428_v15  ;;  %v746_v39 = vshrl.u32 %v745_v31, 4 }
  0xf8   :  { %v4702_v40 = vmul.u32.u64.low 2454267026, %v4693_v32  ;;  %v4703_v43 = vmul.u32.u64.high 2454267026, %v4693_v32, %v4702_v40  ;;  %v963_v44 = vmul.u32 784, %v962_v33  ;;  %v759_v49 = vadd.s32 %v4687_v27, %v758_v37 }
  0xf9   :  { %v4706_v47 = vmul.u32.u64.low 2804876602, %v4663_v7  ;;  %v4707_v48 = vmul.u32.u64.high 2804876602, %v4663_v7, %v4706_v47  ;;  %v4711_v50 = vmul.u32.u64.low 2454267026, %v4697_v34  ;;  %v4712_v52 = vmul.u32.u64.high 2454267026, %v4697_v34, %v4711_v50 }
  0xfa   :  { %611 = vadd.xlane.f32.xlu0 %v610_v63  ;;  %v720_v53 = vsub.s32 %v4655_v2, %v719_v35  ;;  %v733_v54 = vmul.u32 28, %v732_v36  ;;  %v974_v55 = vmul.u32 784, %v973_v38  ;;  %vm771_vm11 = vc.u32 %v4702_v40, 2454267026 }
  0xfb   :  { %v747_v56 = vmul.u32 28, %v746_v39  ;;  %v964_v58 = vsub.s32 %v4655_v2, %v963_v44  ;;  %v4717_v59 = vmul.u32.u64.low 2804876602, %v4674_v18  ;;  %v4718_v62 = vmul.u32.u64.high 2804876602, %v4674_v18, %v4717_v59 }
  0xfc   :  { %v760_v63 = vshrl.u32 %v759_v49, 4  ;;  %vm785_vm12 = vc.u32 %v4711_v50, 2454267026  ;;  %v4721_v0 = vmul.u32.u64.low 2804876602, %v4693_v32  ;;  %v4722_v5 = vmul.u32.u64.high 2804876602, %v4693_v32, %v4721_v0 }
  0xfd   :  { %v734_v6 = vsub.s32 %v697_v4, %v733_v54  ;;  %vm891_vm13 = vcmp.ne.s32.totalorder %v720_v53, 0  ;;  %v772_v8 = vsel %vm771_vm11, 1, %v4428_v15  ;;  %vm904_vm14 = vcmp.lt.s32.totalorder %v720_v53, 0 }
  0xfe   :  { %v930_v10 = vadd.s32 28, %v720_v53  ;;  %v975_v11 = vsub.s32 %v697_v4, %v974_v55  ;;  %v748_v14 = vsub.s32 %v4663_v7, %v747_v56  ;;  %vm1099_vm15 = vcmp.ne.s32.totalorder %v964_v58, 0  ;;  %vm917_vm10 = vmand %vm904_vm14, %vm891_vm13 }
  0xff   :  { %v984_v17 = vshrl.u32 %v4707_v48, 9  ;;  %v786_v19 = vsel %vm785_vm12, 1, %v4428_v15  ;;  %vm1112_vm0 = vcmp.lt.s32.totalorder %v964_v58, 0  ;;  %v1138_v21 = vadd.s32 784, %v964_v58 }
 0x100   :  { %v761_v22 = vmul.u32 28, %v760_v63  ;;  %v773_v24 = vadd.s32 %v4703_v43, %v772_v8  ;;  %vm892_vm4 = vcmp.ne.s32.totalorder %v734_v6, 0  ;;  %vm905_vm6 = vcmp.lt.s32.totalorder %v734_v6, 0  ;;  %vm4747_vm12 = vmand %vm1112_vm0, %vm1099_vm15 }
 0x101   :  { %v931_v25 = vadd.s32 28, %v734_v6  ;;  %v4733_v4 = vadd.s32 896, %v4655_v2  ;;  %vm1100_vm7 = vcmp.ne.s32.totalorder %v975_v11, 0  ;;  %vm1113_vm8 = vcmp.lt.s32.totalorder %v975_v11, 0  ;;  %vm918_vm13 = vmand %vm905_vm6, %vm892_vm4 }
 0x102   :  { %vm893_vm9 = vcmp.ne.s32.totalorder %v748_v14, 0  ;;  %v787_v26 = vadd.s32 %v4712_v52, %v786_v19  ;;  %v985_v27 = vmul.u32 784, %v984_v17  ;;  %v995_v28 = vshrl.u32 %v4718_v62, 9  ;;  %vm4765_vm14 = vmand %vm1113_vm8, %vm1100_vm7 }
 0x103   :  { %v4740_v29 = vmul.u32.u64.low 2454267026, %v4729_v20  ;;  %v4741_v30 = vmul.u32.u64.high 2454267026, %v4729_v20, %v4740_v29  ;;  %v762_v31 = vsub.s32 %v4674_v18, %v761_v22  ;;  %vm906_vm11 = vcmp.lt.s32.totalorder %v748_v14, 0 }
 0x104   :  { %v774_v33 = vshrl.u32 %v773_v24, 4  ;;  %v1006_v35 = vshrl.u32 %v4722_v5, 9  ;;  %v4752_v37 = vmul.u32.u64.low 2804876602, %v4697_v34  ;;  %v4753_v38 = vmul.u32.u64.high 2804876602, %v4697_v34, %v4752_v37  ;;  %vm919_vm4 = vmand %vm906_vm11, %vm893_vm9 }
 0x105   :  { %v4756_v39 = vmul.u32.u64.low 2454267026, %v4733_v4  ;;  %v4757_v40 = vmul.u32.u64.high 2454267026, %v4733_v4, %v4756_v39  ;;  %v4761_v43 = vsel %vm917_vm10, %v930_v10, %v720_v53  ;;  %v1139_v44 = vadd.s32 784, %v975_v11 }
 0x106   :  { %v788_v47 = vshrl.u32 %v787_v26, 4  ;;  %v932_v49 = vadd.s32 28, %v748_v14  ;;  %v4770_v50 = vsub.s32 %v4663_v7, %v985_v27  ;;  %v996_v52 = vmul.u32 784, %v995_v28 }
 0x107   :  { %vm799_vm15 = vc.u32 %v4740_v29, 2454267026  ;;  %vm894_vm0 = vcmp.ne.s32.totalorder %v762_v31, 0  ;;  %vm907_vm1 = vcmp.lt.s32.totalorder %v762_v31, 0  ;;  %v775_v53 = vmul.u32 28, %v774_v33 }
 0x108   :  { %v1007_v54 = vmul.u32 784, %v1006_v35  ;;  %v4774_v55 = vsel %vm918_vm13, %v931_v25, %v734_v6  ;;  %v4778_v56 = vsel %vm4747_vm12, %v1138_v21, %v964_v58  ;;  %vm813_vm6 = vc.u32 %v4756_v39, 2454267026  ;;  %vm920_vm7 = vmand %vm907_vm1, %vm894_vm0 }
 0x109   :  { %v4781_v59 = vadd.s32 1024, %v4655_v2  ;;  %v4785_v7 = vsel %vm4765_vm14, %v1139_v44, %v975_v11  ;;  %v933_v62 = vadd.s32 28, %v762_v31  ;;  %v789_v63 = vmul.u32 28, %v788_v47 }
 0x10a   :  { %v800_v0 = vsel %vm799_vm15, 1, %v4428_v15  ;;  %v4789_v5 = vsel %vm919_vm4, %v932_v49, %v748_v14  ;;  %v997_v6 = vsub.s32 %v4674_v18, %v996_v52  ;;  %vm1101_vm8 = vcmp.ne.s32.totalorder %v4770_v50, 0 }
 0x10b   :  { %vm1114_vm9 = vcmp.lt.s32.totalorder %v4770_v50, 0  ;;  %v1140_v58 = vadd.s32 784, %v4770_v50  ;;  %v776_v8 = vsub.s32 %v4693_v32, %v775_v53  ;;  %v1008_v10 = vsub.s32 %v4693_v32, %v1007_v54 }
 0x10c   :  { %v814_v11 = vsel %vm813_vm6, 1, %v4428_v15  ;;  %v1017_v17 = vshrl.u32 %v4753_v38, 9  ;;  %v801_v19 = vadd.s32 %v4741_v30, %v800_v0  ;;  %v4804_v18 = vsel %vm920_vm7, %v933_v62, %v762_v31  ;;  %vm4819_vm0 = vmand %vm1114_vm9, %vm1101_vm8 }
 0x10d   :  { %v4801_v14 = vmul.u32.u64.low 2454267026, %v4781_v59  ;;  %v4802_v21 = vmul.u32.u64.high 2454267026, %v4781_v59, %v4801_v14  ;;  %v790_v22 = vsub.s32 %v4697_v34, %v789_v63  ;;  %vm1102_vm1 = vcmp.ne.s32.totalorder %v997_v6, 0 }
 0x10e   :  { %v4808_v24 = vmul.u32.u64.low 2804876602, %v4729_v20  ;;  %v4809_v25 = vmul.u32.u64.high 2804876602, %v4729_v20, %v4808_v24  ;;  %vm1115_vm10 = vcmp.lt.s32.totalorder %v997_v6, 0  ;;  %v815_v32 = vadd.s32 %v4757_v40, %v814_v11 }
 0x10f   :  { %v4813_v26 = vadd.s32 1152, %v4655_v2  ;;  %v1141_v27 = vadd.s32 784, %v997_v6  ;;  %vm895_vm11 = vcmp.ne.s32.totalorder %v776_v8, 0  ;;  %vm1103_vm12 = vcmp.ne.s32.totalorder %v1008_v10, 0  ;;  %vm1128_vm7 = vmand %vm1115_vm10, %vm1102_vm1 }
 0x110   :  { %vm1116_vm13 = vcmp.lt.s32.totalorder %v1008_v10, 0  ;;  %vm908_vm14 = vcmp.lt.s32.totalorder %v776_v8, 0  ;;  %v1018_v28 = vmul.u32 784, %v1017_v17  ;;  %v802_v29 = vshrl.u32 %v801_v19, 4 }
 0x111   :  { %vm827_vm15 = vc.u32 %v4801_v14, 2454267026  ;;  %vm896_vm4 = vcmp.ne.s32.totalorder %v790_v22, 0  ;;  %vm909_vm6 = vcmp.lt.s32.totalorder %v790_v22, 0  ;;  %v816_v35 = vshrl.u32 %v815_v32, 4  ;;  %vm4838_vm8 = vmand %vm1116_vm13, %vm1103_vm12 }
 0x112   :  { %v4824_v31 = vmul.u32.u64.low 2804876602, %v4733_v4  ;;  %v4825_v33 = vmul.u32.u64.high 2804876602, %v4733_v4, %v4824_v31  ;;  %v4830_v36 = vmul.u32.u64.low 2454267026, %v4813_v26  ;;  %v4831_v37 = vmul.u32.u64.high 2454267026, %v4813_v26, %v4830_v36  ;;  %vm4852_vm9 = vmand %vm908_vm14, %vm895_vm11 }
 0x113   :  { %v4834_v38 = vadd.s32 1536, %v4655_v2  ;;  %v828_v40 = vsel %vm827_vm15, 1, %v4428_v15  ;;  %v4844_v44 = vmul.u32.u64.low 2804876602, %v4781_v59  ;;  %v4845_v47 = vmul.u32.u64.high 2804876602, %v4781_v59, %v4844_v44  ;;  %vm922_vm1 = vmand %vm909_vm6, %vm896_vm4 }
 0x114   :  { %v4848_v48 = vadd.s32 1280, %v4655_v2  ;;  %v934_v52 = vadd.s32 28, %v776_v8  ;;  %v935_v53 = vadd.s32 28, %v790_v22  ;;  %v1142_v54 = vadd.s32 784, %v1008_v10 }
 0x115   :  { %v803_v62 = vmul.u32 28, %v802_v29  ;;  %v4859_v63 = vsel %vm4819_vm0, %v1140_v58, %v4770_v50  ;;  %v4861_v0 = vsel %vm1128_vm7, %v1141_v27, %v997_v6  ;;  %v1028_v11 = vshrl.u32 %v4809_v25, 9 }
 0x116   :  { %v4867_v17 = vadd.s32 1408, %v4655_v2  ;;  %v817_v19 = vmul.u32 28, %v816_v35  ;;  %v829_v14 = vadd.s32 %v4802_v21, %v828_v40  ;;  %v4875_v50 = vsub.s32 %v4697_v34, %v1018_v28 }
 0x117   :  { %v4871_v24 = vmul.u32.u64.low 2454267026, %v4834_v38  ;;  %v4872_v32 = vmul.u32.u64.high 2454267026, %v4834_v38, %v4871_v24  ;;  %vm841_vm10 = vc.u32 %v4830_v36, 2454267026  ;;  %v4883_v25 = vsel %vm4852_vm9, %v934_v52, %v776_v8 }
 0x118   :  { %v4878_v6 = vmul.u32.u64.low 2454267026, %v4848_v48  ;;  %v4879_v58 = vmul.u32.u64.high 2454267026, %v4848_v48, %v4878_v6  ;;  %v4885_v2 = vsel %vm922_vm1, %v935_v53, %v790_v22  ;;  %v4889_v21 = vsel %vm4838_vm8, %v1142_v54, %v1008_v10 }
 0x119   :  { %v4892_v27 = vsub.s32 %v4729_v20, %v803_v62  ;;  %v1029_v34 = vmul.u32 784, %v1028_v11  ;;  %v1039_v28 = vshrl.u32 %v4825_v33, 9  ;;  %v4900_v31 = vsub.s32 %v4733_v4, %v817_v19 }
 0x11a   :  { %v4896_v29 = vmul.u32.u64.low 2454267026, %v4867_v17  ;;  %v4897_v30 = vmul.u32.u64.high 2454267026, %v4867_v17, %v4896_v29  ;;  %v830_v8 = vshrl.u32 %v829_v14, 4  ;;  %v842_v22 = vsel %vm841_vm10, 1, %v4428_v15 }
 0x11b   :  { %vm883_vm11 = vc.u32 %v4871_v24, 2454267026  ;;  %vm1104_vm12 = vcmp.ne.s32.totalorder %v4875_v50, 0  ;;  %vm1117_vm13 = vcmp.lt.s32.totalorder %v4875_v50, 0  ;;  %v1050_v10 = vshrl.u32 %v4845_v47, 9 }
 0x11c   :  { %v4907_v35 = vmul.u32.u64.low 2804876602, %v4813_v26  ;;  %v4908_v33 = vmul.u32.u64.high 2804876602, %v4813_v26, %v4907_v35  ;;  %vm855_vm14 = vc.u32 %v4878_v6, 2454267026  ;;  %v4911_v36 = vadd.s32 784, %v4875_v50  ;;  %vm4965_vm10 = vmand %vm1117_vm13, %vm1104_vm12 }
 0x11d   :  { %vm897_vm15 = vcmp.ne.s32.totalorder %v4892_v27, 0  ;;  %vm910_vm0 = vcmp.lt.s32.totalorder %v4892_v27, 0  ;;  %v4916_v39 = vadd.s32 28, %v4892_v27  ;;  %v1040_v40 = vmul.u32 784, %v1039_v28 }
 0x11e   :  { %v843_v44 = vadd.s32 %v4831_v37, %v842_v22  ;;  %v884_v47 = vsel %vm883_vm11, 1, %v4428_v15  ;;  %vm869_vm4 = vc.u32 %v4896_v29, 2454267026  ;;  %v831_v52 = vmul.u32 28, %v830_v8 }
 0x11f   :  { %v856_v53 = vsel %vm855_vm14, 1, %v4428_v15  ;;  %v4922_v54 = vmul.u32.u64.low 2804876602, %v4848_v48  ;;  %v4923_v62 = vmul.u32.u64.high 2804876602, %v4848_v48, %v4922_v54  ;;  %vm898_vm6 = vcmp.ne.s32.totalorder %v4900_v31, 0  ;;  %vm4976_vm14 = vmand %vm910_vm0, %vm897_vm15 }
 0x120   :  { %v4929_v19 = vsub.s32 %v4729_v20, %v1029_v34  ;;  %v1051_v14 = vmul.u32 784, %v1050_v10  ;;  %v885_v37 = vadd.s32 %v4872_v32, %v884_v47  ;;  %v870_v24 = vsel %vm869_vm4, 1, %v4428_v15 }
 0x121   :  { %v4934_v6 = vmul.u32.u64.low 2804876602, %v4867_v17  ;;  %v4935_v28 = vmul.u32.u64.high 2804876602, %v4867_v17, %v4934_v6  ;;  %v4938_v29 = vsub.s32 %v4733_v4, %v1040_v40  ;;  %v857_v35 = vadd.s32 %v4879_v58, %v856_v53 }
 0x122   :  { %v4941_v8 = vmul.u32.u64.low 2804876602, %v4834_v38  ;;  %v4942_v22 = vmul.u32.u64.high 2804876602, %v4834_v38, %v4941_v8  ;;  %vm911_vm7 = vcmp.lt.s32.totalorder %v4900_v31, 0  ;;  %v937_v32 = vadd.s32 28, %v4900_v31 }
 0x123   :  { %v4948_v15 = vsub.s32 %v4781_v59, %v831_v52  ;;  %v844_v34 = vshrl.u32 %v843_v44, 4  ;;  %v1061_v40 = vshrl.u32 %v4908_v33, 9  ;;  %v871_v47 = vadd.s32 %v4897_v30, %v870_v24  ;;  %vm4985_vm13 = vmand %vm911_vm7, %vm898_vm6 }
 0x124   :  { %vm1105_vm8 = vcmp.ne.s32.totalorder %v4929_v19, 0  ;;  %vm1118_vm9 = vcmp.lt.s32.totalorder %v4929_v19, 0  ;;  %v4957_v58 = vsub.s32 %v4781_v59, %v1051_v14  ;;  %vm1106_vm1 = vcmp.ne.s32.totalorder %v4938_v29, 0 }
 0x125   :  { %v1144_v44 = vadd.s32 784, %v4929_v19  ;;  %v858_v52 = vshrl.u32 %v857_v35, 4  ;;  %vm1119_vm11 = vcmp.lt.s32.totalorder %v4938_v29, 0  ;;  %v1145_v59 = vadd.s32 784, %v4938_v29  ;;  %vm4996_vm15 = vmand %vm1118_vm9, %vm1105_vm8 }
 0x126   :  { %v845_v33 = vmul.u32 28, %v844_v34  ;;  %v1072_v54 = vshrl.u32 %v4923_v62, 9  ;;  %vm899_vm12 = vcmp.ne.s32.totalorder %v4948_v15, 0  ;;  %v1062_v24 = vmul.u32 784, %v1061_v40  ;;  %vm5014_vm8 = vmand %vm1119_vm11, %vm1106_vm1 }
 0x127   :  { %v872_v6 = vshrl.u32 %v871_v47, 4  ;;  %vm912_vm4 = vcmp.lt.s32.totalorder %v4948_v15, 0  ;;  %vm1107_vm2 = vcmp.ne.s32.totalorder %v4957_v58, 0  ;;  %v1083_v35 = vshrl.u32 %v4935_v28, 9 }
 0x128   :  { %vm1120_vm0 = vcmp.lt.s32.totalorder %v4957_v58, 0  ;;  %vm7517_vm6 = vcmp.ge.s32.totalorder %v4761_v43, 0  ;;  %vm7516_vm7 = vcmp.ge.s32.totalorder %v4778_v56, 0  ;;  %v5008_v28 = vsel %vm4965_vm10, %v4911_v36, %v4875_v50  ;;  %vm5028_vm5 = vmand %vm912_vm4, %vm899_vm12 }
 0x129   :  { %v938_v47 = vadd.s32 28, %v4948_v15  ;;  %vm7519_vm9 = vcmp.ge.s32.totalorder %v4774_v55, 0  ;;  %vm7518_vm10 = vcmp.ge.s32.totalorder %v4785_v7, 0  ;;  %v5033_v36 = vsub.s32 %v4813_v26, %v1062_v24  ;;  %vm5053_vm12 = vmand %vm1120_vm0, %vm1107_vm2 }
 0x12a   :  { %vm7521_vm1 = vcmp.ge.s32.totalorder %v4789_v5, 0  ;;  %vm7520_vm11 = vcmp.ge.s32.totalorder %v4859_v63, 0  ;;  %v5042_v30 = vsel %vm4976_vm14, %v4916_v39, %v4892_v27  ;;  %vm7523_vm14 = vcmp.ge.s32.totalorder %v4804_v18, 0  ;;  %vm5166_vm3 = vmand %vm7518_vm10, %vm7519_vm9 }
 0x12b   :  { %vm7522_vm4 = vcmp.ge.s32.totalorder %v4861_v0, 0  ;;  %v5065_v27 = vsel %vm4996_vm15, %v1144_v44, %v4929_v19  ;;  %v5083_v19 = vsel %vm5028_vm5, %v938_v47, %v4948_v15  ;;  %vm1108_vm15 = vcmp.ne.s32.totalorder %v5033_v36, 0  ;;  %vm5156_vm5 = vmand %vm7516_vm7, %vm7517_vm6 }
 0x12c   :  { %vm1121_vm0 = vcmp.lt.s32.totalorder %v5033_v36, 0  ;;  %v5099_v24 = vadd.s32 784, %v5033_v36  ;;  %vm7575_vm6 = vcmp.ge.s32.totalorder %v4883_v25, 0  ;;  %vm7574_vm9 = vcmp.ge.s32.totalorder %v4885_v2, 0  ;;  %vm5186_vm7 = vmand %vm7522_vm4, %vm7523_vm14 }
 0x12d   :  { %vm5211_vm4 = vmand %vm1121_vm0, %vm1108_vm15 }
 0x183   :  { %v572_v49 = vpop.xlane.xlu0 %571 }
 0x184   :  { %v4925_v11 = vmul.f32 0.0006377551, %v572_v49  ;;  %v886_v49 = vshrl.u32 %v885_v37, 4 }
 0x186   :  { %v615_v10 = vmul.f32 %v4925_v11, %v4925_v11  ;;  %v887_v62 = vmul.u32 28, %v886_v49  ;;  %v1073_v49 = vmul.u32 784, %v1072_v54  ;;  %v624_v34 = vsub.f32 %v4591_v61, %v4925_v11 }
 0x187   :  { %v612_v20 = vpop.xlane.xlu0 %611  ;;  %v629_v61 = vsub.f32 %v4617_v16, %v4925_v11 }
 0x188   :  { %v614_v4 = vmul.f32 0.0006377551, %v612_v20  ;;  %v5058_v54 = vsub.s32 %v4834_v38, %v887_v62  ;;  %v5086_v44 = vsub.s32 %v4848_v48, %v1073_v49  ;;  %v620_v62 = vsub.f32 %v4570_v46, %v4925_v11 }
 0x189   :  { %v626_v46 = vsub.f32 %v4607_v9, %v4925_v11 }
 0x18a   :  { %v616_v53 = vsub.f32 %v614_v4, %v615_v10  ;;  %v1094_v10 = vshrl.u32 %v4942_v22, 9  ;;  %v859_v4 = vmul.u32 28, %v858_v52  ;;  %v5019_v22 = vsub.s32 %v4813_v26, %v845_v33 }
 0x18b   :  { %v873_v52 = vmul.u32 28, %v872_v6  ;;  %v5047_v33 = vsel %vm4985_vm13, %v937_v32, %v4900_v31  ;;  %v5070_v31 = vsel %vm5014_vm8, %v1145_v59, %v4938_v29  ;;  %v5107_v15 = vadd.s32 28, %v5058_v54  ;;  %vm5176_vm8 = vmand %vm7520_vm11, %vm7521_vm1 }
 0x18c   :  { %v617_v14 = vmax.f32 %v616_v53, 0.0  ;;  %v1146_v53 = vadd.s32 784, %v4957_v58  ;;  %v1095_v39 = vmul.u32 784, %v1094_v10  ;;  %v5073_v32 = vsub.s32 %v4848_v48, %v859_v4 }
 0x18d   :  { %vm900_vm2 = vcmp.ne.s32.totalorder %v5019_v22, 0  ;;  %vm913_vm13 = vcmp.lt.s32.totalorder %v5019_v22, 0  ;;  %v5078_v37 = vadd.s32 28, %v5019_v22  ;;  %v5096_v59 = vsub.s32 %v4867_v17, %v873_v52 }
 0x18e   :  { %v631_v20 = vadd.f32 1e-05, %v617_v14  ;;  %v1084_v14 = vmul.u32 784, %v1083_v35  ;;  %v5093_v29 = vsel %vm5053_vm12, %v1146_v53, %v4957_v58  ;;  %v5110_v6 = vsub.s32 %v4834_v38, %v1095_v39  ;;  %vm5199_vm1 = vmand %vm913_vm13, %vm900_vm2 }
 0x18f   :  { %v618_v58 = vsub.f32 %v4562_v42, %v4925_v11  ;;  %v5117_v8 = vadd.s32 28, %v5073_v32  ;;  %v619_v38 = vsub.f32 %v4568_v45, %v4925_v11  ;;  %v621_v35 = vsub.f32 %v4580_v51, %v4925_v11 }
 0x190   :  { %4411 = vrsqrt.f32 %v631_v20  ;;  %v5104_v48 = vsub.s32 %v4867_v17, %v1084_v14  ;;  %v5122_v17 = vadd.s32 784, %v5086_v44  ;;  %v622_v42 = vsub.f32 %v4587_v57, %v4925_v11 }
 0x191   :  { %v623_v20 = vsub.f32 %v4589_v60, %v4925_v11  ;;  %v625_v45 = vsub.f32 %v4599_v1, %v4925_v11  ;;  %v627_v57 = vsub.f32 %v4609_v12, %v4925_v11  ;;  %v628_v60 = vsub.f32 %v4611_v13, %v4925_v11 }
 0x192   :  { %v630_v1 = vsub.f32 %v4625_v23, %v4925_v11  ;;  %vm1111_vm12 = vcmp.ne.s32.totalorder %v5110_v6, 0  ;;  %vm7653_vm2 = vcmp.ne.s32.totalorder %v5058_v54, 0  ;;  %vm7654_vm13 = vcmp.lt.s32.totalorder %v5058_v54, 0 }
 0x193   :  { %vm5225_vm14 = vmand %vm7654_vm13, %vm7653_vm2  ;;  %vm7657_vm15 = vcmp.ne.s32.totalorder %v5073_v32, 0  ;;  %vm7658_vm0 = vcmp.lt.s32.totalorder %v5073_v32, 0  ;;  %vm7661_vm2 = vcmp.ne.s32.totalorder %v5086_v44, 0  ;;  %vm7662_vm13 = vcmp.lt.s32.totalorder %v5086_v44, 0 }
 0x194   :  { %vm5241_vm11 = vmand %vm7658_vm0, %vm7657_vm15  ;;  %vm7665_vm15 = vcmp.ne.s32.totalorder %v5096_v59, 0  ;;  %vm7666_vm0 = vcmp.lt.s32.totalorder %v5096_v59, 0  ;;  %v1150_v9 = vadd.s32 784, %v5110_v6 }
 0x195   :  { %vm5254_vm10 = vmand %vm7662_vm13, %vm7661_vm2  ;;  %v5308_v14 = vsel %vm5241_vm11, %v5117_v8, %v5073_v32  ;;  %vm7524_vm11 = vcmp.ge.s32.totalorder %v5070_v31, 0  ;;  %v5331_v32 = vsel %vm5199_vm1, %v5078_v37, %v5019_v22  ;;  %vm7527_vm1 = vcmp.ge.s32.totalorder %v5093_v29, 0 }
 0x196   :  { %vm5272_vm2 = vmand %vm7666_vm0, %vm7665_vm15  ;;  %7676 = vst [vmem:[#allocation4_spill] sm:$0xff] %v5308_v14 }
 0x19a   :  { %v4412_v51 = vpop.eup %4411 }
 0x19b   :  { %v633_v12 = vmul.f32 %v4412_v51, %v618_v58  ;;  %v634_v13 = vmul.f32 %v4412_v51, %v619_v38  ;;  %v635_v10 = vmul.f32 %v4412_v51, %v620_v62  ;;  %v636_v4 = vmul.f32 %v4412_v51, %v621_v35 }
 0x19c   :  { %v637_v23 = vmul.f32 %v4412_v51, %v622_v42  ;;  %v638_v11 = vmul.f32 %v4412_v51, %v623_v20  ;;  %v639_v40 = vmul.f32 %v4412_v51, %v624_v34  ;;  %v640_v47 = vmul.f32 %v4412_v51, %v625_v45 }
 0x19d   :  { %v646_v50 = vmax.f32 %v633_v12, 0.0  ;;  %v647_v53 = vmax.f32 %v634_v13, 0.0  ;;  %v648_v52 = vmax.f32 %v635_v10, 0.0  ;;  %v649_v26 = vmax.f32 %v636_v4, 0.0 }
 0x19e   :  { %v650_v39 = vmax.f32 %v637_v23, 0.0  ;;  %v5191_v58 = vmax.f32 %v638_v11, 0.0  ;;  %v652_v38 = vmax.f32 %v639_v40, 0.0  ;;  %v5193_v62 = vmax.f32 %v640_v47, 0.0 }
 0x19f   :  { %v5203_v42 = vcombine.low %v646_v50, %v647_v53  ;;  %v5205_v20 = vcombine.low %v648_v52, %v649_v26  ;;  %v641_v34 = vmul.f32 %v4412_v51, %v626_v46  ;;  %v642_v45 = vmul.f32 %v4412_v51, %v627_v57 }
 0x1a0   :  { %v5216_v13 = vcombine.low %v650_v39, %v5191_v58  ;;  %v5219_v10 = vcombine.low %v652_v38, %v5193_v62  ;;  %v643_v4 = vmul.f32 %v4412_v51, %v628_v60  ;;  %v644_v23 = vmul.f32 %v4412_v51, %v629_v61 }
 0x1a1   :  { %688 = vst [vmem:[#allocation2 + $0x4] sm:$0xff] %v5203_v42  ;;  %689 = vst [vmem:[#allocation2 + $0xc] sm:$0xff] %v5205_v20  ;;  %v5231_v57 = vcombine.low %v649_v26, %v649_v26  ;;  %v5233_v11 = vcombine.low %v647_v53, %v647_v53  ;;  %v654_v40 = vmax.f32 %v641_v34, 0.0  ;;  %v5235_v47 = vmax.f32 %v642_v45, 0.0 }
 0x1a2   :  { %690 = vst [vmem:[#allocation2 + $0x14] sm:$0xff] %v5216_v13  ;;  %691 = vst [vmem:[#allocation2 + $0x1c] sm:$0xff] %v5219_v10  ;;  %v656_v61 = vmax.f32 %v643_v4, 0.0  ;;  %v5247_v50 = vmax.f32 %v644_v23, 0.0  ;;  %v941_v53 = vadd.s32 28, %v5096_v59  ;;  %v1149_v26 = vadd.s32 784, %v5104_v48 }
 0x1a3   :  { %v5260_v39 = vcombine.low %v654_v40, %v5235_v47  ;;  %v645_v38 = vmul.f32 %v4412_v51, %v630_v1  ;;  %v1948_v34 = vsel %vm5156_vm5, %v5203_v42, 0.0  ;;  %v1949_v45 = vsel %vm5166_vm3, %v5233_v11, 0.0 }
 0x1a4   :  { %v5277_v23 = vcombine.low %v656_v61, %v5247_v50  ;;  %1961 = vst [vmem:[#allocation3 + $0xd0] sm:$0xf] %v1948_v34  ;;  %1962 = vst [vmem:[#allocation3 + $0xd8] sm:$0xf] %v1949_v45  ;;  %v1950_v51 = vsel %vm5176_vm8, %v5205_v20, 0.0  ;;  %v1951_v1 = vsel %vm5186_vm7, %v5231_v57, 0.0  ;;  %v5314_v61 = vsel %vm5254_vm10, %v5122_v17, %v5086_v44 }
 0x1a5   :  { %vm7669_vm3 = vcmp.ne.s32.totalorder %v5104_v48, 0  ;;  %vm7670_vm5 = vcmp.lt.s32.totalorder %v5104_v48, 0  ;;  %692 = vst [vmem:[#allocation2 + $0x24] sm:$0xff] %v5260_v39  ;;  %v658_v40 = vmax.f32 %v645_v38, 0.0  ;;  %1963 = vst [vmem:[#allocation3 + $0xe0] sm:$0xf] %v1950_v51  ;;  %v5337_v44 = vsel %vm5211_vm4, %v5099_v24, %v5033_v36 }
 0x1a6   :  { %vm5290_vm13 = vmand %vm7670_vm5, %vm7669_vm3  ;;  %1964 = vst [vmem:[#allocation3 + $0xe8] sm:$0xf] %v1951_v1  ;;  %vm7525_vm8 = vcmp.ge.s32.totalorder %v5065_v27, 0  ;;  %vm7673_vm7 = vcmp.lt.s32.totalorder %v5110_v6, 0  ;;  %vm7526_vm3 = vcmp.ge.s32.totalorder %v5047_v33, 0  ;;  %vm7681_vm10 = vcmask 257024  }
 0x1a7   :  { %vm5300_vm15 = vmand %vm7673_vm7, %vm1111_vm12  ;;  %7677 = vst [vmem:[#allocation5_spill] sm:$0xff] %v5314_v61  ;;  %vm7678_vm12 = vcmp.ge.s32.totalorder %v4889_v21, 0  ;;  %vm7682_vm5 = vcmp.ge.s32.totalorder %v5008_v28, 0  ;;  %v5353_v22 = vsel %vm5272_vm2, %v941_v53, %v5096_v59  ;;  %v5358_v36 = vsel %vm5290_vm13, %v1149_v26, %v5104_v48 }
 0x1a8   :  { %693 = vst [vmem:[#allocation2 + $0x2c] sm:$0xff] %v5277_v23  ;;  %vm5321_vm0 = vmand %vm7678_vm12, %vm7575_vm6  ;;  %vm7560_vm12 = vcmp.ge.s32.totalorder %v5083_v19, 0  ;;  %v5360_v37 = vld [vmem:[#allocation2 + $0x8] sm:$0xff]  ;;  %vm7687_vm4 = vcmp.ge.s32.totalorder %v5042_v30, 0  ;;  %v5374_v59 = vsel %vm5225_vm14, %v5107_v15, %v5058_v54  ;;  %v5379_v48 = vsel %vm5300_vm15, %v1150_v9, %v5110_v6  ;;  %v5421_v52 = vld [vmem:[#allocation2] sm:$0xff] }
 0x1a9   :  { %694 = vst.msk [vmem:[#allocation2 + $0x34] sm:$0xf] %vm7681_vm10, %v658_v40  ;;  %vm5344_vm7 = vmand %vm7682_vm5, %vm7574_vm9  ;;  %vm7553_vm2 = vcmp.ge.s32.totalorder %v5308_v14, 0  ;;  %vm7528_vm13 = vcmp.ge.s32.totalorder %v5314_v61, 0  ;;  %1627 = vrot.lane.b32.xlu0 %v5360_v37, %s4429_s15  ;;  %1447 = vrot.lane.b32.xlu1 %v5360_v37, %s4430_s16  ;;  %v1886_v17 = vld [vmem:[#allocation2 + $0x14] sm:$0xff]  ;;  %vm7557_vm15 = vcmp.ge.s32.totalorder %v5331_v32, 0 }
 0x1aa   :  { %7685 = vst [vmem:[#allocation6_spill] sm:$0xff] %v5353_v22  ;;  %7686 = vst [vmem:[#allocation7_spill] sm:$0xff] %v5358_v36  ;;  %vm7556_vm5 = vcmp.ge.s32.totalorder %v5337_v44, 0  ;;  %v1938_v15 = vcombine.high %v1886_v17, %v1886_v17  ;;  %v1952_v6 = vsel %vm5321_vm0, %v1886_v17, 0.0  ;;  %v1887_v35 = vld [vmem:[#allocation2 + $0x1c] sm:$0xff]  ;;  %vm7555_vm0 = vcmp.ge.s32.totalorder %v5379_v48, 0 }
 0x1ab   :  { %vm5366_vm10 = vmand %vm7525_vm8, %vm7687_vm4  ;;  %7690 = vst [vmem:[#allocation8_spill] sm:$0xff] %v5374_v59  ;;  %vm7543_vm8 = vcmp.ge.s32.totalorder %v5358_v36, 0  ;;  %v1939_v46 = vcombine.high %v1887_v35, %v1887_v35  ;;  %v5460_v24 = vld [vmem:[#allocation2 + $0x10] sm:$0xff]  ;;  %v1386_v17 = vld [vmem:[#allocation2 + $0x18] sm:$0xff] }
 0x1ac   :  { %7691 = vst [vmem:[#allocation9_spill] sm:$0xff] %v5379_v48  ;;  %vm5391_vm14 = vmand %vm7524_vm11, %vm7526_vm3  ;;  %vm7547_vm11 = vcmp.ge.s32.totalorder %v5353_v22, 0  ;;  %v1954_v60 = vsel %vm5366_vm10, %v1887_v35, 0.0  ;;  %vm7544_vm3 = vcmp.ge.s32.totalorder %v5374_v59, 0  ;;  %v1953_v26 = vsel %vm5344_vm7, %v1938_v15, 0.0  ;;  %v1888_v34 = vld [vmem:[#allocation2 + $0x24] sm:$0xff] }
 0x1ad   :  { %vm5403_vm4 = vmand %vm7527_vm1, %vm7560_vm12  ;;  %1965 = vst [vmem:[#allocation3 + $0xf0] sm:$0xf] %v1952_v6  ;;  %1623 = vrot.lane.b32.xlu0 %v5421_v52, %s4429_s15  ;;  %1768 = vrot.lane.b32.xlu1 %v5360_v37, %s4431_s17  ;;  %v1955_v45 = vsel %vm5391_vm14, %v1939_v46, 0.0  ;;  %v1940_v4 = vcombine.high %v1888_v34, %v1888_v34  ;;  %vm7698_vm14 = vcmask 257024   ;;  %v1387_v54 = vld [vmem:[#allocation2 + $0x20] sm:$0xff]  ;;  %v1616_v15 = vcombine.high %v5421_v52, %v5421_v52 }
 0x1ae   :  { %vm5417_vm1 = vmand %vm7528_vm13, %vm7553_vm2  ;;  %1967 = vst [vmem:[#allocation3 + $0x100] sm:$0xf] %v1954_v60  ;;  %v1956_v51 = vsel %vm5403_vm4, %v1888_v34, 0.0  ;;  %vm7707_vm4 = vcmp.ge.s32.totalorder %v4761_v43, 0  ;;  %vm7558_vm2 = vcmp.le.s32.totalorder %v4774_v55, 26  ;;  %vm7565_vm12 = vcmp.ge.s32.totalorder %v4859_v63, 28 }
 0x1af   :  { %vm1900_vm10 = vmand %vm7556_vm5, %vm7557_vm15  ;;  %1966 = vst [vmem:[#allocation3 + $0xf8] sm:$0xf] %v1953_v26  ;;  %v1889_v1 = vld [vmem:[#allocation2 + $0x2c] sm:$0xff]  ;;  %vm7561_vm5 = vcmask 220160   ;;  %vm7567_vm15 = vcmp.lt.s32.totalorder %v4778_v56, 756 }
 0x1b0   :  { %vm1902_vm7 = vmand %vm7543_vm8, %vm7547_vm11  ;;  %1968 = vst [vmem:[#allocation3 + $0x108] sm:$0xf] %v1955_v45  ;;  %v1941_v9 = vcombine.high %v1889_v1, %v1889_v1  ;;  %v1958_v16 = vsel %vm5417_vm1, %v1889_v1, 0.0  ;;  %v1957_v40 = vsel %vm1900_vm10, %v1940_v4, 0.0  ;;  %v1890_v49 = vld [vmem:[#allocation2 + $0x34] sm:$0xf]  ;;  %v1440_v45 = vcombine.high %v1387_v54, %v1387_v54 }
 0x1b1   :  { %1969 = vst [vmem:[#allocation3 + $0x110] sm:$0xf] %v1956_v51  ;;  %vm1903_vm13 = vmand %vm7555_vm0, %vm7544_vm3  ;;  %2037 = vrot.lane.b32.xlu0 %v5205_v20, %s4432_s18  ;;  %1443 = vrot.lane.b32.xlu1 %v5421_v52, %s4430_s16  ;;  %vm1164_vm1 = vcmp.ge.s32.totalorder %v4778_v56, 28  ;;  %vm1203_vm3 = vcmp.ge.s32.totalorder %v4761_v43, 1  ;;  %vm7570_vm11 = vcmp.ge.s32.totalorder %v4774_v55, 1 }
 0x1b2   :  { %1971 = vst [vmem:[#allocation3 + $0x120] sm:$0xf] %v1958_v16  ;;  %1970 = vst [vmem:[#allocation3 + $0x118] sm:$0xf] %v1957_v40  ;;  %v1959_v38 = vsel %vm1902_vm7, %v1941_v9, 0.0  ;;  %v1960_v8 = vsel %vm1903_vm13, %v1890_v49, 0.0  ;;  %v1438_v9 = vcombine.high %v5460_v24, %v5460_v24  ;;  %v5603_v16 = vcombine.low %v5193_v62, %v5193_v62 }
 0x1b3   :  { %1972 = vst [vmem:[#allocation3 + $0x128] sm:$0xf] %v1959_v38  ;;  %1973 = vst.msk [vmem:[#allocation3 + $0x130] sm:$0xf] %vm7698_vm14, %v1960_v8  ;;  %vm1165_vm13 = vcmp.ge.s32.totalorder %v4785_v7, 28  ;;  %vm7576_vm7 = vcmask 228352  }
 0x1b4   :  { %vm1390_vm10 = vmand %vm1164_vm1, %vm7707_vm4  ;;  %vm7708_vm14 = vcmp.ge.s32.totalorder %v4774_v55, 0 }
 0x1b5   :  { %2350 = vrot.lane.b32.xlu0 %v5205_v20, %s4433_s19  ;;  %1764 = vrot.lane.b32.xlu1 %v5421_v52, %s4431_s17  ;;  %vm1391_vm8 = vmand %vm1165_vm13, %vm7708_vm14  ;;  %vm7562_vm14 = vcmask 236544  }
 0x1b6   :  { %vm5712_vm4 = vmand %vm1164_vm1, %vm1203_vm3 }
 0x1b9   :  { %2346 = vrot.lane.b32.xlu0 %v5203_v42, %s4433_s19  ;;  %1306 = vrot.lane.b32.xlu1 %v5360_v37, %s4434_s20 }
 0x1bd   :  { %1451 = vrot.lane.b32.xlu0 %v5460_v24, %s4430_s16  ;;  %1302 = vrot.lane.b32.xlu1 %v5421_v52, %s4434_s20 }
 0x1c1   :  { %1772 = vrot.lane.b32.xlu0 %v5460_v24, %s4431_s17  ;;  %2033 = vrot.lane.b32.xlu1 %v5203_v42, %s4432_s18 }
 0x1c5   :  { %2213 = vrot.lane.b32.xlu0 %v5205_v20, %s4435_s21  ;;  %2209 = vrot.lane.b32.xlu1 %v5203_v42, %s4435_s21 }
 0x1c9   :  { %2522 = vrot.lane.b32.xlu0 %v5203_v42, %s4436_s22  ;;  %1310 = vrot.lane.b32.xlu1 %v5460_v24, %s4434_s20  ;;  %v5502_v42 = vld [vmem:[#allocation2 + $0x28] sm:$0xff] }
 0x1cd   :  { %2045 = vrot.lane.b32.xlu0 %v5219_v10, %s4432_s18  ;;  %1631 = vrot.lane.b32.xlu1 %v5460_v24, %s4429_s15 }
 0x1d1   :  { %2358 = vrot.lane.b32.xlu0 %v5219_v10, %s4433_s19  ;;  %1455 = vrot.lane.b32.xlu1 %v1386_v17, %s4430_s16 }
 0x1d5   :  { %1459 = vrot.lane.b32.xlu0 %v1387_v54, %s4430_s16  ;;  %1776 = vrot.lane.b32.xlu1 %v1386_v17, %s4431_s17 }
 0x1d9   :  { %1780 = vrot.lane.b32.xlu0 %v1387_v54, %s4431_s17  ;;  %2041 = vrot.lane.b32.xlu1 %v5216_v13, %s4432_s18 }
 0x1dd   :  { %2221 = vrot.lane.b32.xlu0 %v5219_v10, %s4435_s21  ;;  %2354 = vrot.lane.b32.xlu1 %v5216_v13, %s4433_s19 }
 0x1e1   :  { %1318 = vrot.lane.b32.xlu0 %v1387_v54, %s4434_s20  ;;  %1314 = vrot.lane.b32.xlu1 %v1386_v17, %s4434_s20 }
 0x1e5   :  { %1639 = vrot.lane.b32.xlu0 %v1387_v54, %s4429_s15  ;;  %1635 = vrot.lane.b32.xlu1 %v1386_v17, %s4429_s15 }
 0x1e9   :  { %2530 = vrot.lane.b32.xlu0 %v5216_v13, %s4436_s22  ;;  %2217 = vrot.lane.b32.xlu1 %v5216_v13, %s4435_s21  ;;  %v4421_v13 = vcombine.low %v5191_v58, %v5191_v58 }
 0x1ed   :  { %1463 = vrot.lane.b32.xlu0 %v5502_v42, %s4430_s16  ;;  %2526 = vrot.lane.b32.xlu1 %v5205_v20, %s4436_s22  ;;  %v1617_v20 = vcombine.high %v5360_v37, %v5360_v37  ;;  %v5544_v37 = vld [vmem:[#allocation2 + $0x30] sm:$0xff] }
 0x1f1   :  { %1784 = vrot.lane.b32.xlu0 %v5502_v42, %s4431_s17  ;;  %1445 = vrot.lane.b32.xlu1 %v1616_v15, %s4430_s16 }
 0x1f5   :  { %2049 = vrot.lane.b32.xlu0 %v5260_v39, %s4432_s18  ;;  %1304 = vrot.lane.b32.xlu1 %v1616_v15, %s4434_s20 }
 0x1f9   :  { %2362 = vrot.lane.b32.xlu0 %v5260_v39, %s4433_s19  ;;  %1625 = vrot.lane.b32.xlu1 %v1616_v15, %s4429_s15 }
 0x1fd   :  { %1322 = vrot.lane.b32.xlu0 %v5502_v42, %s4434_s20  ;;  %2035 = vrot.lane.b32.xlu1 %v5233_v11, %s4432_s18 }
 0x201   :  { %1643 = vrot.lane.b32.xlu0 %v5502_v42, %s4429_s15  ;;  %2348 = vrot.lane.b32.xlu1 %v5233_v11, %s4433_s19 }
 0x205   :  { %2225 = vrot.lane.b32.xlu0 %v5260_v39, %s4435_s21  ;;  %1449 = vrot.lane.b32.xlu1 %v1617_v20, %s4430_s16 }
 0x209   :  { %2534 = vrot.lane.b32.xlu0 %v5219_v10, %s4436_s22  ;;  %1770 = vrot.lane.b32.xlu1 %v1617_v20, %s4431_s17  ;;  %v1439_v10 = vcombine.high %v1386_v17, %v1386_v17 }
 0x20d   :  { %2053 = vrot.lane.b32.xlu0 %v5277_v23, %s4432_s18  ;;  %2211 = vrot.lane.b32.xlu1 %v5233_v11, %s4435_s21 }
 0x211   :  { %2366 = vrot.lane.b32.xlu0 %v5277_v23, %s4433_s19  ;;  %2043 = vrot.lane.b32.xlu1 %v4421_v13, %s4432_s18 }
 0x215   :  { %1467 = vrot.lane.b32.xlu0 %v5544_v37, %s4430_s16  ;;  %2356 = vrot.lane.b32.xlu1 %v4421_v13, %s4433_s19 }
 0x219   :  { %1788 = vrot.lane.b32.xlu0 %v5544_v37, %s4431_s17  ;;  %1457 = vrot.lane.b32.xlu1 %v1439_v10, %s4430_s16 }
 0x21b   :  { %v5552_v6 = vpop.permute.xlu0 %1627  ;;  %v5554_v58 = vpop.permute.xlu1 %1447 }
 0x21d   :  { %2229 = vrot.lane.b32.xlu0 %v5277_v23, %s4435_s21  ;;  %1778 = vrot.lane.b32.xlu1 %v1439_v10, %s4431_s17 }
 0x21f   :  { %v5559_v35 = vpop.permute.xlu0 %1623  ;;  %v5561_v12 = vpop.permute.xlu1 %1768 }
 0x221   :  { %1326 = vrot.lane.b32.xlu0 %v5544_v37, %s4434_s20  ;;  %2219 = vrot.lane.b32.xlu1 %v4421_v13, %s4435_s21 }
 0x223   :  { %v5566_v46 = vpop.permute.xlu0 %2037  ;;  %v5568_v60 = vpop.permute.xlu1 %1443 }
 0x225   :  { %1647 = vrot.lane.b32.xlu0 %v5544_v37, %s4429_s15  ;;  %1316 = vrot.lane.b32.xlu1 %v1439_v10, %s4434_s20 }
 0x227   :  { %v5573_v53 = vpop.permute.xlu0 %2350  ;;  %v5575_v52 = vpop.permute.xlu1 %1764 }
 0x229   :  { %2538 = vrot.lane.b32.xlu0 %v5260_v39, %s4436_s22  ;;  %1637 = vrot.lane.b32.xlu1 %v1439_v10, %s4429_s15 }
 0x22b   :  { %v5580_v26 = vpop.permute.xlu0 %2346  ;;  %v5582_v34 = vpop.permute.xlu1 %1306 }
 0x22d   :  { %1766 = vrot.lane.b32.xlu0 %v1616_v15, %s4431_s17  ;;  %2528 = vrot.lane.b32.xlu1 %v5231_v57, %s4436_s22 }
 0x22f   :  { %v5587_v4 = vpop.permute.xlu0 %1451  ;;  %v5589_v51 = vpop.permute.xlu1 %1302 }
 0x231   :  { %1308 = vrot.lane.b32.xlu0 %v1617_v20, %s4434_s20  ;;  %1461 = vrot.lane.b32.xlu1 %v1440_v45, %s4430_s16 }
 0x233   :  { %v5593_v39 = vpop.permute.xlu0 %1772  ;;  %v5595_v1 = vpop.permute.xlu1 %2033 }
 0x235   :  { %1629 = vrot.lane.b32.xlu0 %v1617_v20, %s4429_s15  ;;  %1782 = vrot.lane.b32.xlu1 %v1440_v45, %s4431_s17 }
 0x237   :  { %v5605_v40 = vpop.permute.xlu0 %2213  ;;  %v5607_v49 = vpop.permute.xlu1 %2209 }
 0x238   :  { %7699 = vst [vmem:[#allocation10_spill] sm:$0xff] %v5605_v40 }
 0x239   :  { %1453 = vrot.lane.b32.xlu0 %v1438_v9, %s4430_s16  ;;  %2047 = vrot.lane.b32.xlu1 %v5603_v16, %s4432_s18 }
 0x23b   :  { %v5612_v38 = vpop.permute.xlu0 %2522  ;;  %v5614_v8 = vpop.permute.xlu1 %1310 }
 0x23c   :  { %7700 = vst [vmem:[#allocation11_spill] sm:$0xff] %v5612_v38  ;;  %7701 = vst [vmem:[#allocation12_spill] sm:$0xff] %v5614_v8 }
 0x23d   :  { %1774 = vrot.lane.b32.xlu0 %v1438_v9, %s4431_s17  ;;  %2360 = vrot.lane.b32.xlu1 %v5603_v16, %s4433_s19 }
 0x23f   :  { %v5619_v62 = vpop.permute.xlu0 %2045  ;;  %v5621_v24 = vpop.permute.xlu1 %1631 }
 0x240   :  { %7702 = vst [vmem:[#allocation13_spill] sm:$0xff] %v5621_v24 }
 0x241   :  { %2039 = vrot.lane.b32.xlu0 %v5231_v57, %s4432_s18  ;;  %1320 = vrot.lane.b32.xlu1 %v1440_v45, %s4434_s20 }
 0x243   :  { %v5626_v17 = vpop.permute.xlu0 %2358  ;;  %v5628_v54 = vpop.permute.xlu1 %1455 }
 0x245   :  { %2352 = vrot.lane.b32.xlu0 %v5231_v57, %s4433_s19  ;;  %1641 = vrot.lane.b32.xlu1 %v1440_v45, %s4429_s15  ;;  %v5648_v45 = vcombine.low %v5235_v47, %v5235_v47  ;;  %v1441_v47 = vcombine.high %v5502_v42, %v5502_v42 }
 0x247   :  { %v5633_v15 = vpop.permute.xlu0 %1459  ;;  %v5635_v20 = vpop.permute.xlu1 %1776 }
 0x249   :  { %1312 = vrot.lane.b32.xlu0 %v1438_v9, %s4434_s20  ;;  %2223 = vrot.lane.b32.xlu1 %v5603_v16, %s4435_s21 }
 0x24b   :  { %v5640_v10 = vpop.permute.xlu0 %1780  ;;  %v5642_v41 = vpop.permute.xlu1 %2041 }
 0x24d   :  { %1633 = vrot.lane.b32.xlu0 %v1438_v9, %s4429_s15  ;;  %2532 = vrot.lane.b32.xlu1 %v4421_v13, %s4436_s22 }
 0x24f   :  { %v5650_v3 = vpop.permute.xlu0 %2221  ;;  %v5652_v38 = vpop.permute.xlu1 %2354 }
 0x251   :  { %2215 = vrot.lane.b32.xlu0 %v5231_v57, %s4435_s21  ;;  %2051 = vrot.lane.b32.xlu1 %v5648_v45, %s4432_s18  ;;  %v1980_v57 = vld [vmem:[#allocation2 + $0x34] sm:$0xf] }
 0x253   :  { %v5658_v22 = vpop.permute.xlu0 %1318  ;;  %v5660_v14 = vpop.permute.xlu1 %1314 }
 0x255   :  { %2524 = vrot.lane.b32.xlu0 %v5233_v11, %s4436_s22  ;;  %2364 = vrot.lane.b32.xlu1 %v5648_v45, %s4433_s19  ;;  %v2293_v11 = vld [vmem:[#allocation2 + $0x34] sm:$0xf] }
 0x257   :  { %v5668_v13 = vpop.permute.xlu0 %1639  ;;  %v5670_v9 = vpop.permute.xlu1 %1635 }
 0x259   :  { %2057 = vrot.lane.b32.xlu0 %v1980_v57, %s4432_s18  ;;  %1465 = vrot.lane.b32.xlu1 %v1441_v47, %s4430_s16  ;;  %v2156_v57 = vld [vmem:[#allocation2 + $0x34] sm:$0xf] }
 0x25b   :  { %v5674_v48 = vpop.permute.xlu0 %2530  ;;  %v5676_v36 = vpop.permute.xlu1 %2217 }
 0x25c   :  { %7703 = vst [vmem:[#allocation14_spill] sm:$0xff] %v5674_v48  ;;  %7704 = vst [vmem:[#allocation15_spill] sm:$0xff] %v5676_v36 }
 0x25d   :  { %2370 = vrot.lane.b32.xlu0 %v2293_v11, %s4433_s19  ;;  %1786 = vrot.lane.b32.xlu1 %v1441_v47, %s4431_s17 }
 0x25f   :  { %v5681_v42 = vpop.permute.xlu0 %1463  ;;  %v5683_v61 = vpop.permute.xlu1 %2526 }
 0x260   :  { %7705 = vst [vmem:[#allocation16_spill] sm:$0xff] %v5681_v42  ;;  %7706 = vst [vmem:[#allocation17_spill] sm:$0xff] %v5683_v61 }
 0x261   :  { %2233 = vrot.lane.b32.xlu0 %v2156_v57, %s4435_s21  ;;  %2227 = vrot.lane.b32.xlu1 %v5648_v45, %s4435_s21 }
 0x263   :  { %v5698_v11 = vpop.permute.xlu0 %1784  ;;  %v1446_v59 = vpop.permute.xlu1 %1445 }
 0x264   :  { %7709 = vst [vmem:[#allocation18_spill] sm:$0xff] %v5698_v11  ;;  %v1472_v57 = vsel %vm7576_vm7, %v5568_v60, %v1446_v59  ;;  %v1473_v24 = vsel %vm7576_vm7, %v1446_v59, %v5554_v58 }
 0x265   :  { %v1498_v42 = vsel %vm1390_vm10, %v1472_v57, 0.0  ;;  %v1499_v8 = vsel %vm1391_vm8, %v1473_v24, 0.0  ;;  %2542 = vrot.lane.b32.xlu0 %v5277_v23, %s4436_s22  ;;  %1324 = vrot.lane.b32.xlu1 %v1441_v47, %s4434_s20  ;;  %vm5720_vm8 = vmand %vm1165_vm13, %vm7570_vm11  ;;  %vm7559_vm10 = vcmp.le.s32.totalorder %v4761_v43, 26  ;;  %v5727_v23 = vcombine.high %v5544_v37, %v5544_v37 }
 0x266   :  { %v1524_v60 = vrot.slane %v1498_v42, 4  ;;  %v1525_v48 = vrot.slane %v1499_v8, 4  ;;  %vm1570_vm0 = vmand %vm1164_vm1, %vm7559_vm10  ;;  %vm7715_vm1 = vcmp.ge.s32.totalorder %v4778_v56, 0 }
 0x267   :  { %v5729_v24 = vpop.permute.xlu0 %2049  ;;  %v1305_v57 = vpop.permute.xlu1 %1304 }
 0x268   :  { %7714 = vst [vmem:[#allocation19_spill] sm:$0xff] %v5729_v24  ;;  %1550 = vst [vmem:[#allocation3] sm:$0xf0] %v1524_v60  ;;  %v1331_v8 = vsel %vm7562_vm14, %v5589_v51, %v1305_v57  ;;  %v1332_v42 = vsel %vm7562_vm14, %v1305_v57, %v5582_v34  ;;  %vm7728_vm14 = vcmp.ge.s32.totalorder %v4804_v18, 0 }
 0x269   :  { %1551 = vst [vmem:[#allocation3 + $0x8] sm:$0xf0] %v1525_v48  ;;  %v1357_v61 = vsel %vm5712_vm4, %v1331_v8, 0.0  ;;  %v1358_v37 = vsel %vm5720_vm8, %v1332_v42, 0.0  ;;  %1790 = vrot.lane.b32.xlu0 %v5727_v23, %s4431_s17  ;;  %1645 = vrot.lane.b32.xlu1 %v1441_v47, %s4429_s15  ;;  %vm1571_vm4 = vmand %vm1165_vm13, %vm7558_vm2  ;;  %vm7573_vm8 = vcmask 1039360  }
 0x26a   :  { %1370 = vst [vmem:[#allocation3] sm:$0xf] %v1357_v61  ;;  %1371 = vst [vmem:[#allocation3 + $0x8] sm:$0xf] %v1358_v37 }
 0x26b   :  { %v5751_v48 = vpop.permute.xlu0 %2362  ;;  %v1626_v51 = vpop.permute.xlu1 %1625  ;;  %vm5765_vm13 = vmand %vm7715_vm1, %vm7559_vm10  ;;  %vm7566_vm1 = vcmp.lt.s32.totalorder %v4785_v7, 756  ;;  %vm7563_vm10 = vcmask 818176  }
 0x26c   :  { %v1652_v11 = vsel %vm7561_vm5, %v5559_v35, %v1626_v51  ;;  %v1653_v47 = vsel %vm7561_vm5, %v1626_v51, %v5552_v6  ;;  %v2469_v51 = vld [vmem:[#allocation2 + $0x34] sm:$0xf]  ;;  %vm7564_vm5 = vcmp.ge.s32.totalorder %v4861_v0, 28 }
 0x26d   :  { %v1678_v60 = vsel %vm1570_vm0, %v1652_v11, 0.0  ;;  %v1679_v59 = vsel %vm1571_vm4, %v1653_v47, 0.0  ;;  %1649 = vrot.lane.b32.xlu0 %v5727_v23, %s4429_s15  ;;  %2536 = vrot.lane.b32.xlu1 %v5603_v16, %s4436_s22  ;;  %vm7718_vm0 = vcmp.ge.s32.totalorder %v4785_v7, 0  ;;  %v5780_v16 = vcombine.low %v5247_v50, %v5247_v50 }
 0x26e   :  { %1691 = vst [vmem:[#allocation3 + $0x68] sm:$0xf] %v1678_v60  ;;  %1692 = vst [vmem:[#allocation3 + $0x70] sm:$0xf] %v1679_v59 }
 0x26f   :  { %vm5773_vm4 = vmand %vm7718_vm0, %vm7558_vm2  ;;  %v5782_v57 = vpop.permute.xlu0 %1322  ;;  %v2036_v8 = vpop.permute.xlu1 %2035  ;;  %vm7721_vm0 = vcmp.ge.s32.totalorder %v4761_v43, 0 }
 0x270   :  { %v2060_v42 = vsel %vm7573_vm8, %v5595_v1, %v2036_v8  ;;  %v2061_v37 = vsel %vm7573_vm8, %v2036_v8, %v5566_v46  ;;  %vm5800_vm2 = vmand %vm7567_vm15, %vm7721_vm0  ;;  %vm7725_vm0 = vcmp.ge.s32.totalorder %v4789_v5, 0 }
 0x271   :  { %v2085_v11 = vsel %vm5765_vm13, %v2060_v42, 0.0  ;;  %v2086_v47 = vsel %vm5773_vm4, %v2061_v37, 0.0  ;;  %2546 = vrot.lane.b32.xlu0 %v2469_v51, %s4436_s22  ;;  %2055 = vrot.lane.b32.xlu1 %v5780_v16, %s4432_s18  ;;  %vm7724_vm13 = vcmp.ge.s32.totalorder %v4774_v55, 0 }
 0x272   :  { %v2111_v1 = vrot.slane %v2085_v11, 4  ;;  %v2112_v60 = vrot.slane %v2086_v47, 4  ;;  %vm2295_vm4 = vmand %vm7566_vm1, %vm7724_vm13 }
 0x273   :  { %v5809_v59 = vpop.permute.xlu0 %1643  ;;  %v2349_v61 = vpop.permute.xlu1 %2348  ;;  %vm5824_vm13 = vmand %vm7565_vm12, %vm7725_vm0  ;;  %vm7732_vm12 = vcmp.ge.s32.totalorder %v4861_v0, 0 }
 0x274   :  { %2137 = vst [vmem:[#allocation3 + $0xd0] sm:$0xf0] %v2111_v1  ;;  %2138 = vst [vmem:[#allocation3 + $0xd8] sm:$0xf0] %v2112_v60  ;;  %v2373_v35 = vsel %vm7563_vm10, %v5580_v26, %v2349_v61  ;;  %v2374_v8 = vsel %vm7563_vm10, %v2349_v61, %v5573_v53 }
 0x275   :  { %v2398_v42 = vsel %vm5800_vm2, %v2373_v35, 0.0  ;;  %v2399_v37 = vsel %vm2295_vm4, %v2374_v8, 0.0  ;;  %2368 = vrot.lane.b32.xlu1 %v5780_v16, %s4433_s19  ;;  %vm1393_vm10 = vmand %vm7564_vm5, %vm7728_vm14  ;;  %vm7569_vm2 = vcmp.ge.s32.totalorder %v4789_v5, 1  ;;  %vm7568_vm4 = vcmp.ge.s32.totalorder %v4804_v18, 1 }
 0x276   :  { %v2424_v11 = vrot.slane %v2398_v42, 4  ;;  %v2425_v26 = vrot.slane %v2399_v37, 4  ;;  %vm7729_vm14 = vcmp.ge.s32.totalorder %v4859_v63, 0  ;;  %vm7603_vm5 = vcmask 7168  }
 0x277   :  { %v5833_v47 = vpop.permute.xlu0 %2225  ;;  %v1450_v50 = vpop.permute.xlu1 %1449  ;;  %vm5848_vm0 = vmand %vm7729_vm14, %vm7569_vm2 }
 0x278   :  { %2450 = vst [vmem:[#allocation3 + $0x138] sm:$0xf0] %v2424_v11  ;;  %2451 = vst [vmem:[#allocation3 + $0x140] sm:$0xf0] %v2425_v26  ;;  %v1474_v1 = vsel %vm7576_vm7, %v5554_v58, %v1450_v50  ;;  %v1475_v60 = vsel %vm7576_vm7, %v1450_v50, %v5587_v4 }
 0x279   :  { %v1500_v61 = vsel %vm5824_vm13, %v1474_v1, 0.0  ;;  %v1501_v35 = vsel %vm1393_vm10, %v1475_v60, 0.0  ;;  %1469 = vrot.lane.b32.xlu1 %v5727_v23, %s4430_s16  ;;  %vm1714_vm13 = vmand %vm7732_vm12, %vm7568_vm4  ;;  %vm7579_vm10 = vcmask 826368   ;;  %vm7737_vm4 = vcmp.ge.s32.totalorder %v5008_v28, 0 }
 0x27a   :  { %v1526_v58 = vrot.slane %v1500_v61, 4  ;;  %v1527_v42 = vrot.slane %v1501_v35, 4  ;;  %vm5870_vm12 = vmand %vm7567_vm15, %vm1203_vm3 }
 0x27b   :  { %v5856_v37 = vpop.permute.xlu0 %2534  ;;  %v1771_v51 = vpop.permute.xlu1 %1770  ;;  %vm2158_vm14 = vmand %vm7566_vm1, %vm7570_vm11  ;;  %vm7736_vm1 = vcmp.ge.s32.totalorder %v4889_v21, 0  ;;  %vm7578_vm11 = vcmp.lt.s32.totalorder %v4889_v21, 756 }
 0x27c   :  { %1552 = vst [vmem:[#allocation3 + $0x10] sm:$0xf0] %v1526_v58  ;;  %1553 = vst [vmem:[#allocation3 + $0x18] sm:$0xf0] %v1527_v42  ;;  %v1795_v11 = vsel %vm7603_vm5, %v5561_v12, %v1771_v51  ;;  %v1796_v26 = vsel %vm7603_vm5, %v1771_v51, %v5593_v39 }
 0x27d   :  { %v1821_v50 = vsel %vm5848_vm0, %v1795_v11, 0.0  ;;  %v1822_v1 = vsel %vm1714_vm13, %v1796_v26, 0.0  ;;  %2231 = vrot.lane.b32.xlu1 %v5780_v16, %s4435_s21  ;;  %vm7572_vm0 = vcmp.le.s32.totalorder %v4883_v25, 26  ;;  %vm7571_vm13 = vcmp.le.s32.totalorder %v4885_v2, 26 }
 0x27e   :  { %v1847_v61 = vrot.slane %v1821_v50, 4  ;;  %v1848_v35 = vrot.slane %v1822_v1, 4  ;;  %vm1985_vm15 = vmand %vm7736_vm1, %vm7572_vm0  ;;  %vm7744_vm0 = vcmp.ge.s32.totalorder %v5042_v30, 0 }
 0x27f   :  { %v5879_v8 = vpop.permute.xlu0 %2053  ;;  %v2212_v58 = vpop.permute.xlu1 %2211  ;;  %vm1986_vm2 = vmand %vm7737_vm4, %vm7571_vm13 }
 0x280   :  { %7735 = vst [vmem:[#allocation20_spill] sm:$0xff] %v5879_v8  ;;  %1873 = vst [vmem:[#allocation3 + $0x78] sm:$0xf0] %v1847_v61  ;;  %v2236_v42 = vsel %vm7579_vm10, %v5607_v49, %v2212_v58  ;;  %v2237_v51 = vsel %vm7579_vm10, %v2212_v58, %v5605_v40 }
 0x281   :  { %1874 = vst [vmem:[#allocation3 + $0x80] sm:$0xf0] %v1848_v35  ;;  %v2261_v11 = vsel %vm5870_vm12, %v2236_v42, 0.0  ;;  %v2262_v26 = vsel %vm2158_vm14, %v2237_v51, 0.0  ;;  %2540 = vrot.lane.b32.xlu1 %v5648_v45, %s4436_s22  ;;  %vm7577_vm12 = vcmp.lt.s32.totalorder %v5008_v28, 756  ;;  %vm5912_vm1 = vmand %vm7578_vm11, %vm7575_vm6  ;;  %vm7742_vm14 = vcmask 818176  }
 0x282   :  { %2274 = vst [vmem:[#allocation3 + $0x138] sm:$0xf] %v2261_v11  ;;  %2275 = vst [vmem:[#allocation3 + $0x140] sm:$0xf] %v2262_v26 }
 0x283   :  { %v5899_v49 = vpop.permute.xlu0 %2366  ;;  %v2044_v50 = vpop.permute.xlu1 %2043  ;;  %vm2299_vm4 = vmand %vm7577_vm12, %vm7574_vm9  ;;  %vm7752_vm9 = vcmp.ge.s32.totalorder %v5070_v31, 0 }
 0x284   :  { %7738 = vst [vmem:[#allocation21_spill] sm:$0xff] %v5899_v49  ;;  %v2064_v45 = vsel %vm7573_vm8, %v5642_v41, %v2044_v50  ;;  %v2065_v1 = vsel %vm7573_vm8, %v2044_v50, %v5619_v62  ;;  %vm7743_vm13 = vmmov %vm7742_vm14  ;;  %v7790_v49 = vld [vmem:[#allocation14_spill] sm:$0xff] }
 0x285   :  { %v2089_v60 = vsel %vm1985_vm15, %v2064_v45, 0.0  ;;  %v2090_v61 = vsel %vm1986_vm2, %v2065_v1, 0.0  ;;  %1328 = vrot.lane.b32.xlu1 %v5727_v23, %s4434_s20  ;;  %vm1170_vm15 = vcmp.ge.s32.totalorder %v5065_v27, 28  ;;  %vm1171_vm2 = vcmp.ge.s32.totalorder %v5070_v31, 28 }
 0x286   :  { %v2115_v58 = vrot.slane %v2089_v60, 4  ;;  %v2116_v42 = vrot.slane %v2090_v61, 4  ;;  %vm5936_vm8 = vmand %vm1170_vm15, %vm7744_vm0  ;;  %vm7749_vm0 = vcmp.ge.s32.totalorder %v5065_v27, 0 }
 0x287   :  { %v5921_v51 = vpop.permute.xlu0 %1467  ;;  %v2357_v23 = vpop.permute.xlu1 %2356 }
 0x288   :  { %7741 = vst [vmem:[#allocation22_spill] sm:$0xff] %v5921_v51  ;;  %2141 = vst [vmem:[#allocation3 + $0xf0] sm:$0xf0] %v2115_v58  ;;  %v2377_v11 = vsel %vm7742_vm14, %v5652_v38, %v2357_v23  ;;  %v2378_v26 = vsel %vm7743_vm13, %v2357_v23, %v5626_v17  ;;  %vm7747_vm14 = vcmp.ge.s32.totalorder %v5047_v33, 0 }
 0x289   :  { %2142 = vst [vmem:[#allocation3 + $0xf8] sm:$0xf0] %v2116_v42  ;;  %v2402_v50 = vsel %vm5912_vm1, %v2377_v11, 0.0  ;;  %v2403_v45 = vsel %vm2299_vm4, %v2378_v26, 0.0  ;;  %2544 = vrot.lane.b32.xlu1 %v5780_v16, %s4436_s22  ;;  %vm1397_vm13 = vmand %vm1171_vm2, %vm7747_vm14  ;;  %vm7582_vm1 = vcmp.ge.s32.totalorder %v5042_v30, 1  ;;  %vm7581_vm4 = vcmp.ge.s32.totalorder %v5047_v33, 1 }
 0x28a   :  { %v2428_v60 = vrot.slane %v2402_v50, 4  ;;  %v2429_v61 = vrot.slane %v2403_v45, 4  ;;  %vm5958_vm14 = vmand %vm7749_vm0, %vm7582_vm1 }
 0x28b   :  { %v5945_v35 = vpop.permute.xlu0 %1788  ;;  %v1458_v16 = vpop.permute.xlu1 %1457  ;;  %vm1718_vm6 = vmand %vm7752_vm9, %vm7581_vm4 }
 0x28c   :  { %7748 = vst [vmem:[#allocation23_spill] sm:$0xff] %v5945_v35  ;;  %2454 = vst [vmem:[#allocation3 + $0x158] sm:$0xf0] %v2428_v60  ;;  %v1478_v58 = vsel %vm7576_vm7, %v5628_v54, %v1458_v16  ;;  %v1479_v42 = vsel %vm7576_vm7, %v1458_v16, %v5633_v15  ;;  %vm7584_vm7 = vcmp.ge.s32.totalorder %v4883_v25, 1  ;;  %v7789_v35 = vld [vmem:[#allocation17_spill] sm:$0xff] }
 0x28d   :  { %2455 = vst [vmem:[#allocation3 + $0x160] sm:$0xf0] %v2429_v61  ;;  %v1504_v23 = vsel %vm5936_vm8, %v1478_v58, 0.0  ;;  %v1505_v11 = vsel %vm1397_vm13, %v1479_v42, 0.0  ;;  %vm7583_vm8 = vcmp.ge.s32.totalorder %v4885_v2, 1  ;;  %vm2161_vm9 = vmand %vm7578_vm11, %vm7584_vm7 }
 0x28e   :  { %v1530_v50 = vrot.slane %v1504_v23, 4  ;;  %v1531_v45 = vrot.slane %v1505_v11, 4  ;;  %vm2162_vm13 = vmand %vm7577_vm12, %vm7583_vm8  ;;  %vm7773_vm8 = vcmp.ge.s32.totalorder %v4859_v63, 28 }
 0x28f   :  { %v5967_v1 = vpop.permute.xlu0 %2229  ;;  %v1779_v60 = vpop.permute.xlu1 %1778  ;;  %vm5995_vm0 = vmand %vm1170_vm15, %vm7582_vm1  ;;  %vm7768_vm1 = vcmp.ge.s32.totalorder %v4785_v7, 0 }
 0x290   :  { %7753 = vst [vmem:[#allocation24_spill] sm:$0xff] %v5967_v1  ;;  %1556 = vst [vmem:[#allocation3 + $0x30] sm:$0xf0] %v1530_v50  ;;  %v1799_v61 = vsel %vm7603_vm5, %v5635_v20, %v1779_v60  ;;  %v1800_v16 = vsel %vm7603_vm5, %v1779_v60, %v5640_v10 }
 0x291   :  { %1557 = vst [vmem:[#allocation3 + $0x38] sm:$0xf0] %v1531_v45  ;;  %v1825_v58 = vsel %vm5958_vm14, %v1799_v61, 0.0  ;;  %v1826_v42 = vsel %vm1718_vm6, %v1800_v16, 0.0  ;;  %vm7587_vm6 = vcmp.le.s32.totalorder %v5042_v30, 26  ;;  %vm7585_vm14 = vcmp.le.s32.totalorder %v5047_v33, 26  ;;  %vm1256_vm12 = vmand %vm1171_vm2, %vm7581_vm4 }
 0x292   :  { %v1851_v23 = vrot.slane %v1825_v58, 4  ;;  %v1852_v11 = vrot.slane %v1826_v42, 4  ;;  %vm7593_vm4 = vcmp.le.s32.totalorder %v4789_v5, 26 }
 0x293   :  { %v5984_v50 = vpop.permute.xlu0 %1326  ;;  %v2220_v45 = vpop.permute.xlu1 %2219 }
 0x294   :  { %7754 = vst [vmem:[#allocation25_spill] sm:$0xff] %v5984_v50  ;;  %1877 = vst [vmem:[#allocation3 + $0x98] sm:$0xf0] %v1851_v23  ;;  %v2240_v26 = vsel %vm7579_vm10, %v5676_v36, %v2220_v45  ;;  %v2241_v60 = vsel %vm7579_vm10, %v2220_v45, %v5650_v3 }
 0x295   :  { %1878 = vst [vmem:[#allocation3 + $0xa0] sm:$0xf0] %v1852_v11  ;;  %v2265_v61 = vsel %vm2161_vm9, %v2240_v26, 0.0  ;;  %v2266_v16 = vsel %vm2162_vm13, %v2241_v60, 0.0  ;;  %vm6010_vm9 = vmand %vm1170_vm15, %vm7587_vm6  ;;  %vm7760_vm13 = vcmask 236544   ;;  %vm7764_vm15 = vcmp.ge.s32.totalorder %v4778_v56, 0 }
 0x296   :  { %2278 = vst [vmem:[#allocation3 + $0x158] sm:$0xf] %v2265_v61  ;;  %2279 = vst [vmem:[#allocation3 + $0x160] sm:$0xf] %v2266_v16  ;;  %vm7602_vm6 = vcmp.ge.s32.totalorder %v5093_v29, 28 }
 0x297   :  { %v6004_v42 = vpop.permute.xlu0 %1647  ;;  %v1317_v23 = vpop.permute.xlu1 %1316  ;;  %vm7761_vm11 = vmmov %vm7760_vm13 }
 0x298   :  { %7757 = vst [vmem:[#allocation26_spill] sm:$0xff] %v6004_v42  ;;  %v1337_v45 = vsel %vm7760_vm13, %v5660_v14, %v1317_v23  ;;  %v1338_v26 = vsel %vm7761_vm11, %v1317_v23, %v5658_v22  ;;  %vm6022_vm10 = vmand %vm1171_vm2, %vm7585_vm14  ;;  %vm7590_vm11 = vcmp.lt.s32.totalorder %v4859_v63, 756  ;;  %vm7767_vm2 = vcmp.ge.s32.totalorder %v4774_v55, 1 }
 0x299   :  { %v1363_v61 = vsel %vm5995_vm0, %v1337_v45, 0.0  ;;  %v1364_v16 = vsel %vm1256_vm12, %v1338_v26, 0.0  ;;  %vm6032_vm13 = vmand %vm7764_vm15, %vm1203_vm3  ;;  %vm7591_vm12 = vcmp.lt.s32.totalorder %v4861_v0, 756  ;;  %vm7592_vm3 = vcmp.le.s32.totalorder %v4804_v18, 26 }
 0x29a   :  { %1376 = vst [vmem:[#allocation3 + $0x30] sm:$0xf] %v1363_v61  ;;  %1377 = vst [vmem:[#allocation3 + $0x38] sm:$0xf] %v1364_v16  ;;  %vm7772_vm15 = vcmp.ge.s32.totalorder %v4789_v5, 1 }
 0x29b   :  { %vm6042_vm0 = vmand %vm7768_vm1, %vm7767_vm2  ;;  %v6048_v23 = vpop.permute.xlu0 %2538  ;;  %v1638_v45 = vpop.permute.xlu1 %1637  ;;  %vm7776_vm1 = vcmask 220160  }
 0x29c   :  { %7771 = vst [vmem:[#allocation27_spill] sm:$0xff] %v6048_v23  ;;  %vm6054_vm7 = vmand %vm7773_vm8, %vm7772_vm15  ;;  %v1658_v61 = vsel %vm7776_vm1, %v5670_v9, %v1638_v45  ;;  %vm7599_vm15 = vcmask 809984  }
 0x29d   :  { %vm7777_vm2 = vmmov %vm7776_vm1  ;;  %v1684_v50 = vsel %vm6010_vm9, %v1658_v61, 0.0  ;;  %vm7601_vm1 = vcmp.ge.s32.totalorder %v5337_v44, 28  ;;  %vm7783_vm9 = vcmp.ge.s32.totalorder %v4861_v0, 28 }
 0x29e   :  { %v1659_v16 = vsel %vm7777_vm2, %v1638_v45, %v5668_v13  ;;  %vm6066_vm14 = vmand %vm7590_vm11, %vm7593_vm4  ;;  %1697 = vst [vmem:[#allocation3 + $0x98] sm:$0xf] %v1684_v50  ;;  %vm7782_vm2 = vcmp.ge.s32.totalorder %v4804_v18, 1  ;;  %vm7609_vm4 = vcmp.ge.s32.totalorder %v5331_v32, 1 }
 0x29f   :  { %v1685_v1 = vsel %vm6022_vm10, %v1659_v16, 0.0  ;;  %vm6079_vm8 = vmand %vm7591_vm12, %vm7592_vm3  ;;  %v1767_v60 = vpop.permute.xlu0 %1766  ;;  %v2529_v61 = vpop.permute.xlu1 %2528  ;;  %vm7786_vm10 = vcmp.ge.s32.totalorder %v5083_v19, 0  ;;  %vm7604_vm3 = vcmp.ge.s32.totalorder %v5083_v19, 1 }
 0x2a0   :  { %1698 = vst [vmem:[#allocation3 + $0xa0] sm:$0xf] %v1685_v1  ;;  %vm6088_vm11 = vmand %vm7783_vm9, %vm7782_vm2  ;;  %v1793_v1 = vsel %vm7603_vm5, %v5575_v52, %v1767_v60  ;;  %v1794_v50 = vsel %vm7603_vm5, %v1767_v60, %v5561_v12  ;;  %v2551_v51 = vsel %vm7599_vm15, %v7789_v35, %v2529_v61  ;;  %v2552_v8 = vsel %vm7599_vm15, %v2529_v61, %v7790_v49 }
 0x2a1   :  { %vm6096_vm12 = vmand %vm7602_vm6, %vm7786_vm10  ;;  %vm7791_vm2 = vcmp.ge.s32.totalorder %v5331_v32, 0  ;;  %v1819_v52 = vsel %vm6032_vm13, %v1793_v1, 0.0  ;;  %v1820_v12 = vsel %vm6042_vm0, %v1794_v50, 0.0  ;;  %v2576_v60 = vsel %vm6066_vm14, %v2551_v51, 0.0  ;;  %v7806_v1 = vld [vmem:[#allocation12_spill] sm:$0xff] }
 0x2a2   :  { %vm6114_vm9 = vmand %vm7601_vm1, %vm7791_vm2  ;;  %v2577_v61 = vsel %vm6079_vm8, %v2552_v8, 0.0  ;;  %vm7794_vm10 = vcmp.le.s32.totalorder %v4789_v5, 26  ;;  %vm7795_vm15 = vcmp.ge.s32.totalorder %v4859_v63, 28  ;;  %v1845_v40 = vrot.slane %v1819_v52, 4  ;;  %2589 = vst [vmem:[#allocation3 + $0x1b0] sm:$0xf] %v2576_v60 }
 0x2a3   :  { %vm6130_vm2 = vmand %vm7795_vm15, %vm7794_vm10  ;;  %v1846_v42 = vrot.slane %v1820_v12, 4  ;;  %2590 = vst [vmem:[#allocation3 + $0x1b8] sm:$0xf] %v2577_v61  ;;  %vm7798_vm13 = vcmp.le.s32.totalorder %v4804_v18, 26  ;;  %vm7799_vm0 = vcmp.ge.s32.totalorder %v4861_v0, 28  ;;  %vm7606_vm8 = vcmp.ge.s32.totalorder %v4889_v21, 28  ;;  %v1309_v8 = vpop.permute.xlu0 %1308  ;;  %v1462_v58 = vpop.permute.xlu1 %1461 }
 0x2a4   :  { %vm6138_vm14 = vmand %vm7799_vm0, %vm7798_vm13  ;;  %vm7802_vm15 = vcmp.ge.s32.totalorder %v5093_v29, 0  ;;  %vm7605_vm1 = vcmp.ge.s32.totalorder %v5008_v28, 28  ;;  %1871 = vst [vmem:[#allocation3 + $0x68] sm:$0xf0] %v1845_v40  ;;  %vm7805_vm13 = vcmask 236544   ;;  %vm7808_vm6 = vcmask 228352  }
 0x2a5   :  { %vm6147_vm10 = vmand %vm7802_vm15, %vm7604_vm3  ;;  %1872 = vst [vmem:[#allocation3 + $0x70] sm:$0xf0] %v1846_v42  ;;  %v1333_v45 = vsel %vm7805_vm13, %v5582_v34, %v1309_v8  ;;  %v1480_v52 = vsel %vm7808_vm6, %v5633_v15, %v1462_v58  ;;  %v7809_v12 = vld [vmem:[#allocation16_spill] sm:$0xff]  ;;  %vm7811_vm15 = vcmp.ge.s32.totalorder %v5337_v44, 0 }
 0x2a6   :  { %vm7807_vm0 = vmmov %vm7805_vm13  ;;  %v1359_v34 = vsel %vm6054_vm7, %v1333_v45, 0.0  ;;  %v1506_v15 = vsel %vm6096_vm12, %v1480_v52, 0.0  ;;  %vm7817_vm7 = vcmp.ge.s32.totalorder %v4885_v2, 0  ;;  %vm7820_vm12 = vcmp.le.s32.totalorder %v5042_v30, 26  ;;  %v7825_v52 = vld [vmem:[#allocation13_spill] sm:$0xff] }
 0x2a7   :  { %v1334_v50 = vsel %vm7807_vm0, %v1309_v8, %v7806_v1  ;;  %vm7810_vm5 = vmmov %vm7808_vm6  ;;  %1372 = vst [vmem:[#allocation3 + $0x10] sm:$0xf] %v1359_v34  ;;  %v1532_v26 = vrot.slane %v1506_v15, 4  ;;  %v1630_v36 = vpop.permute.xlu0 %1629  ;;  %v1783_v16 = vpop.permute.xlu1 %1782  ;;  %vm7824_vm0 = vcmask 220160  }
 0x2a8   :  { %v1481_v60 = vsel %vm7810_vm5, %v1462_v58, %v7809_v12  ;;  %vm6164_vm3 = vmand %vm7811_vm15, %vm7609_vm4  ;;  %v1360_v40 = vsel %vm6088_vm11, %v1334_v50, 0.0  ;;  %vm7814_vm5 = vcmp.ge.s32.totalorder %v4883_v25, 0  ;;  %v1654_v50 = vsel %vm7824_vm0, %v5552_v6, %v1630_v36 }
 0x2a9   :  { %v1507_v42 = vsel %vm6114_vm9, %v1481_v60, 0.0  ;;  %vm6180_vm6 = vmand %vm7606_vm8, %vm7814_vm5  ;;  %1373 = vst [vmem:[#allocation3 + $0x18] sm:$0xf] %v1360_v40  ;;  %vm7821_vm9 = vcmp.ge.s32.totalorder %v5065_v27, 0  ;;  %vm7827_vm5 = vcmask 7168   ;;  %v7828_v40 = vld [vmem:[#allocation18_spill] sm:$0xff] }
 0x2aa   :  { %v1533_v58 = vrot.slane %v1507_v42, 4  ;;  %vm6188_vm11 = vmand %vm7605_vm1, %vm7817_vm7  ;;  %1558 = vst [vmem:[#allocation3 + $0x40] sm:$0xf0] %v1532_v26  ;;  %v1801_v34 = vsel %vm7827_vm5, %v5640_v10, %v1783_v16  ;;  %vm7830_vm1 = vcmp.le.s32.totalorder %v5047_v33, 26  ;;  %v1680_v6 = vsel %vm6130_vm2, %v1654_v50, 0.0  ;;  %v2628_v42 = vld [vmem:[#allocation3 + $0xd8] sm:$0xff] }
 0x2ab   :  { %vm6196_vm13 = vmand %vm7821_vm9, %vm7820_vm12  ;;  %vm7831_vm12 = vcmp.ge.s32.totalorder %v5070_v31, 0  ;;  %v1827_v10 = vsel %vm6147_vm10, %v1801_v34, 0.0  ;;  %1693 = vst [vmem:[#allocation3 + $0x78] sm:$0xf] %v1680_v6  ;;  %vm7838_vm2 = vcmp.ge.s32.totalorder %v4885_v2, 1  ;;  %v1454_v23 = vpop.permute.xlu0 %1453  ;;  %v2048_v61 = vpop.permute.xlu1 %2047 }
 0x2ac   :  { %1559 = vst [vmem:[#allocation3 + $0x48] sm:$0xf0] %v1533_v58  ;;  %vm7826_vm15 = vmmov %vm7824_vm0  ;;  %vm7834_vm0 = vcmp.ge.s32.totalorder %v4883_v25, 1  ;;  %v1853_v35 = vrot.slane %v1827_v10, 4  ;;  %v2614_v10 = vld [vmem:[#allocation3 + $0x68] sm:$0xff] }
 0x2ad   :  { %v1655_v60 = vsel %vm7826_vm15, %v1630_v36, %v7825_v52  ;;  %vm7829_vm7 = vmmov %vm7827_vm5  ;;  %vm7835_vm15 = vcmp.ge.s32.totalorder %v4889_v21, 0  ;;  %vm7608_vm5 = vcmp.lt.s32.totalorder %v5070_v31, 756 }
 0x2ae   :  { %v1802_v15 = vsel %vm7829_vm7, %v1783_v16, %v7828_v40  ;;  %vm6212_vm9 = vmand %vm7831_vm12, %vm7830_vm1  ;;  %v1681_v26 = vsel %vm6138_vm14, %v1655_v60, 0.0  ;;  %vm7839_vm14 = vcmp.ge.s32.totalorder %v5008_v28, 0  ;;  %vm7842_vm7 = vcmp.le.s32.totalorder %v4789_v5, 26  ;;  %1879 = vst [vmem:[#allocation3 + $0xa8] sm:$0xf0] %v1853_v35 }
 0x2af   :  { %v1828_v58 = vsel %vm6164_vm3, %v1802_v15, 0.0  ;;  %vm6228_vm1 = vmand %vm7835_vm15, %vm7834_vm0  ;;  %1694 = vst [vmem:[#allocation3 + $0x80] sm:$0xf] %v1681_v26  ;;  %vm7612_vm3 = vcmp.lt.s32.totalorder %v5065_v27, 756  ;;  %vm7843_vm12 = vcmp.ge.s32.totalorder %v4859_v63, 0  ;;  %vm7846_vm15 = vcmask 228352   ;;  %v2361_v12 = vpop.permute.xlu1 %2360 }
 0x2b0   :  { %v1854_v16 = vrot.slane %v1828_v58, 4  ;;  %vm6236_vm10 = vmand %vm7839_vm14, %vm7838_vm2  ;;  %v1476_v60 = vsel %vm7846_vm15, %v5587_v4, %v1454_v23  ;;  %vm7848_vm14 = vcmask 1039360   ;;  %v2615_v26 = vld [vmem:[#allocation3 + $0x70] sm:$0xff]  ;;  %v2641_v58 = vld [vmem:[#allocation3 + $0x140] sm:$0xff] }
 0x2b1   :  { %vm6246_vm0 = vmand %vm7843_vm12, %vm7842_vm7  ;;  %v2066_v15 = vsel %vm7848_vm14, %v5619_v62, %v2048_v61  ;;  %v1502_v40 = vsel %vm6180_vm6, %v1476_v60, 0.0  ;;  %vm7850_vm7 = vcmp.ge.s32.totalorder %v5042_v30, 0  ;;  %v2601_v60 = vld [vmem:[#allocation3] sm:$0xff]  ;;  %vm7853_vm6 = vcmp.ge.s32.totalorder %v5047_v33, 0  ;;  %v2604_v62 = vld [vmem:[#allocation3 + $0x18] sm:$0xff] }
 0x2b2   :  { %1880 = vst [vmem:[#allocation3 + $0xb0] sm:$0xf0] %v1854_v16  ;;  %vm7847_vm2 = vmmov %vm7846_vm15  ;;  %v2091_v4 = vsel %vm6196_vm13, %v2066_v15, 0.0  ;;  %v2602_v16 = vld [vmem:[#allocation3 + $0x8] sm:$0xff]  ;;  %v1528_v8 = vrot.slane %v1502_v40, 4  ;;  %v1775_v15 = vpop.permute.xlu0 %1774  ;;  %vm7856_vm13 = vcmp.le.s32.totalorder %v4804_v18, 26 }
 0x2b3   :  { %v1477_v34 = vsel %vm7847_vm2, %v1454_v23, %v5628_v54  ;;  %vm7849_vm8 = vmmov %vm7848_vm14  ;;  %vm7611_vm15 = vcmp.le.s32.totalorder %v5083_v19, 26  ;;  %vm7860_vm2 = vcmask 7168   ;;  %v2616_v36 = vld [vmem:[#allocation3 + $0x78] sm:$0xff] }
 0x2b4   :  { %v2067_v6 = vsel %vm7849_vm8, %v2048_v61, %v5729_v24  ;;  %v1503_v35 = vsel %vm6188_vm11, %v1477_v34, 0.0  ;;  %vm6270_vm8 = vmand %vm7612_vm3, %vm7850_vm7  ;;  %v2117_v61 = vrot.slane %v2091_v4, 4  ;;  %v4282_v34 = vpack.c.bf16 %v2615_v26, %v2602_v16  ;;  %1554 = vst [vmem:[#allocation3 + $0x20] sm:$0xf0] %v1528_v8  ;;  %v2627_v4 = vld [vmem:[#allocation3 + $0xd0] sm:$0xff] }
 0x2b5   :  { %v2092_v54 = vsel %vm6212_vm9, %v2067_v6, 0.0  ;;  %v1529_v23 = vrot.slane %v1503_v35, 4  ;;  %vm6278_vm11 = vmand %vm7608_vm5, %vm7853_vm6  ;;  %v4284_v6 = vpack.c.bf16 %v2614_v10, %v2601_v60  ;;  %v4286_v24 = vpack.c.bf16 %v2641_v58, %v2628_v42  ;;  %v2603_v42 = vld [vmem:[#allocation3 + $0x10] sm:$0xff] }
 0x2b6   :  { %v2118_v11 = vrot.slane %v2092_v54, 4  ;;  %vm7857_vm9 = vcmp.ge.s32.totalorder %v4861_v0, 0  ;;  %2143 = vst [vmem:[#allocation3 + $0x100] sm:$0xf0] %v2117_v61  ;;  %v1797_v26 = vsel %vm7860_vm2, %v5593_v39, %v1775_v15  ;;  %vm7861_vm14 = vmmov %vm7860_vm2  ;;  %vm7862_vm7 = vcmask 818176   ;;  %v2640_v54 = vld [vmem:[#allocation3 + $0x138] sm:$0xff]  ;;  %4283 = vmatprep.subr.bf16.mxu1 %v4282_v34  ;;  %v2040_v34 = vpop.permute.xlu0 %2039 }
 0x2b7   :  { %vm6286_vm12 = vmand %vm7857_vm9, %vm7856_vm13  ;;  %1555 = vst [vmem:[#allocation3 + $0x28] sm:$0xf0] %v1529_v23  ;;  %v1798_v10 = vsel %vm7861_vm14, %v1775_v15, %v5635_v20  ;;  %v2379_v58 = vsel %vm7862_vm7, %v5626_v17, %v2361_v12  ;;  %vm7864_vm13 = vcmp.ge.s32.totalorder %v5083_v19, 1  ;;  %vm7865_vm9 = vcmp.ge.s32.totalorder %v5093_v29, 28  ;;  %v2617_v23 = vld [vmem:[#allocation3 + $0x80] sm:$0xff]  ;;  %4285 = vmatpush1.bf16.msra.mxu1 %v4284_v6 }
 0x2b8   :  { %2144 = vst [vmem:[#allocation3 + $0x108] sm:$0xf0] %v2118_v11  ;;  %vm7863_vm6 = vmmov %vm7862_vm7  ;;  %v1823_v39 = vsel %vm6228_vm1, %v1797_v26, 0.0  ;;  %v1824_v17 = vsel %vm6236_vm10, %v1798_v10, 0.0  ;;  %v2404_v20 = vsel %vm6270_vm8, %v2379_v58, 0.0  ;;  %vm7868_vm2 = vcmp.ge.s32.totalorder %v5337_v44, 28  ;;  %4287 = vmatprep.subr.bf16.mxu1 %v4286_v24  ;;  %v1321_v26 = vpop.permute.xlu1 %1320 }
 0x2b9   :  { %v2380_v35 = vsel %vm7863_vm6, %v2361_v12, %v5751_v48  ;;  %vm6303_vm5 = vmand %vm7865_vm9, %vm7864_vm13  ;;  %v1849_v61 = vrot.slane %v1823_v39, 4  ;;  %v1850_v11 = vrot.slane %v1824_v17, 4  ;;  %v2430_v51 = vrot.slane %v2404_v20, 4  ;;  %v8003_v20 = vld [vmem:[#allocation22_spill] sm:$0xff] }
 0x2ba   :  { %v2405_v12 = vsel %vm6278_vm11, %v2380_v35, 0.0  ;;  %vm6319_vm14 = vmand %vm7868_vm2, %vm7609_vm4  ;;  %vm7871_vm1 = vcmp.ge.s32.totalorder %v4789_v5, 0  ;;  %vm7872_vm10 = vcmp.lt.s32.totalorder %v4859_v63, 756  ;;  %v4288_v15 = vpack.c.bf16 %v2640_v54, %v2627_v4  ;;  %v2353_v16 = vpop.permute.xlu0 %2352 }
 0x2bb   :  { %v2431_v60 = vrot.slane %v2405_v12, 4  ;;  %vm6327_vm8 = vmand %vm7872_vm10, %vm7871_vm1  ;;  %v4290_v10 = vpack.c.bf16 %v2617_v23, %v2604_v62  ;;  %v4292_v58 = vpack.c.bf16 %v2616_v36, %v2603_v42  ;;  %vm7875_vm11 = vcmp.ge.s32.totalorder %v4804_v18, 0  ;;  %1875 = vst [vmem:[#allocation3 + $0x88] sm:$0xf0] %v1849_v61 }
 0x2bc   :  { %vm7876_vm7 = vcmp.lt.s32.totalorder %v4861_v0, 756  ;;  %vm7610_vm13 = vcmp.le.s32.totalorder %v5331_v32, 26  ;;  %1876 = vst [vmem:[#allocation3 + $0x90] sm:$0xf0] %v1850_v11  ;;  %2456 = vst [vmem:[#allocation3 + $0x168] sm:$0xf0] %v2430_v51  ;;  %4289 = vmatpush1.bf16.msra.mxu1 %v4288_v15  ;;  %v1642_v8 = vpop.permute.xlu1 %1641 }
 0x2bd   :  { %vm6335_vm6 = vmand %vm7876_vm7, %vm7875_vm11  ;;  %2457 = vst [vmem:[#allocation3 + $0x170] sm:$0xf0] %v2431_v60  ;;  %vm7879_vm9 = vcmask 1039360   ;;  %vm7881_vm1 = vcmask 236544   ;;  %vm7883_vm11 = vcmp.ge.s32.totalorder %v4883_v25, 1  ;;  %vm7884_vm7 = vcmp.ge.s32.totalorder %v4889_v21, 28  ;;  %4291 = vmatprep.subr.bf16.mxu0 %v4290_v10 }
 0x2be   :  { %v2062_v24 = vsel %vm7879_vm9, %v5566_v46, %v2040_v34  ;;  %vm7880_vm2 = vmmov %vm7879_vm9  ;;  %v1339_v4 = vsel %vm7881_vm1, %v5658_v22, %v1321_v26  ;;  %vm7887_vm9 = vcmp.ge.s32.totalorder %v5093_v29, 28  ;;  %4293 = vmatpush1.bf16.msra.mxu0 %v4292_v58  ;;  %v7972_v15 = vld [vmem:[#allocation9_spill] sm:$0xff] }
 0x2bf   :  { %v2063_v35 = vsel %vm7880_vm2, %v2040_v34, %v5642_v41  ;;  %vm7882_vm10 = vmmov %vm7881_vm1  ;;  %v2087_v46 = vsel %vm6246_vm0, %v2062_v24, 0.0  ;;  %v1365_v22 = vsel %vm6303_vm5, %v1339_v4, 0.0  ;;  %vm7890_vm5 = vcmp.ge.s32.totalorder %v5337_v44, 28 }
 0x2c0   :  { %v1340_v54 = vsel %vm7882_vm10, %v1321_v26, %v5782_v57  ;;  %vm6352_vm4 = vmand %vm7884_vm7, %vm7883_vm11  ;;  %v2088_v41 = vsel %vm6286_vm12, %v2063_v35, 0.0  ;;  %v2113_v50 = vrot.slane %v2087_v46, 4  ;;  %1378 = vst [vmem:[#allocation3 + $0x40] sm:$0xf] %v1365_v22  ;;  %vm7893_vm12 = vcmp.ge.s32.totalorder %v4885_v2, 1  ;;  %v1313_v26 = vpop.permute.xlu0 %1312  ;;  %v2224_v10 = vpop.permute.xlu1 %2223 }
 0x2c1   :  { %v1366_v17 = vsel %vm6319_vm14, %v1340_v54, 0.0  ;;  %vm6368_vm2 = vmand %vm7887_vm9, %vm7611_vm15  ;;  %v2114_v12 = vrot.slane %v2088_v41, 4  ;;  %vm7894_vm14 = vcmp.ge.s32.totalorder %v5008_v28, 28  ;;  %vm7897_vm10 = vcmask 818176  }
 0x2c2   :  { %1379 = vst [vmem:[#allocation3 + $0x48] sm:$0xf] %v1366_v17  ;;  %vm6376_vm0 = vmand %vm7890_vm5, %vm7610_vm13  ;;  %v2375_v36 = vsel %vm7897_vm10, %v5573_v53, %v2353_v16  ;;  %vm7899_vm7 = vcmask 220160   ;;  %vm7901_vm5 = vcmp.ge.s32.totalorder %v5042_v30, 1 }
 0x2c3   :  { %vm6384_vm1 = vmand %vm7894_vm14, %vm7893_vm12  ;;  %2139 = vst [vmem:[#allocation3 + $0xe0] sm:$0xf0] %v2113_v50  ;;  %v1660_v11 = vsel %vm7899_vm7, %v5668_v13, %v1642_v8  ;;  %v2400_v53 = vsel %vm6327_vm8, %v2375_v36, 0.0  ;;  %vm7904_vm14 = vcmp.ge.s32.totalorder %v5047_v33, 1  ;;  %vm7908_vm8 = vcmp.le.s32.totalorder %v4883_v25, 26  ;;  %v7959_v36 = vld [vmem:[#allocation15_spill] sm:$0xff] }
 0x2c4   :  { %2140 = vst [vmem:[#allocation3 + $0xe8] sm:$0xf0] %v2114_v12  ;;  %vm7898_vm11 = vmmov %vm7897_vm10  ;;  %v1686_v13 = vsel %vm6368_vm2, %v1660_v11, 0.0  ;;  %vm7905_vm10 = vcmp.lt.s32.totalorder %v5070_v31, 756  ;;  %v2426_v34 = vrot.slane %v2400_v53, 4  ;;  %v1634_v39 = vpop.permute.xlu0 %1633  ;;  %v7961_v11 = vld [vmem:[#allocation19_spill] sm:$0xff] }
 0x2c5   :  { %v2376_v61 = vsel %vm7898_vm11, %v2353_v16, %v5652_v38  ;;  %vm7900_vm9 = vmmov %vm7899_vm7  ;;  %1699 = vst [vmem:[#allocation3 + $0xa8] sm:$0xf] %v1686_v13  ;;  %vm7913_vm7 = vcmp.ge.s32.totalorder %v5008_v28, 28  ;;  %v7954_v16 = vld [vmem:[#allocation8_spill] sm:$0xff] }
 0x2c6   :  { %v1661_v51 = vsel %vm7900_vm9, %v1642_v8, %v5809_v59  ;;  %vm6400_vm12 = vmand %vm7612_vm3, %vm7901_vm5  ;;  %v2401_v38 = vsel %vm6335_vm6, %v2376_v61, 0.0  ;;  %vm7909_vm6 = vcmp.ge.s32.totalorder %v4889_v21, 28  ;;  %2452 = vst [vmem:[#allocation3 + $0x148] sm:$0xf0] %v2426_v34  ;;  %vm7916_vm5 = vcmask 236544   ;;  %v7957_v8 = vld [vmem:[#allocation10_spill] sm:$0xff] }
 0x2c7   :  { %v1687_v62 = vsel %vm6376_vm0, %v1661_v51, 0.0  ;;  %vm6416_vm11 = vmand %vm7905_vm10, %vm7904_vm14  ;;  %v2427_v45 = vrot.slane %v2401_v38, 4  ;;  %vm7912_vm0 = vcmp.le.s32.totalorder %v4885_v2, 26  ;;  %v1335_v6 = vsel %vm7916_vm5, %v7806_v1, %v1313_v26 }
 0x2c8   :  { %1700 = vst [vmem:[#allocation3 + $0xb0] sm:$0xf] %v1687_v62  ;;  %vm6424_vm2 = vmand %vm7909_vm6, %vm7908_vm8  ;;  %vm7918_vm10 = vcmask 826368   ;;  %vm7920_vm6 = vcmp.le.s32.totalorder %v4883_v25, 26  ;;  %v1361_v1 = vsel %vm6352_vm4, %v1335_v6, 0.0  ;;  %vm7928_vm4 = vcmp.ge.s32.totalorder %v4789_v5, 1  ;;  %v2216_v50 = vpop.permute.xlu0 %2215 }
 0x2c9   :  { %vm6432_vm9 = vmand %vm7913_vm7, %vm7912_vm0  ;;  %2453 = vst [vmem:[#allocation3 + $0x150] sm:$0xf0] %v2427_v45  ;;  %v2242_v35 = vsel %vm7918_vm10, %v5650_v3, %v2224_v10  ;;  %vm7921_vm0 = vcmp.lt.s32.totalorder %v4889_v21, 756  ;;  %vm7962_vm3 = vcmask 1039360   ;;  %v7976_v6 = vld [vmem:[#allocation4_spill] sm:$0xff] }
 0x2ca   :  { %vm7917_vm14 = vmmov %vm7916_vm5  ;;  %v2267_v3 = vsel %vm6400_vm12, %v2242_v35, 0.0  ;;  %vm7924_vm5 = vcmp.le.s32.totalorder %v4885_v2, 26  ;;  %1374 = vst [vmem:[#allocation3 + $0x20] sm:$0xf] %v1361_v1  ;;  %v2533_v2 = vpop.permute.xlu1 %2532  ;;  %v7980_v35 = vld [vmem:[#allocation6_spill] sm:$0xff]  ;;  %v7983_v1 = vld [vmem:[#allocation17_spill] sm:$0xff] }
 0x2cb   :  { %v1336_v24 = vsel %vm7917_vm14, %v1313_v26, %v5660_v14  ;;  %vm7919_vm8 = vmmov %vm7918_vm10  ;;  %vm7925_vm14 = vcmp.lt.s32.totalorder %v5008_v28, 756  ;;  %2280 = vst [vmem:[#allocation3 + $0x168] sm:$0xf] %v2267_v3  ;;  %v2645_v26 = vld [vmem:[#allocation3 + $0x160] sm:$0xff] }
 0x2cc   :  { %v2243_v4 = vsel %vm7919_vm8, %v2224_v10, %v5833_v47  ;;  %vm6448_vm7 = vmand %vm7921_vm0, %vm7920_vm6  ;;  %v1362_v14 = vsel %vm6384_vm1, %v1336_v24, 0.0  ;;  %vm7929_vm1 = vcmp.lt.s32.totalorder %v4859_v63, 756  ;;  %vm7933_vm8 = vcmp.lt.s32.totalorder %v4861_v0, 756  ;;  %v2525_v10 = vpop.permute.xlu0 %2524 }
 0x2cd   :  { %v2268_v46 = vsel %vm6416_vm11, %v2243_v4, 0.0  ;;  %vm6464_vm10 = vmand %vm7925_vm14, %vm7924_vm5  ;;  %1375 = vst [vmem:[#allocation3 + $0x28] sm:$0xf] %v1362_v14  ;;  %vm7932_vm11 = vcmp.ge.s32.totalorder %v4804_v18, 1  ;;  %vm7614_vm0 = vcmp.lt.s32.totalorder %v5093_v29, 756  ;;  %vm7936_vm5 = vcmask 220160  }
 0x2ce   :  { %2281 = vst [vmem:[#allocation3 + $0x170] sm:$0xf] %v2268_v46  ;;  %vm6472_vm12 = vmand %vm7929_vm1, %vm7928_vm4  ;;  %v1656_v5 = vsel %vm7936_vm5, %v7825_v52, %v1634_v39  ;;  %vm7938_vm4 = vcmask 809984   ;;  %v2052_v12 = vpop.permute.xlu1 %2051  ;;  %v7981_v4 = vld [vmem:[#allocation11_spill] sm:$0xff]  ;;  %v7986_v46 = vld [vmem:[#allocation21_spill] sm:$0xff] }
 0x2cf   :  { %vm6480_vm6 = vmand %vm7933_vm8, %vm7932_vm11  ;;  %v2553_v41 = vsel %vm7938_vm4, %v7790_v49, %v2533_v2  ;;  %vm7940_vm11 = vcmp.ge.s32.totalorder %v5093_v29, 0  ;;  %v1682_v52 = vsel %vm6424_vm2, %v1656_v5, 0.0  ;;  %vm7946_vm2 = vcmp.le.s32.totalorder %v4761_v43, 26  ;;  %v7955_v43 = vld [vmem:[#allocation5_spill] sm:$0xff] }
 0x2d0   :  { %vm7937_vm14 = vmmov %vm7936_vm5  ;;  %v2578_v49 = vsel %vm6448_vm7, %v2553_v41, 0.0  ;;  %vm7943_vm5 = vcmp.ge.s32.totalorder %v5337_v44, 0  ;;  %1695 = vst [vmem:[#allocation3 + $0x88] sm:$0xf] %v1682_v52  ;;  %v6629_v0 = vpop.permute.xlu0 %2057 }
 0x2d1   :  { %v1657_v63 = vsel %vm7937_vm14, %v1634_v39, %v5670_v9  ;;  %vm7939_vm1 = vmmov %vm7938_vm4  ;;  %2591 = vst [vmem:[#allocation3 + $0x1c0] sm:$0xf] %v2578_v49  ;;  %vm7950_vm4 = vcmp.le.s32.totalorder %v4774_v55, 26  ;;  %v2068_v55 = vsel %vm7962_vm3, %v7961_v11, %v2052_v12  ;;  %v2629_v11 = vld [vmem:[#allocation3 + $0xe0] sm:$0xff] }
 0x2d2   :  { %v2554_v18 = vsel %vm7939_vm1, %v2533_v2, %v5856_v37  ;;  %vm6497_vm8 = vmand %vm7940_vm11, %vm7611_vm15  ;;  %v1683_v9 = vsel %vm6432_vm9, %v1657_v63, 0.0  ;;  %vm7947_vm9 = vcmp.lt.s32.totalorder %v4778_v56, 756  ;;  %vm7951_vm1 = vcmp.lt.s32.totalorder %v4785_v7, 756  ;;  %v7956_v56 = vld [vmem:[#allocation7_spill] sm:$0xff]  ;;  %v7963_v7 = vld [vmem:[#allocation20_spill] sm:$0xff]  ;;  %v2365_v58 = vpop.permute.xlu1 %2364 }
 0x2d3   :  { %v2579_v22 = vsel %vm6464_vm10, %v2554_v18, 0.0  ;;  %vm6513_vm14 = vmand %vm7943_vm5, %vm7610_vm13  ;;  %1696 = vst [vmem:[#allocation3 + $0x90] sm:$0xf] %v1683_v9  ;;  %vm7613_vm10 = vcmp.lt.s32.totalorder %v5337_v44, 756  ;;  %vm7615_vm13 = vcmp.ge.s32.totalorder %v7955_v43, 28  ;;  %v2093_v13 = vsel %vm6497_vm8, %v2068_v55, 0.0 }
 0x2d4   :  { %2592 = vst [vmem:[#allocation3 + $0x1c8] sm:$0xf] %v2579_v22  ;;  %vm6521_vm7 = vmand %vm7947_vm9, %vm7946_vm2  ;;  %vm1175_vm2 = vcmp.ge.s32.totalorder %v7956_v56, 28  ;;  %vm7958_vm9 = vcmask 826368   ;;  %v2119_v34 = vrot.slane %v2093_v13, 4  ;;  %v8001_v22 = vld [vmem:[#allocation16_spill] sm:$0xff] }
 0x2d5   :  { %vm6530_vm11 = vmand %vm7951_vm1, %vm7950_vm4  ;;  %v2238_v23 = vsel %vm7958_vm9, %v7957_v8, %v2216_v50  ;;  %vm7965_vm1 = vcmp.ge.s32.totalorder %v5083_v19, 0  ;;  %v2632_v9 = vld [vmem:[#allocation3 + $0xf8] sm:$0xff] }
 0x2d6   :  { %vm7960_vm15 = vmmov %vm7958_vm9  ;;  %v2263_v53 = vsel %vm6472_vm12, %v2238_v23, 0.0  ;;  %vm7971_vm12 = vcmp.le.s32.totalorder %v7954_v16, 26  ;;  %vm7977_vm9 = vcmp.ge.s32.totalorder %v7976_v6, 0  ;;  %2145 = vst [vmem:[#allocation3 + $0x110] sm:$0xf0] %v2119_v34  ;;  %v1466_v52 = vpop.permute.xlu1 %1465 }
 0x2d7   :  { %v2239_v61 = vsel %vm7960_vm15, %v2216_v50, %v7959_v36  ;;  %vm7964_vm4 = vmmov %vm7962_vm3  ;;  %vm7968_vm3 = vcmp.ge.s32.totalorder %v5331_v32, 0  ;;  %2276 = vst [vmem:[#allocation3 + $0x148] sm:$0xf] %v2263_v53 }
 0x2d8   :  { %v2069_v51 = vsel %vm7964_vm4, %v2052_v12, %v7963_v7  ;;  %vm6549_vm5 = vmand %vm7614_vm0, %vm7965_vm1  ;;  %v2264_v38 = vsel %vm6480_vm6, %v2239_v61, 0.0  ;;  %vm7973_vm6 = vcmp.ge.s32.totalorder %v7972_v15, 0  ;;  %vm1213_vm1 = vcmp.ge.s32.totalorder %v7976_v6, 1  ;;  %v2630_v12 = vld [vmem:[#allocation3 + $0xe8] sm:$0xff] }
 0x2d9   :  { %v2094_v62 = vsel %vm6513_vm14, %v2069_v51, 0.0  ;;  %vm6565_vm15 = vmand %vm7613_vm10, %vm7968_vm3  ;;  %2277 = vst [vmem:[#allocation3 + $0x150] sm:$0xf] %v2264_v38  ;;  %vm1202_vm14 = vcmp.lt.s32.totalorder %v7972_v15, 756  ;;  %vm7985_vm0 = vcmask 818176  }
 0x2da   :  { %v2120_v45 = vrot.slane %v2094_v62, 4  ;;  %vm6573_vm8 = vmand %vm7973_vm6, %vm7971_vm12  ;;  %vm1215_vm12 = vcmp.ge.s32.totalorder %v7954_v16, 1  ;;  %vm7982_vm6 = vcmask 809984   ;;  %v2381_v3 = vsel %vm7985_vm0, %v5751_v48, %v2365_v58  ;;  %v6667_v62 = vpop.permute.xlu0 %2370  ;;  %v1787_v42 = vpop.permute.xlu1 %1786  ;;  %v2619_v34 = vld [vmem:[#allocation3 + $0x90] sm:$0xff] }
 0x2db   :  { %vm6582_vm4 = vmand %vm7615_vm13, %vm7977_vm9  ;;  %v2549_v54 = vsel %vm7982_vm6, %v7981_v4, %v2525_v10  ;;  %vm7988_vm13 = vcmp.ge.s32.totalorder %v7980_v35, 0  ;;  %v2406_v48 = vsel %vm6549_vm5, %v2381_v3, 0.0  ;;  %vm7998_vm5 = vcmp.ge.s32.totalorder %v7956_v56, 0  ;;  %v8014_v4 = vld [vmem:[#allocation23_spill] sm:$0xff] }
 0x2dc   :  { %2146 = vst [vmem:[#allocation3 + $0x118] sm:$0xf0] %v2120_v45  ;;  %vm7984_vm10 = vmmov %vm7982_vm6  ;;  %v2574_v39 = vsel %vm6521_vm7, %v2549_v54, 0.0  ;;  %v2432_v63 = vrot.slane %v2406_v48, 4  ;;  %vm7994_vm7 = vcmp.ge.s32.totalorder %v7955_v43, 0  ;;  %v2097_v49 = vsel %vm6573_vm8, %v6629_v0, 0.0 }
 0x2dd   :  { %v2550_v14 = vsel %vm7984_vm10, %v2525_v10, %v7983_v1  ;;  %vm7987_vm9 = vmmov %vm7985_vm0  ;;  %vm7991_vm0 = vcmp.ge.s32.totalorder %v7954_v16, 0  ;;  %2587 = vst [vmem:[#allocation3 + $0x1a0] sm:$0xf] %v2574_v39  ;;  %vm8002_vm6 = vcmask 228352   ;;  %v2123_v8 = vrot.slane %v2097_v49, 4  ;;  %v2621_v3 = vld [vmem:[#allocation3 + $0xa0] sm:$0xff] }
 0x2de   :  { %v2382_v25 = vsel %vm7987_vm9, %v2365_v58, %v7986_v46  ;;  %vm6601_vm3 = vmand %vm1175_vm2, %vm7988_vm13  ;;  %v2575_v2 = vsel %vm6530_vm11, %v2550_v14, 0.0  ;;  %vm7997_vm11 = vcmp.ge.s32.totalorder %v7980_v35, 1  ;;  %2458 = vst [vmem:[#allocation3 + $0x178] sm:$0xf0] %v2432_v63  ;;  %v1482_v17 = vsel %vm8002_vm6, %v8001_v22, %v1466_v52  ;;  %v2642_v55 = vld [vmem:[#allocation3 + $0x148] sm:$0xff]  ;;  %v8012_v58 = vld [vmem:[#allocation18_spill] sm:$0xff]  ;;  %v6696_v49 = vpop.permute.xlu0 %2233  ;;  %v2228_v22 = vpop.permute.xlu1 %2227 }
 0x2df   :  { %v2407_v28 = vsel %vm6565_vm15, %v2382_v25, 0.0  ;;  %vm6617_vm13 = vmand %vm1202_vm14, %vm7991_vm0  ;;  %2588 = vst [vmem:[#allocation3 + $0x1a8] sm:$0xf] %v2575_v2  ;;  %v1508_v23 = vsel %vm6582_vm4, %v1482_v17, 0.0  ;;  %v4296_v38 = vpack.c.bf16 %v2642_v55, %v2629_v11  ;;  %vm8007_vm8 = vcmp.ge.s32.totalorder %v5083_v19, 1  ;;  %v2618_v14 = vld [vmem:[#allocation3 + $0x88] sm:$0xff] }
 0x2e0   :  { %v2433_v41 = vrot.slane %v2407_v28, 4  ;;  %vm6625_vm10 = vmand %vm7994_vm7, %vm1213_vm1  ;;  %v2643_v61 = vld [vmem:[#allocation3 + $0x150] sm:$0xff]  ;;  %v1534_v51 = vrot.slane %v1508_v23, 4  ;;  %vm8008_vm7 = vcmp.lt.s32.totalorder %v5093_v29, 756  ;;  %v6672_v45 = vld [vmem:[%s7509_s2] sm:$0xf] }
 0x2e1   :  { %vm6635_vm15 = vmand %vm7998_vm5, %vm7997_vm11  ;;  %v4294_v53 = vpack.c.bf16 %v2643_v61, %v2630_v12  ;;  %vm8011_vm5 = vcmask 261124   ;;  %v2410_v10 = vsel %vm6617_vm13, %v6667_v62, 0.0  ;;  %vm8013_vm4 = vcmask 7168   ;;  %v2656_v1 = vld [vmem:[#allocation3 + $0x1b8] sm:$0xf]  ;;  %v2606_v28 = vld [vmem:[#allocation3 + $0x28] sm:$0xff] }
 0x2e2   :  { %2459 = vst [vmem:[#allocation3 + $0x180] sm:$0xf0] %v2433_v41  ;;  %vm8004_vm9 = vmmov %vm8002_vm6  ;;  %v1803_v24 = vsel %vm8013_vm4, %v8012_v58, %v1787_v42  ;;  %vm7616_vm6 = vcmask 293888   ;;  %v2436_v25 = vrot.slane %v2410_v10, 4  ;;  %vm8016_vm13 = vcmp.ge.s32.totalorder %v5331_v32, 1  ;;  %v2608_v12 = vld [vmem:[#allocation3 + $0x38] sm:$0xff]  ;;  %v6731_v58 = vpop.permute.xlu0 %2542 }
 0x2e3   :  { %v1483_v50 = vsel %vm8004_vm9, %v1466_v52, %v8003_v20  ;;  %vm6650_vm0 = vmand %vm1202_vm14, %vm1215_vm12  ;;  %2149 = vst.msk [vmem:[#allocation3 + $0x130] sm:$0xf0] %vm8011_vm5, %v2123_v8  ;;  %4295 = vmatprep.subr.bf16.mxu0 %v4294_v53  ;;  %v1829_v21 = vsel %vm6625_vm10, %v1803_v24, 0.0  ;;  %vm8017_vm9 = vcmp.lt.s32.totalorder %v5337_v44, 756  ;;  %v4298_v18 = vpack.c.bf16 %v2619_v34, %v2606_v28  ;;  %v2605_v52 = vld [vmem:[#allocation3 + $0x20] sm:$0xff]  ;;  %v2620_v8 = vld [vmem:[#allocation3 + $0x98] sm:$0xff]  ;;  %v1325_v24 = vpop.permute.xlu1 %1324 }
 0x2e4   :  { %v1509_v36 = vsel %vm6601_vm3, %v1483_v50, 0.0  ;;  %vm6662_vm11 = vmand %vm8008_vm7, %vm8007_vm8  ;;  %1560 = vst [vmem:[#allocation3 + $0x50] sm:$0xf0] %v1534_v51  ;;  %4297 = vmatpush1.bf16.msra.mxu0 %v4296_v38  ;;  %v1855_v5 = vrot.slane %v1829_v21, 4  ;;  %vm8020_vm7 = vcmask 1043456   ;;  %vm8022_vm10 = vcmask 261124  }
 0x2e5   :  { %v1535_v60 = vrot.slane %v1509_v36, 4  ;;  %vm8015_vm3 = vmmov %vm8013_vm4  ;;  %v2653_v41 = vld [vmem:[#allocation3 + $0x1a0] sm:$0xf]  ;;  %2462 = vst.msk [vmem:[#allocation3 + $0x198] sm:$0xf0] %vm8022_vm10, %v2436_v25  ;;  %v4300_v17 = vpack.c.bf16 %v2618_v14, %v2605_v52  ;;  %v4302_v50 = vpack.c.bf16 %v2645_v26, %v2632_v9  ;;  %v2273_v23 = vsel %vm6650_vm0, %v6696_v49, 0.0 }
 0x2e6   :  { %v1804_v54 = vsel %vm8015_vm3, %v1787_v42, %v8014_v4  ;;  %v2654_v2 = vld [vmem:[#allocation3 + $0x1a8] sm:$0xf]  ;;  %vm6689_vm8 = vmand %vm8017_vm9, %vm8016_vm13  ;;  %1881 = vst [vmem:[#allocation3 + $0xb8] sm:$0xf0] %v1855_v5  ;;  %vm8024_vm4 = vcmask 826368   ;;  %v4306_v51 = vpack.c.bf16 %v2621_v3, %v2608_v12  ;;  %v2644_v53 = vld [vmem:[#allocation3 + $0x158] sm:$0xff] }
 0x2e7   :  { %1561 = vst [vmem:[#allocation3 + $0x58] sm:$0xf0] %v1535_v60  ;;  %v1830_v39 = vsel %vm6635_vm15, %v1804_v54, 0.0  ;;  %4171 = vmatprep.subr.msk.mxu1 %vm8020_vm7, %v2654_v2  ;;  %vm8021_vm5 = vmmov %vm8020_vm7  ;;  %v2244_v36 = vsel %vm8024_vm4, %v5833_v47, %v2228_v22  ;;  %v8025_v61 = vld [vmem:[#allocation24_spill] sm:$0xff]  ;;  %v2655_v55 = vld [vmem:[#allocation3 + $0x1b0] sm:$0xf] }
 0x2e8   :  { %v1856_v63 = vrot.slane %v1830_v39, 4  ;;  %4174 = vmatprep.subr.msk.mxu0 %vm8021_vm5, %v2656_v1  ;;  %vm8023_vm15 = vmmov %vm8021_vm5  ;;  %v2647_v60 = vld [vmem:[#allocation3 + $0x170] sm:$0xff]  ;;  %vm8027_vm13 = vcmask 257024   ;;  %v2269_v40 = vsel %vm6662_vm11, %v2244_v36, 0.0  ;;  %vm8029_vm9 = vcmp.ge.s32.totalorder %v7955_v43, 28  ;;  %v2634_v26 = vld [vmem:[#allocation3 + $0x108] sm:$0xff] }
 0x2e9   :  { %4172 = vmatpush1.msk.msra.mxu1 %vm8023_vm15, %v2653_v41  ;;  %vm8026_vm3 = vmmov %vm8024_vm4  ;;  %2286 = vst.msk [vmem:[#allocation3 + $0x198] sm:$0xf] %vm8027_vm13, %v2273_v23  ;;  %v2607_v47 = vld [vmem:[#allocation3 + $0x30] sm:$0xff]  ;;  %vm8032_vm11 = vcmp.ge.s32.totalorder %v7980_v35, 1  ;;  %v4310_v54 = vpack.c.bf16 %v2647_v60, %v2634_v26  ;;  %vm8035_vm10 = vcmp.ge.s32.totalorder %v7972_v15, 0  ;;  %v2646_v3 = vld [vmem:[#allocation3 + $0x168] sm:$0xff] }
 0x2ea   :  { %1882 = vst [vmem:[#allocation3 + $0xc0] sm:$0xf0] %v1856_v63  ;;  %v2245_v11 = vsel %vm8026_vm3, %v2228_v22, %v8025_v61  ;;  %4299 = vmatprep.subr.bf16.mxu1 %v4298_v18  ;;  %4173 = vmatmul.mubr.msk.f32.vlgmr.msra.gmra.mrb[6].mxu1 %vm7616_vm6, %v6672_v45  ;;  %vm8028_vm0 = vmmov %vm8021_vm5  ;;  %vm1239_vm5 = vcmp.le.s32.totalorder %v7976_v6, 26  ;;  %v4308_v13 = vpack.c.bf16 %v2620_v8, %v2607_v47  ;;  %v2631_v10 = vld [vmem:[#allocation3 + $0xf0] sm:$0xff]  ;;  %vm1240_vm4 = vcmp.le.s32.totalorder %v7980_v35, 26  ;;  %v2633_v63 = vld [vmem:[#allocation3 + $0x100] sm:$0xff]  ;;  %v1791_v22 = vpop.permute.xlu0 %1790 }
 0x2eb   :  { %v2270_v38 = vsel %vm6689_vm8, %v2245_v11, 0.0  ;;  %4175 = vmatpush1.msk.msra.mxu0 %vm8028_vm0, %v2655_v55  ;;  %4301 = vmatpush1.bf16.msra.mxu1 %v4300_v17  ;;  %vm6718_vm7 = vmand %vm8029_vm9, %vm1213_vm1  ;;  %2282 = vst [vmem:[#allocation3 + $0x178] sm:$0xf] %v2269_v40  ;;  %v4304_v1 = vpack.c.bf16 %v2644_v53, %v2631_v10  ;;  %v8038_v25 = vmov 0.0   ;;  %vm8039_vm3 = vcmask 236544   ;;  %v8040_v39 = vld [vmem:[#allocation25_spill] sm:$0xff]  ;;  %v1646_v17 = vpop.permute.xlu1 %1645 }
 0x2ec   :  { %2283 = vst [vmem:[#allocation3 + $0x180] sm:$0xf] %v2270_v38  ;;  %4303 = vmatprep.subr.bf16.mxu1 %v4302_v50  ;;  %4307 = vmatprep.subr.bf16.mxu0 %v4306_v51  ;;  %vm6727_vm8 = vmand %vm1175_vm2, %vm8032_vm11  ;;  %v1341_v21 = vsel %vm8039_vm3, %v5782_v57, %v1325_v24  ;;  %vm1176_vm11 = vcmp.ge.s32.totalorder %v7972_v15, 28  ;;  %v2658_v5 = vld [vmem:[#allocation3 + $0x1c8] sm:$0xf]  ;;  %v2623_v41 = vld [vmem:[#allocation3 + $0xb0] sm:$0xff]  ;;  %v4312_v18 = vpack.c.bf16 %v2646_v3, %v2633_v63 }
 0x2ed   :  { %4176 = vmatmul.mubr.msk.f32.vlgmr.msra.gmra.mrb[8].mxu0 %vm7616_vm6, %v6672_v45  ;;  %vm6739_vm15 = vmand %vm8035_vm10, %vm1215_vm12  ;;  %2915 = vmatprep.mubr.f32.mxu1 %v8038_v25  ;;  %v1367_v28 = vsel %vm6718_vm7, %v1341_v21, 0.0  ;;  %vm8045_vm10 = vcmask 1043456   ;;  %v2622_v9 = vld [vmem:[#allocation3 + $0xa8] sm:$0xff]  ;;  %vm8048_vm7 = vcmask 7168   ;;  %v8050_v23 = vld [vmem:[#allocation26_spill] sm:$0xff] }
 0x2ee   :  { %4309 = vmatpush1.bf16.msra.mxu0 %v4308_v13  ;;  %vm8041_vm13 = vmmov %vm8039_vm3  ;;  %2986 = vmatprep.mubr.f32.mxu0 %v8038_v25  ;;  %1380 = vst [vmem:[#allocation3 + $0x50] sm:$0xf] %v1367_v28  ;;  %v2610_v50 = vld [vmem:[#allocation3 + $0x48] sm:$0xff]  ;;  %v1805_v12 = vsel %vm8048_vm7, %v8014_v4, %v1791_v22  ;;  %v2657_v11 = vld [vmem:[#allocation3 + $0x1c0] sm:$0xf]  ;;  %vm8055_vm7 = vcmp.le.s32.totalorder %v5042_v30, 26  ;;  %v1650_v26 = vpop.permute.xlu0 %1649 }
 0x2ef   :  { %v1342_v2 = vsel %vm8041_vm13, %v1325_v24, %v8040_v39  ;;  %vm8042_vm0 = vmmov %vm8029_vm9  ;;  %4311 = vmatprep.subr.bf16.mxu0 %v4310_v54  ;;  %4305 = vmatpush1.bf16.msra.mxu1 %v4304_v1  ;;  %v4314_v55 = vpack.c.bf16 %v2623_v41, %v2610_v50  ;;  %v2609_v60 = vld [vmem:[#allocation3 + $0x40] sm:$0xff]  ;;  %v1831_v4 = vsel %vm6739_vm15, %v1805_v12, 0.0  ;;  %v2636_v47 = vld [vmem:[#allocation3 + $0x118] sm:$0xff]  ;;  %vm8059_vm15 = vcmp.le.s32.totalorder %v5047_v33, 26  ;;  %v2537_v10 = vpop.permute.xlu1 %2536 }
 0x2f0   :  { %vm6753_vm9 = vmand %vm8042_vm0, %vm1239_vm5  ;;  %v1368_v57 = vsel %vm6727_vm8, %v1342_v2, 0.0  ;;  %4177 = vmatprep.subr.msk.mxu1 %vm8045_vm10, %v2658_v5  ;;  %vm8049_vm8 = vcmask 220160   ;;  %v4316_v40 = vpack.c.bf16 %v2622_v9, %v2609_v60  ;;  %v1857_v13 = vrot.slane %v1831_v4, 4  ;;  %v2635_v14 = vld [vmem:[#allocation3 + $0x110] sm:$0xff] }
 0x2f1   :  { %1381 = vst [vmem:[#allocation3 + $0x58] sm:$0xf] %v1368_v57  ;;  %vm6768_vm3 = vmand %vm1175_vm2, %vm1240_vm4  ;;  %v1662_v8 = vsel %vm8049_vm8, %v5809_v59, %v1646_v17  ;;  %vm8052_vm2 = vcmp.le.s32.totalorder %v7954_v16, 26 }
 0x2f2   :  { %4313 = vmatpush1.bf16.msra.mxu0 %v4312_v18  ;;  %vm8051_vm13 = vmmov %vm8049_vm8  ;;  %v1688_v59 = vsel %vm6753_vm9, %v1662_v8, 0.0  ;;  %vm8056_vm8 = vcmp.lt.s32.totalorder %v5065_v27, 756  ;;  %vm8060_vm9 = vcmp.lt.s32.totalorder %v5070_v31, 756  ;;  %v2648_v34 = vld [vmem:[#allocation3 + $0x178] sm:$0xff]  ;;  %v8066_v31 = vld [vmem:[#allocation27_spill] sm:$0xff]  ;;  %v6847_v28 = vpop.permute.xlu0 %2546 }
 0x2f3   :  { %v1663_v36 = vsel %vm8051_vm13, %v1646_v17, %v8050_v23  ;;  %vm6782_vm0 = vmand %vm1176_vm11, %vm8052_vm2  ;;  %4178 = vmatpush1.msk.msra.mxu1 %vm8045_vm10, %v2657_v11  ;;  %v2649_v42 = vld [vmem:[#allocation3 + $0x180] sm:$0xff]  ;;  %1701 = vst [vmem:[#allocation3 + $0xb8] sm:$0xf] %v1688_v59  ;;  %vm8063_vm2 = vcmask 261124   ;;  %vm8064_vm10 = vcmask 220160   ;;  %v4320_v2 = vpack.c.bf16 %v2648_v34, %v2635_v14  ;;  %v2056_v57 = vpop.permute.xlu1 %2055 }
 0x2f4   :  { %v1689_v53 = vsel %vm6768_vm3, %v1663_v36, 0.0  ;;  %vm6797_vm13 = vmand %vm8056_vm8, %vm8055_vm7  ;;  %4315 = vmatprep.subr.bf16.mxu1 %v4314_v55  ;;  %4179 = vmatmul.mubr.msk.f32.vlgmr.msra.gmra.mrb[8].mxu1 %vm7616_vm6, %v6672_v45  ;;  %v4318_v27 = vpack.c.bf16 %v2649_v42, %v2636_v47  ;;  %1883 = vst.msk [vmem:[#allocation3 + $0xc8] sm:$0xf0] %vm8063_vm2, %v1857_v13  ;;  %v1664_v24 = vsel %vm8064_vm10, %v8050_v23, %v1650_v26  ;;  %vm8065_vm7 = vcmask 809984  }
 0x2f5   :  { %1702 = vst [vmem:[#allocation3 + $0xc0] sm:$0xf] %v1689_v53  ;;  %vm6807_vm3 = vmand %vm8060_vm9, %vm8059_vm15  ;;  %4317 = vmatpush1.bf16.msra.mxu1 %v4316_v40  ;;  %3057 = vmatprep.mubr.f32.mxu1 %v8038_v25  ;;  %v2555_v33 = vsel %vm8065_vm7, %v5856_v37, %v2537_v10  ;;  %vm8068_vm15 = vcmp.le.s32.totalorder %v7954_v16, 26  ;;  %v1690_v3 = vsel %vm6782_vm0, %v1664_v24, 0.0  ;;  %vm8071_vm2 = vcmp.ge.s32.totalorder %v7955_v43, 0  ;;  %v2611_v59 = vld [vmem:[#allocation3 + $0x50] sm:$0xff] }
 0x2f6   :  { %vm8067_vm8 = vmmov %vm8065_vm7  ;;  %4319 = vmatprep.subr.bf16.mxu1 %v4318_v27  ;;  %v2580_v21 = vsel %vm6797_vm13, %v2555_v33, 0.0  ;;  %vm8075_vm0 = vcmp.ge.s32.totalorder %v7956_v56, 0  ;;  %vm1201_vm7 = vcmp.lt.s32.totalorder %v7956_v56, 756  ;;  %v8108_v56 = vmov 0.0|0.0  }
 0x2f7   :  { %v2556_v54 = vsel %vm8067_vm8, %v2537_v10, %v8066_v31  ;;  %vm6823_vm9 = vmand %vm1202_vm14, %vm8068_vm15  ;;  %vm8074_vm14 = vcmask 257024   ;;  %2593 = vst [vmem:[#allocation3 + $0x1d0] sm:$0xf] %v2580_v21  ;;  %vm8076_vm8 = vcmask 1039360  }
 0x2f8   :  { %v2581_v37 = vsel %vm6807_vm3, %v2556_v54, 0.0  ;;  %vm6837_vm10 = vmand %vm8071_vm2, %vm1239_vm5  ;;  %1703 = vst.msk [vmem:[#allocation3 + $0xc8] sm:$0xf] %vm8074_vm14, %v1690_v3  ;;  %vm1200_vm3 = vcmp.lt.s32.totalorder %v7955_v43, 756  ;;  %v2586_v5 = vsel %vm6823_vm9, %v6847_v28, 0.0  ;;  %v2070_v63 = vsel %vm8076_vm8, %v7963_v7, %v2056_v57  ;;  %v2369_v7 = vpop.permute.xlu1 %2368  ;;  %v2612_v8 = vld [vmem:[#allocation3 + $0x58] sm:$0xff] }
 0x2f9   :  { %2594 = vst [vmem:[#allocation3 + $0x1d8] sm:$0xf] %v2581_v37  ;;  %vm1992_vm13 = vmand %vm8075_vm0, %vm1240_vm4  ;;  %4321 = vmatpush1.bf16.msra.mxu1 %v4320_v2  ;;  %v2095_v18 = vsel %vm6837_vm10, %v2070_v63, 0.0  ;;  %vm8082_vm9 = vcmp.ge.s32.totalorder %v7980_v35, 0  ;;  %vm8083_vm10 = vcmask 818176   ;;  %v2652_v2 = vld [vmem:[#allocation3 + $0x198] sm:$0xff] }
 0x2fa   :  { %vm8077_vm15 = vmmov %vm8076_vm8  ;;  %v2121_v22 = vrot.slane %v2095_v18, 4  ;;  %v2383_v50 = vsel %vm8083_vm10, %v7986_v46, %v2369_v7  ;;  %v2624_v23 = vld [vmem:[#allocation3 + $0xb8] sm:$0xff] }
 0x2fb   :  { %v2071_v41 = vsel %vm8077_vm15, %v2056_v57, %v6629_v0  ;;  %vm8078_vm2 = vmmov %vm8074_vm14  ;;  %vm8079_vm14 = vcmp.ge.s32.totalorder %v7976_v6, 0  ;;  %vm8085_vm15 = vcmask 1043456   ;;  %v4324_v53 = vpack.c.bf16 %v2624_v23, %v2611_v59  ;;  %v2639_v57 = vld [vmem:[#allocation3 + $0x130] sm:$0xff] }
 0x2fc   :  { %2599 = vst.msk [vmem:[#allocation3 + $0x200] sm:$0xf] %vm8078_vm2, %v2586_v5  ;;  %v2096_v52 = vsel %vm1992_vm13, %v2071_v41, 0.0  ;;  %vm6864_vm0 = vmand %vm1200_vm3, %vm8079_vm14  ;;  %v2625_v0 = vld [vmem:[#allocation3 + $0xc0] sm:$0xff]  ;;  %vm8086_vm2 = vcmp.ge.s32.totalorder %v7954_v16, 0  ;;  %v4334_v5 = vpack.c.bf16 %v2652_v2, %v2639_v57 }
 0x2fd   :  { %v2122_v17 = vrot.slane %v2096_v52, 4  ;;  %vm2305_vm8 = vmand %vm1201_vm7, %vm8082_vm9  ;;  %2147 = vst [vmem:[#allocation3 + $0x120] sm:$0xf0] %v2121_v22  ;;  %v2408_v36 = vsel %vm6864_vm0, %v2383_v50, 0.0  ;;  %v4322_v46 = vpack.c.bf16 %v2625_v0, %v2612_v8  ;;  %vm8088_vm0 = vcmask 228352  }
 0x2fe   :  { %vm8084_vm13 = vmmov %vm8083_vm10  ;;  %v2659_v51 = vld [vmem:[#allocation3 + $0x1d0] sm:$0xf]  ;;  %v2434_v60 = vrot.slane %v2408_v36, 4  ;;  %vm8089_vm10 = vcmp.ge.s32.totalorder %v7980_v35, 1 }
 0x2ff   :  { %2148 = vst [vmem:[#allocation3 + $0x128] sm:$0xf0] %v2122_v17  ;;  %v2384_v12 = vsel %vm8084_vm13, %v2369_v7, %v6667_v62  ;;  %vm1402_vm14 = vmand %vm1176_vm11, %vm8086_vm2  ;;  %v1470_v62 = vpop.permute.xlu1 %1469  ;;  %vm8091_vm2 = vcmask 826368   ;;  %v2626_v21 = vld [vmem:[#allocation3 + $0xc8] sm:$0xff] }
 0x300   :  { %v2409_v11 = vsel %vm2305_vm8, %v2384_v12, 0.0  ;;  %v2660_v55 = vld [vmem:[#allocation3 + $0x1d8] sm:$0xf]  ;;  %vm8087_vm9 = vmmov %vm8085_vm15  ;;  %2460 = vst [vmem:[#allocation3 + $0x188] sm:$0xf0] %v2434_v60  ;;  %v1484_v40 = vsel %vm8088_vm0, %v8003_v20, %v1470_v62 }
 0x301   :  { %v2435_v4 = vrot.slane %v2409_v11, 4  ;;  %4180 = vmatprep.subr.msk.mxu0 %vm8085_vm15, %v2660_v55  ;;  %v1510_v38 = vsel %vm1402_vm14, %v1484_v40, 0.0  ;;  %vm2167_vm8 = vmand %vm1200_vm3, %vm1213_vm1  ;;  %vm8090_vm15 = vcmask 261124   ;;  %vm8093_vm1 = vcmp.le.s32.totalorder %v5083_v19, 26 }
 0x302   :  { %4181 = vmatpush1.msk.msra.mxu0 %vm8087_vm9, %v2659_v51  ;;  %v1536_v47 = vrot.slane %v1510_v38, 4  ;;  %vm2168_vm13 = vmand %vm1201_vm7, %vm8089_vm10  ;;  %vm8094_vm9 = vcmp.lt.s32.totalorder %v5093_v29, 756  ;;  %vm8095_vm10 = vcmp.le.s32.totalorder %v5331_v32, 26 }
 0x303   :  { %2461 = vst [vmem:[#allocation3 + $0x190] sm:$0xf0] %v2435_v4  ;;  %4323 = vmatprep.subr.bf16.mxu0 %v4322_v46  ;;  %4182 = vmatmul.mubr.msk.f32.vlgmr.msra.gmra.mrb[10].mxu0 %vm7616_vm6, %v6672_v45  ;;  %v2232_v20 = vpop.permute.xlu1 %2231  ;;  %vm8092_vm14 = vmmov %vm8091_vm2  ;;  %vm8096_vm6 = vcmp.lt.s32.totalorder %v5337_v44, 756  ;;  %v2665_v63 = vld [vmem:[#allocation3 + $0x200] sm:$0xf] }
 0x304   :  { %4325 = vmatpush1.bf16.msra.mxu0 %v4324_v53  ;;  %3128 = vmatprep.mubr.f32.mxu0 %v8038_v25  ;;  %1562 = vst.msk [vmem:[#allocation3 + $0x60] sm:$0xf0] %vm8090_vm15, %v1536_v47  ;;  %v2246_v42 = vsel %vm8091_vm2, %v8025_v61, %v2232_v20  ;;  %v2247_v13 = vsel %vm8092_vm14, %v2232_v20, %v6696_v49  ;;  %vm2478_vm0 = vmand %vm8094_vm9, %vm8093_vm1  ;;  %vm8097_vm2 = vcmask 809984   ;;  %vm8102_vm1 = vcmask 257024  }
 0x305   :  { %v2271_v30 = vsel %vm2167_vm8, %v2246_v42, 0.0  ;;  %v2272_v27 = vsel %vm2168_vm13, %v2247_v13, 0.0  ;;  %vm2479_vm15 = vmand %vm8096_vm6, %vm8095_vm10  ;;  %vm8099_vm13 = vcmask 236544   ;;  %vm8109_vm9 = vmmov 0  }
 0x306   :  { %2284 = vst [vmem:[#allocation3 + $0x188] sm:$0xf] %v2271_v30  ;;  %2285 = vst [vmem:[#allocation3 + $0x190] sm:$0xf] %v2272_v27  ;;  %v2638_v44 = vld [vmem:[#allocation3 + $0x128] sm:$0xff] }
 0x307   :  { %v2541_v34 = vpop.permute.xlu1 %2540  ;;  %vm8098_vm14 = vmmov %vm8097_vm2 }
 0x308   :  { %v2557_v61 = vsel %vm8097_vm2, %v8066_v31, %v2541_v34  ;;  %v2558_v49 = vsel %vm8098_vm14, %v2541_v34, %v6731_v58  ;;  %vm1261_vm8 = vmand %vm1176_vm11, %vm1215_vm12  ;;  %v2637_v31 = vld [vmem:[#allocation3 + $0x120] sm:$0xff] }
 0x309   :  { %v2582_v26 = vsel %vm2478_vm0, %v2557_v61, 0.0  ;;  %v2583_v10 = vsel %vm2479_vm15, %v2558_v49, 0.0  ;;  %vm6924_vm6 = vmand %vm1200_vm3, %vm1239_vm5 }
 0x30a   :  { %2595 = vst [vmem:[#allocation3 + $0x1e0] sm:$0xf] %v2582_v26  ;;  %2596 = vst [vmem:[#allocation3 + $0x1e8] sm:$0xf] %v2583_v10 }
 0x30b   :  { %v1329_v19 = vpop.permute.xlu1 %1328  ;;  %vm2481_vm12 = vmand %vm1201_vm7, %vm1240_vm4  ;;  %vm8105_vm4 = vcmask 1043456   ;;  %vm8107_vm7 = vcmask 293888  }
 0x30c   :  { %v1343_v29 = vsel %vm8099_vm13, %v8040_v39, %v1329_v19  ;;  %vm8103_vm5 = vmmov %vm8097_vm2 }
 0x30d   :  { %v1369_v24 = vsel %vm1261_vm8, %v1343_v29, 0.0  ;;  %v2651_v33 = vld [vmem:[#allocation3 + $0x190] sm:$0xff]  ;;  %v2650_v16 = vld [vmem:[#allocation3 + $0x188] sm:$0xff]  ;;  %vm8104_vm11 = vmmov %vm8097_vm2 }
 0x30e   :  { %1382 = vst.msk [vmem:[#allocation3 + $0x60] sm:$0xf] %vm8102_vm1, %v1369_v24  ;;  %v4326_v15 = vpack.c.bf16 %v2651_v33, %v2638_v44  ;;  %v4328_v6 = vpack.c.bf16 %v2650_v16, %v2637_v31  ;;  %vm8106_vm3 = vmmov %vm8105_vm4 }
 0x30f   :  { %v2545_v39 = vpop.permute.xlu1 %2544  ;;  %vm8110_vm0 = vmmov %vm8106_vm3 }
 0x310   :  { %v2559_v43 = vsel %vm8103_vm5, %v6731_v58, %v2545_v39  ;;  %v2560_v54 = vsel %vm8104_vm11, %v2545_v39, %v6847_v28  ;;  %4327 = vmatprep.subr.bf16.mxu0 %v4326_v15  ;;  %vm8111_vm10 = vmmov %vm8110_vm0 }
 0x311   :  { %v2584_v1 = vsel %vm6924_vm6, %v2559_v43, 0.0  ;;  %v2585_v14 = vsel %vm2481_vm12, %v2560_v54, 0.0  ;;  %4329 = vmatpush1.bf16.msra.mxu0 %v4328_v6  ;;  %v2662_v3 = vld [vmem:[#allocation3 + $0x1e8] sm:$0xf]  ;;  %v2661_v35 = vld [vmem:[#allocation3 + $0x1e0] sm:$0xf]  ;;  %vm8112_vm15 = vmmov %vm8107_vm7 }
 0x312   :  { %2597 = vst [vmem:[#allocation3 + $0x1f0] sm:$0xf] %v2584_v1  ;;  %2598 = vst [vmem:[#allocation3 + $0x1f8] sm:$0xf] %v2585_v14  ;;  %4183 = vmatprep.subr.msk.mxu1 %vm8105_vm4, %v2662_v3 }
 0x313   :  { %4184 = vmatpush1.msk.msra.mxu1 %vm8106_vm3, %v2661_v35  ;;  %vm8113_vm2 = vmmov %vm8110_vm0 }
 0x314   :  { %4185 = vmatmul.mubr.msk.f32.vlgmr.msra.gmra.mrb[10].mxu1 %vm8107_vm7, %v6672_v45  ;;  %4330 = vmatprep.subr.bf16.mxu1 %v8108_v56  ;;  %vm8114_vm14 = vmmov %vm8107_vm7 }
 0x315   :  { %v2613_v58 = vld [vmem:[#allocation3 + $0x60] sm:$0xff]  ;;  %4247 = vmatprep.mubr.msk.f32.mxu1 %vm8109_vm9, %v8038_v25  ;;  %vm8115_vm8 = vmmov %vm8110_vm0 }
 0x316   :  { %v4331_v37 = vpack.c.bf16 %v2626_v21, %v2613_v58  ;;  %vm8116_vm13 = vmmov %vm8110_vm0 }
 0x317   :  { %vm8117_vm6 = vmmov %vm8110_vm0 }
 0x318   :  { %4332 = vmatpush3.bf16.msra.mxu1 %v4331_v37  ;;  %vm8118_vm1 = vmmov %vm8110_vm0 }
 0x319   :  { %v2664_v48 = vld [vmem:[#allocation3 + $0x1f8] sm:$0xf]  ;;  %v2663_v28 = vld [vmem:[#allocation3 + $0x1f0] sm:$0xf]  ;;  %4333 = vmatprep.subr.bf16.mxu1 %v8108_v56  ;;  %vm8119_vm12 = vmmov %vm8110_vm0 }
 0x31a   :  { %4186 = vmatprep.subr.msk.mxu0 %vm8110_vm0, %v2664_v48  ;;  %vm8120_vm5 = vmmov %vm8110_vm0 }
 0x31b   :  { %4187 = vmatpush1.msk.msra.mxu0 %vm8111_vm10, %v2663_v28  ;;  %vm8121_vm11 = vmmov %vm8110_vm0 }
 0x31c   :  { %4188 = vmatmul.mubr.msk.f32.vlgmr.msra.gmra.mrb[12].mxu0 %vm8112_vm15, %v6672_v45  ;;  %4335 = vmatpush3.bf16.msra.mxu1 %v4334_v5  ;;  %vm8122_vm4 = vmmov %vm8110_vm0 }
 0x31d   :  { %4245 = vmatprep.subr.mxu1 %v8038_v25  ;;  %3430 = vmatprep.mubr.f32.mxu0 %v8038_v25  ;;  %vm8123_vm3 = vmmov %vm8110_vm0 }
 0x31e   :  { %vm8124_vm7 = vmmov %vm8110_vm0 }
 0x31f   :  { %vm8125_vm9 = vmmov %vm8110_vm0 }
 0x320   :  { %4246 = vmatpush3.msk.msra.mxu1 %vm8113_vm2, %v2665_v63  ;;  %vm8126_vm10 = vmmov %vm8110_vm0 }
 0x321   :  { %4248 = vmatmul.mubr.msk.f32.vlgmr.msra.gmra.mrb[12].mxu1 %vm8114_vm14, %v6672_v45  ;;  %vm8127_vm15 = vmmov %vm8110_vm0 }
 0x322   :  { %3507 = vmatprep.mubr.f32.mxu1 %v8038_v25  ;;  %vm8128_vm2 = vmmov %vm8110_vm0 }
 0x323   :  { %vm8129_vm14 = vmmov %vm8110_vm0 }
 0x3bd   :  { %v6957_v41 = vpop.f32.mrb[6].mxu1 }
 0x3be   :  { %v3205_v18 = vsel %vm8115_vm8, %v6957_v41, 0.0  ;;  %v3232_v52 = vmul.f32 %v6957_v41, %v6957_v41  ;;  %v6963_v9 = vpop.f32.mrb[7].mxu1  ;;  %vm8130_vm8 = vmmov %vm8110_vm0 }
 0x3bf   :  { %v3206_v22 = vsel %vm8116_vm13, %v6963_v9, 0.0  ;;  %v3233_v17 = vmul.f32 %v6963_v9, %v6963_v9  ;;  %vm8131_vm13 = vmmov %vm8110_vm0 }
 0x3c0   :  { %v3245_v45 = vsel %vm8117_vm6, %v3232_v52, 0.0  ;;  %v3207_v7 = vadd.f32 %v3206_v22, %v3205_v18  ;;  %v6970_v0 = vpop.f32.mrb[8].mxu0  ;;  %vm8132_vm6 = vmmov %vm8110_vm0 }
 0x3c1   :  { %v3246_v50 = vsel %vm8118_vm1, %v3233_v17, 0.0  ;;  %v3208_v12 = vsel %vm8119_vm12, %v6970_v0, 0.0  ;;  %v3234_v8 = vmul.f32 %v6970_v0, %v6970_v0  ;;  %v6977_v23 = vpop.f32.mrb[9].mxu0  ;;  %vm8133_vm1 = vmmov %vm8110_vm0 }
 0x3c2   :  { %v3247_v36 = vadd.f32 %v3246_v50, %v3245_v45  ;;  %v3209_v11 = vadd.f32 %v3208_v12, %v3207_v7  ;;  %v3210_v55 = vsel %vm8120_vm5, %v6977_v23, 0.0  ;;  %v3235_v51 = vmul.f32 %v6977_v23, %v6977_v23  ;;  %vm8134_vm12 = vmmov %vm8110_vm0 }
 0x3c3   :  { %v3248_v60 = vsel %vm8121_vm11, %v3234_v8, 0.0  ;;  %vm8135_vm5 = vmmov %vm8110_vm0 }
 0x3c4   :  { %v3249_v4 = vadd.f32 %v3248_v60, %v3247_v36  ;;  %v3211_v46 = vadd.f32 %v3210_v55, %v3209_v11  ;;  %v3250_v59 = vsel %vm8122_vm4, %v3235_v51, 0.0  ;;  %vm8136_vm11 = vmmov %vm8110_vm0 }
 0x3c5   :  { %vm8137_vm4 = vmmov %vm8110_vm0 }
 0x3c6   :  { %v3251_v62 = vadd.f32 %v3250_v59, %v3249_v4 }
 0x3c7   :  { %v6985_v53 = vpop.f32.mrb[8].mxu1 }
 0x3c8   :  { %v3212_v40 = vsel %vm8123_vm3, %v6985_v53, 0.0  ;;  %v3236_v38 = vmul.f32 %v6985_v53, %v6985_v53  ;;  %v6991_v47 = vpop.f32.mrb[9].mxu1  ;;  %vm8138_vm3 = vcmask 257024  }
 0x3c9   :  { %v3213_v20 = vadd.f32 %v3212_v40, %v3211_v46  ;;  %v3214_v42 = vsel %vm8124_vm7, %v6991_v47, 0.0  ;;  %v3237_v13 = vmul.f32 %v6991_v47, %v6991_v47  ;;  %vm8139_vm7 = vmmov %vm8138_vm3 }
 0x3ca   :  { %v3252_v30 = vsel %vm8125_vm9, %v3236_v38, 0.0  ;;  %vm3320_vm9 = vcmask 31744  }
 0x3cb   :  { %v3253_v27 = vadd.f32 %v3252_v30, %v3251_v62  ;;  %v3215_v34 = vadd.f32 %v3214_v42, %v3213_v20  ;;  %v3254_v61 = vsel %vm8110_vm0, %v3237_v13, 0.0 }
 0x3cd   :  { %v3255_v49 = vadd.f32 %v3254_v61, %v3253_v27 }
 0x3d6   :  { %v6999_v26 = vpop.f32.mrb[10].mxu0 }
 0x3d7   :  { %v3216_v10 = vsel %vm8126_vm10, %v6999_v26, 0.0  ;;  %v3238_v19 = vmul.f32 %v6999_v26, %v6999_v26  ;;  %v7005_v29 = vpop.f32.mrb[11].mxu0  ;;  %vm8140_vm10 = vmmov %vm8110_vm0 }
 0x3d8   :  { %v3217_v32 = vadd.f32 %v3216_v10, %v3215_v34  ;;  %v3218_v44 = vsel %vm8127_vm15, %v7005_v29, 0.0  ;;  %v3239_v24 = vmul.f32 %v7005_v29, %v7005_v29  ;;  %vm8141_vm15 = vmmov %vm8110_vm0 }
 0x3d9   :  { %v3256_v33 = vsel %vm8128_vm2, %v3238_v19, 0.0  ;;  %vm8142_vm2 = vmmov %vm8110_vm0 }
 0x3da   :  { %v3257_v31 = vadd.f32 %v3256_v33, %v3255_v49  ;;  %v3219_v16 = vadd.f32 %v3218_v44, %v3217_v32  ;;  %v3258_v15 = vsel %vm8129_vm14, %v3239_v24, 0.0  ;;  %vm8143_vm14 = vmmov %vm8110_vm0 }
 0x3dc   :  { %v3259_v6 = vadd.f32 %v3258_v15, %v3257_v31 }
 0x3e7   :  { %v7013_v39 = vpop.f32.mrb[10].mxu1 }
 0x3e8   :  { %v3220_v43 = vsel %vm8130_vm8, %v7013_v39, 0.0  ;;  %v3240_v54 = vmul.f32 %v7013_v39, %v7013_v39  ;;  %v7019_v1 = vpop.f32.mrb[11].mxu1  ;;  %vm8144_vm8 = vmmov %vm8110_vm0 }
 0x3e9   :  { %v3221_v14 = vadd.f32 %v3220_v43, %v3219_v16  ;;  %v3222_v3 = vsel %vm8131_vm13, %v7019_v1, 0.0  ;;  %v3241_v35 = vmul.f32 %v7019_v1, %v7019_v1  ;;  %vm8145_vm13 = vmmov %vm8110_vm0 }
 0x3ea   :  { %v3260_v56 = vsel %vm8132_vm6, %v3240_v54, 0.0  ;;  %vm8146_vm6 = vmmov %vm8110_vm0 }
 0x3eb   :  { %v3261_v58 = vadd.f32 %v3260_v56, %v3259_v6  ;;  %v3223_v21 = vadd.f32 %v3222_v3, %v3221_v14  ;;  %v3262_v37 = vsel %vm8133_vm1, %v3241_v35, 0.0  ;;  %vm8147_vm1 = vmmov %vm8110_vm0 }
 0x3ed   :  { %v3263_v2 = vadd.f32 %v3262_v37, %v3261_v58 }
 0x3ef   :  { %v7027_v48 = vpop.f32.mrb[12].mxu0 }
 0x3f0   :  { %v3224_v28 = vsel %vm8134_vm12, %v7027_v48, 0.0  ;;  %v3242_v57 = vmul.f32 %v7027_v48, %v7027_v48  ;;  %v3132_v5 = vpop.f32.mrb[13].mxu0  ;;  %vm8148_vm12 = vmmov %vm8110_vm0 }
 0x3f1   :  { %v3225_v63 = vadd.f32 %v3224_v28, %v3223_v21  ;;  %v3226_v18 = vsel %vm8135_vm5, %v3132_v5, 0.0  ;;  %v3243_v52 = vmul.f32 %v3132_v5, %v3132_v5  ;;  %v3319_v21 = vld [vmem:[%s7510_s3 + $0x8] sm:$0xff]  ;;  %vm8149_vm5 = vmmov %vm8110_vm0 }
 0x3f2   :  { %v3264_v22 = vsel %vm8136_vm11, %v3242_v57, 0.0  ;;  %vm8150_vm11 = vmmov %vm8110_vm0 }
 0x3f3   :  { %v3265_v17 = vadd.f32 %v3264_v22, %v3263_v2  ;;  %v3227_v45 = vadd.f32 %v3226_v18, %v3225_v63  ;;  %v3266_v7 = vsel %vm8137_vm4, %v3243_v52, 0.0  ;;  %vm8151_vm4 = vmmov %vm8110_vm0 }
 0x3f4   :  { %v7036_v50 = vpop.f32.mrb[12].mxu1 }
 0x3f5   :  { %v3228_v12 = vsel %vm8138_vm3, %v7036_v50, 0.0  ;;  %v3244_v8 = vmul.f32 %v7036_v50, %v7036_v50  ;;  %v4249_v36 = vpop.f32.mrb[13].mxu1  ;;  %v3267_v11 = vadd.f32 %v3266_v7, %v3265_v17  ;;  %vm8152_vm3 = vmmov %vm8110_vm0 }
 0x3f6   :  { %v3229_v55 = vadd.f32 %v3228_v12, %v3227_v45 }
 0x3f7   :  { %v3268_v51 = vsel %vm8139_vm7, %v3244_v8, 0.0  ;;  %vm3914_vm7 = vcmask 261120  }
 0x3f8   :  { %3230 = vadd.xlane.f32.xlu1 %v3229_v55  ;;  %v3269_v60 = vadd.f32 %v3268_v51, %v3267_v11 }
 0x3fa   :  { %3270 = vadd.xlane.f32.xlu0 %v3269_v60 }
 0x485   :  { %v3231_v4 = vpop.xlane.xlu1 %3230 }
 0x486   :  { %v7043_v46 = vmul.f32 0.0006377551, %v3231_v4 }
 0x487   :  { %v3271_v59 = vpop.xlane.xlu0 %3270 }
 0x488   :  { %v3273_v62 = vmul.f32 0.0006377551, %v3271_v59  ;;  %v3274_v40 = vmul.f32 %v7043_v46, %v7043_v46  ;;  %v3278_v13 = vsub.f32 %v6963_v9, %v7043_v46  ;;  %v3280_v30 = vsub.f32 %v6977_v23, %v7043_v46 }
 0x489   :  { %v3277_v27 = vsub.f32 %v6957_v41, %v7043_v46  ;;  %v3279_v34 = vsub.f32 %v6970_v0, %v7043_v46  ;;  %v3282_v61 = vsub.f32 %v6991_v47, %v7043_v46  ;;  %v3284_v49 = vsub.f32 %v7005_v29, %v7043_v46 }
 0x48a   :  { %v3275_v38 = vsub.f32 %v3273_v62, %v3274_v40  ;;  %v3281_v19 = vsub.f32 %v6985_v53, %v7043_v46  ;;  %v3283_v9 = vsub.f32 %v6999_v26, %v7043_v46  ;;  %v3286_v23 = vsub.f32 %v7019_v1, %v7043_v46  ;;  %v3318_v26 = vld [vmem:[%s7510_s3] sm:$0xff] }
 0x48b   :  { %v3288_v41 = vsub.f32 %v3132_v5, %v7043_v46  ;;  %v3285_v37 = vsub.f32 %v7013_v39, %v7043_v46  ;;  %v3287_v2 = vsub.f32 %v7027_v48, %v7043_v46  ;;  %v3289_v28 = vsub.f32 %v7036_v50, %v7043_v46 }
 0x48c   :  { %v3276_v20 = vmax.f32 %v3275_v38, 0.0 }
 0x48e   :  { %v3290_v42 = vadd.f32 1e-05, %v3276_v20 }
 0x490   :  { %4413 = vrsqrt.f32 %v3290_v42 }
 0x49a   :  { %v4414_v10 = vpop.eup %4413 }
 0x49b   :  { %v3293_v32 = vmul.f32 %v4414_v10, %v3278_v13  ;;  %v3295_v0 = vmul.f32 %v4414_v10, %v3280_v30  ;;  %v3292_v44 = vmul.f32 %v4414_v10, %v3277_v27  ;;  %v3294_v24 = vmul.f32 %v4414_v10, %v3279_v34 }
 0x49c   :  { %v3297_v47 = vmul.f32 %v4414_v10, %v3282_v61  ;;  %v3299_v33 = vmul.f32 %v4414_v10, %v3284_v49  ;;  %v3296_v31 = vmul.f32 %v4414_v10, %v3281_v19  ;;  %v3298_v29 = vmul.f32 %v4414_v10, %v3283_v9 }
 0x49d   :  { %v3306_v16 = vmax.f32 %v3293_v32, 0.0  ;;  %v3308_v15 = vmax.f32 %v3295_v0, 0.0  ;;  %v3305_v6 = vmax.f32 %v3292_v44, 0.0  ;;  %v3307_v53 = vmax.f32 %v3294_v24, 0.0 }
 0x49e   :  { %v3301_v43 = vmul.f32 %v4414_v10, %v3286_v23  ;;  %v3303_v54 = vmul.f32 %v4414_v10, %v3288_v41  ;;  %v3310_v1 = vmax.f32 %v3297_v47, 0.0  ;;  %v3312_v14 = vmax.f32 %v3299_v33, 0.0 }
 0x49f   :  { %4191 = vmatprep.subr.msk.mxu0 %vm8110_vm0, %v3306_v16  ;;  %4195 = vmatprep.subr.msk.mxu1 %vm8140_vm10, %v3308_v15  ;;  %v3309_v3 = vmax.f32 %v3296_v31, 0.0  ;;  %v3311_v35 = vmax.f32 %v3298_v29, 0.0  ;;  %v3300_v57 = vmul.f32 %v4414_v10, %v3285_v37  ;;  %v3302_v5 = vmul.f32 %v4414_v10, %v3287_v2 }
 0x4a0   :  { %4192 = vmatpush1.msk.msra.mxu0 %vm8141_vm15, %v3305_v6  ;;  %4196 = vmatpush1.msk.msra.mxu1 %vm8142_vm2, %v3307_v53  ;;  %v3314_v56 = vmax.f32 %v3301_v43, 0.0  ;;  %v3316_v58 = vmax.f32 %v3303_v54, 0.0  ;;  %v3304_v39 = vmul.f32 %v4414_v10, %v3289_v28 }
 0x4a1   :  { %4193 = vmatmul.mubr.msk.f32.vlgmr.msra.gmra.mrb[14].mxu0 %vm3320_vm9, %v3318_v26  ;;  %4197 = vmatmul.mubr.msk.f32.vlgmr.msra.gmra.mrb[14].mxu1 %vm3320_vm9, %v3318_v26  ;;  %v3313_v48 = vmax.f32 %v3300_v57, 0.0  ;;  %v3315_v63 = vmax.f32 %v3302_v5, 0.0 }
 0x4a2   :  { %4199 = vmatprep.subr.msk.mxu0 %vm8143_vm14, %v3310_v1  ;;  %4203 = vmatprep.subr.msk.mxu1 %vm8144_vm8, %v3312_v14  ;;  %v3317_v18 = vmax.f32 %v3304_v39, 0.0 }
 0x4a3   :  { %4200 = vmatpush1.msk.msra.mxu0 %vm8145_vm13, %v3309_v3  ;;  %4204 = vmatpush1.msk.msra.mxu1 %vm8146_vm6, %v3311_v35 }
 0x4a4   :  { %4207 = vmatprep.subr.msk.mxu0 %vm8147_vm1, %v3314_v56  ;;  %4211 = vmatprep.subr.msk.mxu1 %vm8148_vm12, %v3316_v58 }
 0x4a5   :  { %3436 = vmatprep.mubr.f32.mxu0 %v8038_v25  ;;  %3513 = vmatprep.mubr.f32.mxu1 %v8038_v25 }
 0x4a6   :  { %4194 = vmatmul.mubr.msk.f32.gmra.mrb[16].mxu0 %vm3320_vm9, %v3319_v21  ;;  %4198 = vmatmul.mubr.msk.f32.gmra.mrb[16].mxu1 %vm3320_vm9, %v3319_v21 }
 0x4a7   :  { %3584 = vmatprep.mubr.f32.mxu0 %v8038_v25  ;;  %3661 = vmatprep.mubr.f32.mxu1 %v8038_v25 }
 0x4aa   :  { %4201 = vmatmul.mubr.msk.f32.vlgmr.msra.gmra.mrb[18].mxu0 %vm3320_vm9, %v3318_v26  ;;  %4205 = vmatmul.mubr.msk.f32.vlgmr.msra.gmra.mrb[18].mxu1 %vm3320_vm9, %v3318_v26 }
 0x4ab   :  { %4208 = vmatpush1.msk.msra.mxu0 %vm8149_vm5, %v3313_v48  ;;  %4212 = vmatpush1.msk.msra.mxu1 %vm8150_vm11, %v3315_v63 }
 0x4ac   :  { %4250 = vmatprep.subr.msk.mxu0 %vm8151_vm4, %v3317_v18  ;;  %3590 = vmatprep.mubr.f32.mxu0 %v8038_v25 }
 0x4ad   :  { %3667 = vmatprep.mubr.f32.mxu1 %v8038_v25 }
 0x4ae   :  { %4202 = vmatmul.mubr.msk.f32.gmra.mrb[20].mxu0 %vm3320_vm9, %v3319_v21  ;;  %4206 = vmatmul.mubr.msk.f32.gmra.mrb[20].mxu1 %vm3320_vm9, %v3319_v21 }
 0x4af   :  { %3738 = vmatprep.mubr.f32.mxu0 %v8038_v25  ;;  %3815 = vmatprep.mubr.f32.mxu1 %v8038_v25 }
 0x4b2   :  { %4209 = vmatmul.mubr.msk.f32.vlgmr.msra.gmra.mrb[22].mxu0 %vm3320_vm9, %v3318_v26  ;;  %4213 = vmatmul.mubr.msk.f32.vlgmr.msra.gmra.mrb[22].mxu1 %vm3320_vm9, %v3318_v26 }
 0x4b3   :  { %4251 = vmatpush3.msk.msra.mxu0 %vm8152_vm3, %v3317_v18  ;;  %3744 = vmatprep.mubr.f32.mxu0 %v8038_v25 }
 0x4b4   :  { %3821 = vmatprep.mubr.f32.mxu1 %v8038_v25 }
 0x4b6   :  { %4210 = vmatmul.mubr.msk.f32.gmra.mrb[24].mxu0 %vm3320_vm9, %v3319_v21  ;;  %4214 = vmatmul.mubr.msk.f32.gmra.mrb[24].mxu1 %vm3320_vm9, %v3319_v21 }
 0x4b7   :  { %4252 = vmatprep.mubr.msk.f32.mxu0 %vm3320_vm9, %v3318_v26 }
 0x4ba   :  { %4253 = vmatmul.mubr.msk.f32.vlgmr.msra.gmra.mrb[26].mxu0 %vm3320_vm9, %v3319_v21 }
 0x574   :  { %v7116_v52 = vpop.f32.mrb[14].mxu0  ;;  %v7118_v22 = vpop.f32.mrb[14].mxu1 }
 0x575   :  { %v3934_v17 = vmul.f32 %v7116_v52, %v7116_v52  ;;  %v7122_v45 = vpop.f32.mrb[15].mxu0  ;;  %v7124_v7 = vpop.f32.mrb[15].mxu1  ;;  %v3936_v12 = vmul.f32 %v7118_v22, %v7118_v22 }
 0x576   :  { %v3903_v25 = vadd.f32 %v7122_v45, %v7116_v52  ;;  %v3935_v50 = vmul.f32 %v7122_v45, %v7122_v45  ;;  %v3937_v11 = vmul.f32 %v7124_v7, %v7124_v7 }
 0x578   :  { %v3960_v8 = vadd.f32 %v3935_v50, %v3934_v17  ;;  %v3904_v36 = vadd.f32 %v3903_v25, %v7118_v22 }
 0x579   :  { %v7135_v55 = vpop.f32.mrb[16].mxu0  ;;  %v7137_v51 = vpop.f32.mrb[16].mxu1 }
 0x57a   :  { %v3947_v60 = vmul.f32 %v7135_v55, %v7135_v55  ;;  %v3961_v4 = vadd.f32 %v3960_v8, %v3936_v12  ;;  %v7141_v46 = vpop.f32.mrb[17].mxu0  ;;  %v3905_v59 = vadd.f32 %v3904_v36, %v7124_v7  ;;  %v7144_v62 = vpop.f32.mrb[17].mxu1  ;;  %v3949_v20 = vmul.f32 %v7137_v51, %v7137_v51 }
 0x57b   :  { %v3919_v40 = vadd.f32 %v7141_v46, %v7135_v55  ;;  %v3948_v38 = vmul.f32 %v7141_v46, %v7141_v46  ;;  %v3950_v34 = vmul.f32 %v7144_v62, %v7144_v62 }
 0x57c   :  { %v3962_v42 = vadd.f32 %v3961_v4, %v3937_v11 }
 0x57d   :  { %v3975_v13 = vadd.f32 %v3948_v38, %v3947_v60  ;;  %v3920_v30 = vadd.f32 %v3919_v40, %v7137_v51  ;;  %v7153_v27 = vpop.f32.mrb[18].mxu0  ;;  %v7157_v61 = vpop.f32.mrb[18].mxu1 }
 0x57e   :  { %v3906_v49 = vadd.f32 %v3905_v59, %v7153_v27  ;;  %v3938_v10 = vmul.f32 %v7153_v27, %v7153_v27  ;;  %v7162_v19 = vpop.f32.mrb[19].mxu0  ;;  %v7164_v9 = vpop.f32.mrb[19].mxu1  ;;  %v3940_v24 = vmul.f32 %v7157_v61, %v7157_v61 }
 0x57f   :  { %v3976_v23 = vadd.f32 %v3975_v13, %v3949_v20  ;;  %v3921_v41 = vadd.f32 %v3920_v30, %v7144_v62  ;;  %v3939_v32 = vmul.f32 %v7162_v19, %v7162_v19  ;;  %v3941_v54 = vmul.f32 %v7164_v9, %v7164_v9 }
 0x580   :  { %v3963_v0 = vadd.f32 %v3962_v42, %v3938_v10  ;;  %v3907_v44 = vadd.f32 %v3906_v49, %v7162_v19 }
 0x581   :  { %v3977_v47 = vadd.f32 %v3976_v23, %v3950_v34  ;;  %v7172_v33 = vpop.f32.mrb[20].mxu0  ;;  %v7174_v31 = vpop.f32.mrb[20].mxu1 }
 0x582   :  { %v3964_v29 = vadd.f32 %v3963_v0, %v3939_v32  ;;  %v3922_v16 = vadd.f32 %v3921_v41, %v7172_v33  ;;  %v3951_v15 = vmul.f32 %v7172_v33, %v7172_v33  ;;  %v3908_v6 = vadd.f32 %v3907_v44, %v7157_v61  ;;  %v7180_v53 = vpop.f32.mrb[21].mxu0  ;;  %v7182_v26 = vpop.f32.mrb[21].mxu1 }
 0x583   :  { %v3952_v43 = vmul.f32 %v7180_v53, %v7180_v53  ;;  %v3953_v1 = vmul.f32 %v7174_v31, %v7174_v31  ;;  %v3954_v25 = vmul.f32 %v7182_v26, %v7182_v26 }
 0x584   :  { %v3978_v14 = vadd.f32 %v3977_v47, %v3951_v15  ;;  %v3965_v3 = vadd.f32 %v3964_v29, %v3940_v24  ;;  %v3923_v35 = vadd.f32 %v3922_v16, %v7180_v53  ;;  %v3909_v56 = vadd.f32 %v3908_v6, %v7164_v9 }
 0x585   :  { %v7192_v58 = vpop.f32.mrb[22].mxu0  ;;  %v7194_v21 = vpop.f32.mrb[22].mxu1 }
 0x586   :  { %v3979_v37 = vadd.f32 %v3978_v14, %v3952_v43  ;;  %v3966_v2 = vadd.f32 %v3965_v3, %v3941_v54  ;;  %v3924_v28 = vadd.f32 %v3923_v35, %v7174_v31  ;;  %v3910_v57 = vadd.f32 %v3909_v56, %v7192_v58  ;;  %v7198_v5 = vpop.f32.mrb[23].mxu0  ;;  %v7200_v39 = vpop.f32.mrb[23].mxu1 }
 0x587   :  { %v3942_v48 = vmul.f32 %v7192_v58, %v7192_v58  ;;  %v3943_v63 = vmul.f32 %v7198_v5, %v7198_v5  ;;  %v3944_v36 = vmul.f32 %v7194_v21, %v7194_v21  ;;  %v3945_v41 = vmul.f32 %v7200_v39, %v7200_v39 }
 0x588   :  { %v3980_v18 = vadd.f32 %v3979_v37, %v3953_v1  ;;  %v3925_v17 = vadd.f32 %v3924_v28, %v7182_v26  ;;  %v3911_v50 = vadd.f32 %v3910_v57, %v7198_v5 }
 0x589   :  { %v3967_v12 = vadd.f32 %v3966_v2, %v3942_v48  ;;  %v7210_v8 = vpop.f32.mrb[24].mxu0  ;;  %v7214_v11 = vpop.f32.mrb[24].mxu1 }
 0x58a   :  { %v3981_v60 = vadd.f32 %v3980_v18, %v3954_v25  ;;  %v3926_v4 = vadd.f32 %v3925_v17, %v7210_v8  ;;  %v3955_v59 = vmul.f32 %v7210_v8, %v7210_v8  ;;  %v3912_v40 = vadd.f32 %v3911_v50, %v7194_v21  ;;  %v7220_v38 = vpop.f32.mrb[25].mxu0  ;;  %v7222_v20 = vpop.f32.mrb[25].mxu1 }
 0x58b   :  { %v3968_v42 = vadd.f32 %v3967_v12, %v3943_v63  ;;  %v3956_v13 = vmul.f32 %v7220_v38, %v7220_v38  ;;  %v3957_v10 = vmul.f32 %v7214_v11, %v7214_v11  ;;  %v3958_v14 = vmul.f32 %v7222_v20, %v7222_v20 }
 0x58c   :  { %v3982_v30 = vadd.f32 %v3981_v60, %v3955_v59  ;;  %v3927_v34 = vadd.f32 %v3926_v4, %v7220_v38  ;;  %v3913_v49 = vadd.f32 %v3912_v40, %v7200_v39 }
 0x58d   :  { %v3969_v23 = vadd.f32 %v3968_v42, %v3944_v36  ;;  %v7232_v32 = vpop.f32.mrb[26].mxu0 }
 0x58e   :  { %v3983_v0 = vadd.f32 %v3982_v30, %v3956_v13  ;;  %v3928_v44 = vadd.f32 %v3927_v34, %v7214_v11  ;;  %v3959_v24 = vmul.f32 %v7232_v32, %v7232_v32  ;;  %v7237_v47 = vpop.f32.mrb[27].mxu0  ;;  %v3930_v16 = vsel %vm3914_vm7, %v7232_v32, 0.0 }
 0x58f   :  { %v3970_v29 = vadd.f32 %v3969_v23, %v3945_v41  ;;  %v3915_v15 = vsel %vm3914_vm7, %v7237_v47, 0.0  ;;  %v3946_v6 = vmul.f32 %v7237_v47, %v7237_v47 }
 0x590   :  { %v3984_v43 = vadd.f32 %v3983_v0, %v3957_v10  ;;  %v3916_v54 = vadd.f32 %v3915_v15, %v3913_v49  ;;  %v3929_v1 = vadd.f32 %v3928_v44, %v7222_v20  ;;  %v3986_v35 = vsel %vm3914_vm7, %v3959_v24, 0.0 }
 0x591   :  { %v3971_v3 = vsel %vm3914_vm7, %v3946_v6, 0.0 }
 0x592   :  { %v3931_v56 = vadd.f32 %v3930_v16, %v3929_v1  ;;  %v3985_v37 = vadd.f32 %v3984_v43, %v3958_v14  ;;  %3917 = vadd.xlane.f32.xlu0 %v3916_v54  ;;  %v3972_v2 = vadd.f32 %v3971_v3, %v3970_v29  ;;  %v4056_v1 = vld [vmem:[%s7507_s0] sm:$0xff]  ;;  %v4057_v14 = vld [vmem:[%s7507_s0 + $0x8] sm:$0xff]  ;;  %v4058_v3 = vld [vmem:[%s7507_s0 + $0x10] sm:$0xff] }
 0x594   :  { %3932 = vadd.xlane.f32.xlu1 %v3931_v56  ;;  %v3987_v28 = vadd.f32 %v3986_v35, %v3985_v37  ;;  %v4059_v35 = vld [vmem:[%s7507_s0 + $0x18] sm:$0xff]  ;;  %v4060_v56 = vld [vmem:[%s7507_s0 + $0x20] sm:$0xff] }
 0x596   :  { %3973 = vadd.xlane.f32.xlu0 %v3972_v2 }
 0x598   :  { %3988 = vadd.xlane.f32.xlu1 %v3987_v28 }
 0x61f   :  { %v3918_v57 = vpop.xlane.xlu0 %3917 }
 0x620   :  { %v7250_v18 = vmul.f32 0.0006377551, %v3918_v57 }
 0x621   :  { %v3933_v48 = vpop.xlane.xlu1 %3932 }
 0x622   :  { %v7252_v25 = vmul.f32 0.0006377551, %v3933_v48  ;;  %v3994_v12 = vmul.f32 %v7250_v18, %v7250_v18  ;;  %v4000_v34 = vsub.f32 %v7116_v52, %v7250_v18  ;;  %v4001_v49 = vsub.f32 %v7122_v45, %v7250_v18  ;;  %v4061_v48 = vld [vmem:[%s7507_s0 + $0x28] sm:$0xff] }
 0x623   :  { %v3974_v63 = vpop.xlane.xlu0 %3973  ;;  %v4002_v10 = vsub.f32 %v7118_v22, %v7250_v18  ;;  %v4003_v23 = vsub.f32 %v7124_v7, %v7250_v18  ;;  %v4004_v41 = vsub.f32 %v7153_v27, %v7250_v18  ;;  %v4005_v0 = vsub.f32 %v7162_v19, %v7250_v18 }
 0x624   :  { %v3992_v50 = vmul.f32 0.0006377551, %v3974_v63  ;;  %v3995_v4 = vmul.f32 %v7252_v25, %v7252_v25  ;;  %v4006_v44 = vsub.f32 %v7157_v61, %v7250_v18  ;;  %v4007_v52 = vsub.f32 %v7164_v9, %v7250_v18  ;;  %v4062_v63 = vld [vmem:[%s7507_s0 + $0x30] sm:$0xff] }
 0x625   :  { %v3989_v17 = vpop.xlane.xlu1 %3988  ;;  %v4008_v45 = vsub.f32 %v7192_v58, %v7250_v18  ;;  %v4009_v22 = vsub.f32 %v7198_v5, %v7250_v18  ;;  %v4010_v7 = vsub.f32 %v7194_v21, %v7250_v18  ;;  %v4011_v27 = vsub.f32 %v7200_v39, %v7250_v18 }
 0x626   :  { %v3993_v36 = vmul.f32 0.0006377551, %v3989_v17  ;;  %v3996_v60 = vsub.f32 %v3992_v50, %v3994_v12  ;;  %v4012_v19 = vsub.f32 %v7237_v47, %v7250_v18  ;;  %v4013_v61 = vsub.f32 %v7135_v55, %v7252_v25  ;;  %v4063_v18 = vld [vmem:[%s7507_s0 + $0x38] sm:$0xff]  ;;  %v4072_v55 = vld [vmem:[%s7507_s0 + $0x80] sm:$0xff] }
 0x627   :  { %v4014_v9 = vsub.f32 %v7141_v46, %v7252_v25  ;;  %v4015_v58 = vsub.f32 %v7137_v51, %v7252_v25  ;;  %v4075_v51 = vld [vmem:[%s7507_s0 + $0x98] sm:$0xff]  ;;  %v4076_v46 = vld [vmem:[%s7507_s0 + $0xa0] sm:$0xff] }
 0x628   :  { %v3998_v59 = vmax.f32 %v3996_v60, 0.0  ;;  %v3997_v40 = vsub.f32 %v3993_v36, %v3995_v4  ;;  %v4064_v60 = vld [vmem:[%s7507_s0 + $0x40] sm:$0xff]  ;;  %v4065_v4 = vld [vmem:[%s7507_s0 + $0x48] sm:$0xff] }
 0x62a   :  { %v4026_v42 = vadd.f32 1e-05, %v3998_v59  ;;  %v3999_v13 = vmax.f32 %v3997_v40, 0.0  ;;  %v4066_v59 = vld [vmem:[%s7507_s0 + $0x50] sm:$0xff] }
 0x62c   :  { %4415 = vrsqrt.f32 %v4026_v42  ;;  %v4027_v30 = vadd.f32 1e-05, %v3999_v13 }
 0x62e   :  { %4417 = vrsqrt.f32 %v4027_v30 }
 0x636   :  { %v4416_v16 = vpop.eup %4415 }
 0x637   :  { %v4030_v37 = vmul.f32 %v4416_v16, %v4000_v34  ;;  %v4031_v2 = vmul.f32 %v4416_v16, %v4001_v49  ;;  %v4032_v28 = vmul.f32 %v4416_v16, %v4002_v10  ;;  %v4033_v57 = vmul.f32 %v4416_v16, %v4003_v23  ;;  %v4067_v34 = vld [vmem:[%s7507_s0 + $0x58] sm:$0xff]  ;;  %v4068_v49 = vld [vmem:[%s7507_s0 + $0x60] sm:$0xff] }
 0x638   :  { %v4034_v17 = vmul.f32 %v4416_v16, %v4004_v41  ;;  %v4035_v50 = vmul.f32 %v4416_v16, %v4005_v0  ;;  %v4036_v12 = vmul.f32 %v4416_v16, %v4006_v44  ;;  %v4037_v36 = vmul.f32 %v4416_v16, %v4007_v52  ;;  %v4418_v6 = vpop.eup %4417 }
 0x639   :  { %v4038_v40 = vmul.f32 %v4416_v16, %v4008_v45  ;;  %v4039_v42 = vmul.f32 %v4416_v16, %v4009_v22  ;;  %v4040_v13 = vmul.f32 %v4416_v16, %v4010_v7  ;;  %v4041_v30 = vmul.f32 %v4416_v16, %v4011_v27 }
 0x63a   :  { %v4042_v10 = vmul.f32 %v4416_v16, %v4012_v19  ;;  %v4082_v23 = vadd.f32 %v4056_v1, %v4030_v37  ;;  %v4083_v41 = vadd.f32 %v4057_v14, %v4031_v2  ;;  %v4084_v0 = vadd.f32 %v4058_v3, %v4032_v28 }
 0x63b   :  { %v4085_v44 = vadd.f32 %v4059_v35, %v4033_v57  ;;  %v4086_v52 = vadd.f32 %v4060_v56, %v4034_v17  ;;  %v4087_v54 = vadd.f32 %v4061_v48, %v4035_v50  ;;  %v4088_v43 = vadd.f32 %v4062_v63, %v4036_v12  ;;  %v4078_v50 = vld [vmem:[%s7507_s0 + $0xb0] sm:$0xff] }
 0x63c   :  { %v4089_v45 = vadd.f32 %v4063_v18, %v4037_v36  ;;  %v4090_v22 = vadd.f32 %v4064_v60, %v4038_v40  ;;  %v4091_v7 = vadd.f32 %v4065_v4, %v4039_v42  ;;  %v4092_v27 = vadd.f32 %v4066_v59, %v4040_v13  ;;  %v4081_v42 = vld [vmem:[%s7507_s0 + $0xc8] sm:$0xff] }
 0x63d   :  { %v4093_v15 = vadd.f32 %v4067_v34, %v4041_v30  ;;  %v4094_v29 = vadd.f32 %v4068_v49, %v4042_v10  ;;  %v4108_v47 = vmax.f32 %v4082_v23, 0.0  ;;  %v4109_v24 = vmax.f32 %v4083_v41, 0.0 }
 0x63e   :  { %v4110_v39 = vmax.f32 %v4084_v0, 0.0  ;;  %v4111_v21 = vmax.f32 %v4085_v44, 0.0  ;;  %v4112_v5 = vmax.f32 %v4086_v52, 0.0  ;;  %v4113_v19 = vmax.f32 %v4087_v54, 0.0 }
 0x63f   :  { %v4114_v16 = vmax.f32 %v4088_v43, 0.0  ;;  %v4115_v1 = vmax.f32 %v4089_v45, 0.0  ;;  %v4116_v14 = vmax.f32 %v4090_v22, 0.0  ;;  %v4117_v3 = vmax.f32 %v4091_v7, 0.0  ;;  %4134 = vst [vmem:[%s7511_s4] sm:$0xff] %v4108_v47  ;;  %4135 = vst [vmem:[%s7511_s4 + $0x8] sm:$0xff] %v4109_v24  ;;  %v4069_v24 = vld [vmem:[%s7507_s0 + $0x68] sm:$0xff] }
 0x640   :  { %v4118_v35 = vmax.f32 %v4092_v27, 0.0  ;;  %v4119_v56 = vmax.f32 %v4093_v15, 0.0  ;;  %v4120_v37 = vmax.f32 %v4094_v29, 0.0  ;;  %4136 = vst [vmem:[%s7511_s4 + $0x10] sm:$0xff] %v4110_v39  ;;  %4137 = vst [vmem:[%s7511_s4 + $0x18] sm:$0xff] %v4111_v21  ;;  %v4070_v39 = vld [vmem:[%s7507_s0 + $0x70] sm:$0xff]  ;;  %v4044_v29 = vmul.f32 %v4418_v6, %v4014_v9 }
 0x641   :  { %4138 = vst [vmem:[%s7511_s4 + $0x20] sm:$0xff] %v4112_v5  ;;  %4139 = vst [vmem:[%s7511_s4 + $0x28] sm:$0xff] %v4113_v19  ;;  %v4071_v21 = vld [vmem:[%s7507_s0 + $0x78] sm:$0xff]  ;;  %v4043_v5 = vmul.f32 %v4418_v6, %v4013_v61  ;;  %v4073_v61 = vld [vmem:[%s7507_s0 + $0x88] sm:$0xff]  ;;  %v4045_v15 = vmul.f32 %v4418_v6, %v4015_v58  ;;  %v8153_v43 = vsub.f32 %v7144_v62, %v7252_v25 }
 0x642   :  { %4140 = vst [vmem:[%s7511_s4 + $0x30] sm:$0xff] %v4114_v16  ;;  %4141 = vst [vmem:[%s7511_s4 + $0x38] sm:$0xff] %v4115_v1  ;;  %v4074_v47 = vld [vmem:[%s7507_s0 + $0x90] sm:$0xff]  ;;  %v8154_v2 = vsub.f32 %v7172_v33, %v7252_v25  ;;  %v4077_v62 = vld [vmem:[%s7507_s0 + $0xa8] sm:$0xff]  ;;  %v8155_v33 = vsub.f32 %v7180_v53, %v7252_v25  ;;  %v8156_v58 = vsub.f32 %v7174_v31, %v7252_v25 }
 0x643   :  { %4142 = vst [vmem:[%s7511_s4 + $0x40] sm:$0xff] %v4116_v14  ;;  %4143 = vst [vmem:[%s7511_s4 + $0x48] sm:$0xff] %v4117_v3  ;;  %v4046_v54 = vmul.f32 %v4418_v6, %v8153_v43  ;;  %v8157_v48 = vsub.f32 %v7182_v26, %v7252_v25  ;;  %v8158_v18 = vsub.f32 %v7210_v8, %v7252_v25  ;;  %v4079_v53 = vld [vmem:[%s7507_s0 + $0xb8] sm:$0xff]  ;;  %v4080_v31 = vld [vmem:[%s7507_s0 + $0xc0] sm:$0xff] }
 0x644   :  { %v4047_v28 = vmul.f32 %v4418_v6, %v8154_v2  ;;  %4144 = vst [vmem:[%s7511_s4 + $0x50] sm:$0xff] %v4118_v35  ;;  %4145 = vst [vmem:[%s7511_s4 + $0x58] sm:$0xff] %v4119_v56  ;;  %v4048_v9 = vmul.f32 %v4418_v6, %v8155_v33  ;;  %v4049_v57 = vmul.f32 %v4418_v6, %v8156_v58 }
 0x645   :  { %4146 = vst.msk [vmem:[%s7511_s4 + $0x60] sm:$0xff] %vm3914_vm7, %v4120_v37  ;;  %v4050_v63 = vmul.f32 %v4418_v6, %v8157_v48  ;;  %v4051_v17 = vmul.f32 %v4418_v6, %v8158_v18  ;;  %v8159_v26 = vsub.f32 %v7220_v38, %v7252_v25  ;;  %v8160_v8 = vsub.f32 %v7214_v11, %v7252_v25 }
 0x646   :  { %v8161_v60 = vsub.f32 %v7222_v20, %v7252_v25  ;;  %v8162_v59 = vsub.f32 %v7232_v32, %v7252_v25  ;;  %v4095_v13 = vadd.f32 %v4069_v24, %v4043_v5  ;;  %v4096_v30 = vadd.f32 %v4070_v39, %v4044_v29 }
 0x647   :  { %v4052_v12 = vmul.f32 %v4418_v6, %v8159_v26  ;;  %v4053_v36 = vmul.f32 %v4418_v6, %v8160_v8  ;;  %v4097_v38 = vadd.f32 %v4071_v21, %v4045_v15  ;;  %v4098_v34 = vadd.f32 %v4072_v55, %v4046_v54 }
 0x648   :  { %v4054_v4 = vmul.f32 %v4418_v6, %v8161_v60  ;;  %v4055_v40 = vmul.f32 %v4418_v6, %v8162_v59  ;;  %v4099_v49 = vadd.f32 %v4073_v61, %v4047_v28  ;;  %v4100_v10 = vadd.f32 %v4074_v47, %v4048_v9 }
 0x649   :  { %v4101_v11 = vadd.f32 %v4075_v51, %v4049_v57  ;;  %v4102_v23 = vadd.f32 %v4076_v46, %v4050_v63  ;;  %v4103_v41 = vadd.f32 %v4077_v62, %v4051_v17  ;;  %v4104_v0 = vadd.f32 %v4078_v50, %v4052_v12 }
 0x64a   :  { %v4105_v20 = vadd.f32 %v4079_v53, %v4053_v36  ;;  %v4106_v44 = vadd.f32 %v4080_v31, %v4054_v4  ;;  %v4107_v52 = vadd.f32 %v4081_v42, %v4055_v40  ;;  %v4121_v45 = vmax.f32 %v4095_v13, 0.0 }
 0x64b   :  { %v4122_v32 = vmax.f32 %v4096_v30, 0.0  ;;  %v4123_v25 = vmax.f32 %v4097_v38, 0.0  ;;  %v4124_v6 = vmax.f32 %v4098_v34, 0.0  ;;  %v4125_v22 = vmax.f32 %v4099_v49, 0.0 }
 0x64c   :  { %v4126_v7 = vmax.f32 %v4100_v10, 0.0  ;;  %v4127_v27 = vmax.f32 %v4101_v11, 0.0  ;;  %v4128_v19 = vmax.f32 %v4102_v23, 0.0  ;;  %v4129_v16 = vmax.f32 %v4103_v41, 0.0  ;;  %4147 = vst [vmem:[%s7511_s4 + $0x68] sm:$0xff] %v4121_v45 }
 0x64d   :  { %v4130_v1 = vmax.f32 %v4104_v0, 0.0  ;;  %v4131_v14 = vmax.f32 %v4105_v20, 0.0  ;;  %4148 = vst [vmem:[%s7511_s4 + $0x70] sm:$0xff] %v4122_v32  ;;  %4149 = vst [vmem:[%s7511_s4 + $0x78] sm:$0xff] %v4123_v25  ;;  %v4132_v3 = vmax.f32 %v4106_v44, 0.0  ;;  %v4133_v35 = vmax.f32 %v4107_v52, 0.0 }
 0x64e   :  { %4150 = vst [vmem:[%s7511_s4 + $0x80] sm:$0xff] %v4124_v6  ;;  %4151 = vst [vmem:[%s7511_s4 + $0x88] sm:$0xff] %v4125_v22 }
 0x64f   :  { %4152 = vst [vmem:[%s7511_s4 + $0x90] sm:$0xff] %v4126_v7  ;;  %4153 = vst [vmem:[%s7511_s4 + $0x98] sm:$0xff] %v4127_v27 }
 0x650   :  { %4154 = vst [vmem:[%s7511_s4 + $0xa0] sm:$0xff] %v4128_v19  ;;  %4155 = vst [vmem:[%s7511_s4 + $0xa8] sm:$0xff] %v4129_v16 }
 0x651   :  { %4156 = vst [vmem:[%s7511_s4 + $0xb0] sm:$0xff] %v4130_v1  ;;  %4157 = vst [vmem:[%s7511_s4 + $0xb8] sm:$0xff] %v4131_v14 }
 0x652   :  { %4158 = vst [vmem:[%s7511_s4 + $0xc0] sm:$0xff] %v4132_v3  ;;  %4159 = vst.msk [vmem:[%s7511_s4 + $0xc8] sm:$0xff] %vm3914_vm7, %v4133_v35 }

</bundles_post_ra>
